<compile_context>
chip_gen: v7x
topology: tpu7x:2x2x1
jax: 0.10.0
libtpu: 0.0.40
codegen_flags: <defaults>
</compile_context>

<pallas_src>
import math

import jax
import jax.numpy as jnp
from jax import lax
from jax.experimental import pallas as pl
from jax.experimental.pallas import tpu as pltpu


def get_padding_centered(kernel_size, stride):
    # cc.get_padding(kernel_size, stride, mode='centered'); the module uses [0]
    # and passes it as symmetric padding to nn.Conv1d.
    if kernel_size == 1:
        return (0, 0)
    p = kernel_size - stride
    return (p // 2 + p % 2, p // 2)


def _choose_tile(l_final, n_batch, t_max=1024):
    """Tile of the final layer's length axis: multiple of 128 dividing l_final."""
    if l_final <= 128:
        return l_final                       # tiny inputs: one (sub-lane) tile
    cands = [t for t in range(128, min(t_max, l_final) + 1, 128)
             if l_final % t == 0]
    if not cands:
        # TODO(synk): masked remainder-tile path; a single huge tile can exceed
        # v7x's 32 MiB scoped VMEM for very long, non-128-divisible inputs.
        return l_final
    for t in reversed(cands):                # largest tile that still leaves
        if n_batch * (l_final // t) >= 2:    # >=2 parallel grid steps (v7x 2 TCs)
            return t
    return cands[-1]


def _fused_config(L, strides, pads, K, T):
    """Static polyphase-tree configuration for the fused kernel."""
    n = len(strides)
    L_lv = [L]
    for i in range(n):
        L_lv.append((L_lv[i] + 2 * pads[i] - K) // strides[i] + 1)
    # R[lvl]: remaining phase count after level lvl (prod of downstream strides)
    R = [0] * (n + 1)
    R[n] = 1
    for lvl in range(n - 1, -1, -1):
        R[lvl] = strides[lvl] * R[lvl + 1]
    for lvl in range(n + 1):
        if L_lv[lvl] != R[lvl] * L_lv[n]:
            raise ValueError("fused ConvNet kernel assumes L divisible by "
                             "prod(strides) (exact length chain)")
    # c[lvl]: left halo offset of level lvl relative to its aligned tile start
    c = [0] * (n + 1)
    for lvl in range(n - 1, -1, -1):
        c[lvl] = strides[lvl] * c[lvl + 1] + pads[lvl]
    # dmax[lvl]: max extra lane offset when level lvl reads level lvl-1 phases
    dmax = [0] * (n + 1)
    for lvl in range(1, n + 1):
        dmax[lvl] = (strides[lvl - 1] * (R[lvl] - 1) + K - 1) // R[lvl - 1]
    # M[lvl]: per-phase buffer length at level lvl (access chain + feature write)
    M = [0] * (n + 1)
    M[n] = T
    for lvl in range(n - 1, -1, -1):
        need_chain = M[lvl + 1] + dmax[lvl + 1]
        need_feat = (T + (c[lvl] + R[lvl] - 1) // R[lvl]) if lvl >= 1 else 0
        M[lvl] = max(need_chain, need_feat)
    return dict(n=n, L_lv=L_lv, R=R, c=c, M=M)


def convnet_forward_pallas(x, params, strides, pads, kernel_size, t_max=1024):
    """Fused ConvNet.forward: returns the list of conv outputs, (N, C, L) layout."""
    N, C0, L = x.shape
    n = len(params) - 1                      # number of strided conv layers
    K = int(kernel_size)
    assert strides[n] == 1 and pads[n] == 0 and params[n][0].shape[2] == 1
    conv_strides = [int(s) for s in strides[:n]]
    conv_pads = [int(p) for p in pads[:n]]
    channels = [C0] + [w.shape[0] for (w, _) in params[:n]]
    out_size = params[n][0].shape[0]

    cfg = _fused_config(L, conv_strides, conv_pads, K, 1)  # probe lengths only
    L_lv = cfg["L_lv"]
    L_fin = L_lv[n]
    T = _choose_tile(L_fin, N, t_max)
    assert L_fin % T == 0
    ntiles = L_fin // T
    cfg = _fused_config(L, conv_strides, conv_pads, K, T)
    R, c, M = cfg["R"], cfg["c"], cfg["M"]

    # ---- ONLY wrapper-side data movement: pad + per-tile phase windows of the
    # raw input (smallest tensor, ~1x its bytes).  No per-layer activation glue.
    R0, M0, c0 = R[0], M[0], c[0]
    win = R0 * M0
    right = max(0, R0 * T * (ntiles - 1) + win - (c0 + L))
    xz = jnp.pad(x, ((0, 0), (0, 0), (c0, right)))
    wins = [xz[:, :, R0 * T * t0:R0 * T * t0 + win] for t0 in range(ntiles)]
    xw = jnp.stack(wins, axis=1)                                      # (N, nt, C0, win)
    xw = xw.reshape(N, ntiles, C0, M0, R0).transpose(0, 1, 4, 2, 3)   # (N, nt, R0, C0, M0)

    # weights: per-tap (K, C_out, C_in) + (C_out, 1) bias; head (out, C_last)
    flat_wb, wb_specs = [], []
    for i in range(n):
        wt = jnp.transpose(params[i][0], (2, 0, 1)).astype(jnp.float32)
        bt = params[i][1].reshape(-1, 1).astype(jnp.float32)
        flat_wb += [wt, bt]
        wb_specs += [pl.BlockSpec(wt.shape, lambda nn, ll: (0, 0, 0)),
                     pl.BlockSpec(bt.shape, lambda nn, ll: (0, 0))]
    wh = params[n][0].reshape(out_size, channels[n]).astype(jnp.float32)
    bh = params[n][1].reshape(out_size, 1).astype(jnp.float32)
    flat_wb += [wh, bh]
    wb_specs += [pl.BlockSpec(wh.shape, lambda nn, ll: (0, 0)),
                 pl.BlockSpec(bh.shape, lambda nn, ll: (0, 0))]

    in_specs = [pl.BlockSpec((None, None, R0, C0, M0),
                             lambda nn, ll: (nn, ll, 0, 0, 0))] + wb_specs

    out_shapes, out_specs = [], []
    for i in range(n):
        Ri, Ci = R[i + 1], channels[i + 1]
        out_shapes.append(jax.ShapeDtypeStruct((N, Ri, Ci, L_fin), x.dtype))
        out_specs.append(pl.BlockSpec((None, Ri, Ci, T),
                                      lambda nn, ll: (nn, 0, 0, ll)))
    out_shapes.append(jax.ShapeDtypeStruct((N, 1, out_size, L_fin), x.dtype))
    out_specs.append(pl.BlockSpec((None, 1, out_size, T),
                                  lambda nn, ll: (nn, 0, 0, ll)))

    def kernel(xw_ref, *refs):
        wb = refs[:2 * (n + 1)]
        out_refs = refs[2 * (n + 1):]
        tile = pl.program_id(1)

        # level-0 phase arrays from the raw-input window
        A = [xw_ref[p] for p in range(R[0])]

        for i in range(n):                                   # strided conv layers
            w_ref, b_ref = wb[2 * i], wb[2 * i + 1]
            s = conv_strides[i]
            P_in, P_out = R[i], R[i + 1]
            M_out = M[i + 1]
            C_out = channels[i + 1]

            # polyphase conv: every tap is a contiguous lane slice -> small MXU dot
            B = []
            for r in range(P_out):
                acc = jnp.zeros((C_out, M_out), jnp.float32)
                for k in range(K):                           # static unroll, K=5
                    t = s * r + k
                    p, d = t % P_in, t // P_in
                    acc = acc + jnp.dot(w_ref[k], A[p][:, d:d + M_out],
                                        preferred_element_type=jnp.float32)
                B.append(acc + b_ref[...])

            # write the pre-activation feature (phase-major, lane-dense blocks)
            fo = out_refs[i]
            for rp in range(P_out):
                src = (rp + c[i + 1]) % P_out
                off = (rp + c[i + 1]) // P_out
                fo[rp] = B[src][:, off:off + T].astype(fo.dtype)

            # fused LeakyReLU(0.2); halo slots outside [0, L_i) are zeroed, which
            # reproduces the next conv's zero padding exactly.
            A = []
            for r in range(P_out):
                m_idx = lax.broadcasted_iota(jnp.int32, (1, M_out), 1)
                g = P_out * (m_idx + T * tile) + (r - c[i + 1])
                valid = jnp.logical_and(g >= 0, g < L_lv[i + 1])
                act = jnp.where(B[r] > 0, B[r], 0.2 * B[r])
                A.append(jnp.where(valid, act, 0.0))

        # fused 1x1 conv head (stride 1, no padding, same tile) -- saves a launch
        wh_ref, bh_ref = wb[2 * n], wb[2 * n + 1]
        y = jnp.dot(wh_ref[...], A[0][:, :T],
                    preferred_element_type=jnp.float32) + bh_ref[...]
        out_refs[n][0] = y.astype(out_refs[n].dtype)

    flops = 2 * N * L_fin * channels[n] * out_size
    for i in range(n):
        flops += 2 * N * L_lv[i + 1] * K * channels[i] * channels[i + 1]
    bytes_accessed = 4 * (xw.size + sum(a.size for a in flat_wb)
                          + sum(math.prod(s.shape) for s in out_shapes))

    feats_raw = pl.pallas_call(
        kernel,
        out_shape=out_shapes,
        grid=(N, ntiles),
        in_specs=in_specs,
        out_specs=out_specs,
        compiler_params=pltpu.CompilerParams(
            dimension_semantics=("parallel", "parallel")),
        cost_estimate=pl.CostEstimate(flops=int(flops), transcendentals=0,
                                      bytes_accessed=int(bytes_accessed)),
    )(xw, *flat_wb)

    # de-interleave the phase-major features back to torch (N, C, L) layout
    features = []
    for i in range(n + 1):
        f = feats_raw[i]
        Nn, Ri, Ci, U = f.shape
        features.append(jnp.transpose(f, (0, 2, 3, 1)).reshape(Nn, Ci, U * Ri))
    return features


def init_convnet_params(key, in_size, out_size, capacity, n_layers,
                        kernel_size, stride):
    # channels = [in_size] + capacity * 2**arange(n_layers)
    channels = [in_size] + [capacity * (2 ** i) for i in range(n_layers)]
    if isinstance(stride, int):
        stride = n_layers * [stride]
    # NOTE: weight_norm(normalization(...)) is a pure reparametrization of the
    # conv weight; with synthetic weights the forward math is identical, so we
    # parameterize the effective conv weight directly.
    params, strides, pads = [], [], []
    for i in range(n_layers):
        key, kw, kb = jax.random.split(key, 3)
        w = 0.1 * jax.random.normal(
            kw, (channels[i + 1], channels[i], kernel_size), jnp.float32)
        b = 0.1 * jax.random.normal(kb, (channels[i + 1],), jnp.float32)
        params.append((w, b))
        strides.append(stride[i])
        pads.append(get_padding_centered(kernel_size, stride[i])[0])
    # final 1x1 conv (no normalization, no activation after it)
    key, kw, kb = jax.random.split(key, 3)
    w = 0.1 * jax.random.normal(kw, (out_size, channels[-1], 1), jnp.float32)
    b = 0.1 * jax.random.normal(kb, (out_size,), jnp.float32)
    params.append((w, b))
    strides.append(1)
    pads.append(0)
    return params, strides, pads


def convnet_forward_ref(x_ncl, params, strides, pads):
    """Pure-JAX reference matching nn.Conv1d / nn.LeakyReLU semantics."""
    h = x_ncl
    feats = []
    for i, (w, b) in enumerate(params):
        y = jax.lax.conv_general_dilated(
            h, w, (strides[i],), [(pads[i], pads[i])],
            dimension_numbers=("NCH", "OIH", "NCH"),
            precision=jax.lax.Precision.HIGHEST) + b[None, :, None]
        feats.append(y)
        h = jnp.where(y > 0, y, 0.2 * y)
    return feats


if __name__ == "__main__":
    # ConvNet(in_size=4, out_size=1, capacity=8, n_layers=3, kernel_size=5,
    #         stride=2, conv=nn.Conv1d)
    in_size, out_size, capacity, n_layers, kernel_size, stride = 4, 1, 8, 3, 5, 2
    N, L = 2, 2048   # small, but long enough for lane-dense (>=128) tiles

    key = jax.random.PRNGKey(0)
    key, kx, kp = jax.random.split(key, 3)
    x = jax.random.normal(kx, (N, in_size, L), jnp.float32)      # (N, C, L)

    params, strides, pads = init_convnet_params(
        kp, in_size, out_size, capacity, n_layers, kernel_size, stride)

    feats = convnet_forward_pallas(x, params, strides, pads, kernel_size)
    feats = [jax.block_until_ready(f) for f in feats]

    feats_ref = convnet_forward_ref(x, params, strides, pads)
    for i, (fp, fr) in enumerate(zip(feats, feats_ref)):
        assert fp.shape == fr.shape, (i, fp.shape, fr.shape)
        err = float(jnp.max(jnp.abs(fp - fr)))
        assert err < 2e-3, f"feature {i} mismatch: {err}"

    # also exercise the multi-tile path (halo recompute + zero-pad masks)
    feats2 = convnet_forward_pallas(x, params, strides, pads, kernel_size,
                                    t_max=128)
    feats2 = [jax.block_until_ready(f) for f in feats2]
    for i, (fp, fr) in enumerate(zip(feats2, feats_ref)):
        assert fp.shape == fr.shape, (i, fp.shape, fr.shape)
        err = float(jnp.max(jnp.abs(fp - fr)))
        assert err < 2e-3, f"feature {i} (tiled) mismatch: {err}"

    print("KERNEL_OK")
</pallas_src>

<mosaic_0001>
module attributes {stable_mosaic.version = 11 : i64} {
  func.func @kernel(%arg0: i32, %arg1: i32, %arg2: memref<1x1x8x4x260xf32, #tpu.memory_space<vmem>>, %arg3: memref<5x8x4xf32, #tpu.memory_space<vmem>>, %arg4: memref<8x1xf32, #tpu.memory_space<vmem>>, %arg5: memref<5x16x8xf32, #tpu.memory_space<vmem>>, %arg6: memref<16x1xf32, #tpu.memory_space<vmem>>, %arg7: memref<5x32x16xf32, #tpu.memory_space<vmem>>, %arg8: memref<32x1xf32, #tpu.memory_space<vmem>>, %arg9: memref<1x32xf32, #tpu.memory_space<vmem>>, %arg10: memref<1x1xf32, #tpu.memory_space<vmem>>, %arg11: memref<1x4x8x256xf32, #tpu.memory_space<vmem>>, %arg12: memref<1x2x16x256xf32, #tpu.memory_space<vmem>>, %arg13: memref<1x1x32x256xf32, #tpu.memory_space<vmem>>, %arg14: memref<1x1x1x256xf32, #tpu.memory_space<vmem>>) attributes {dimension_semantics = [#tpu.dimension_semantics<parallel>, #tpu.dimension_semantics<parallel>], iteration_bounds = array<i64: 2, 1>, scalar_prefetch = 0 : i64, scratch_operands = 0 : i64, tpu.core_type = #tpu.core_type<tc>, window_params = [{transform_indices = @transform_0, window_bounds = array<i64: 1, 1, 8, 4, 260>}, {pipeline_mode = #tpu.pipeline_mode<synchronous>, transform_indices = @transform_1, window_bounds = array<i64: 5, 8, 4>}, {pipeline_mode = #tpu.pipeline_mode<synchronous>, transform_indices = @transform_2, window_bounds = array<i64: 8, 1>}, {pipeline_mode = #tpu.pipeline_mode<synchronous>, transform_indices = @transform_3, window_bounds = array<i64: 5, 16, 8>}, {pipeline_mode = #tpu.pipeline_mode<synchronous>, transform_indices = @transform_4, window_bounds = array<i64: 16, 1>}, {pipeline_mode = #tpu.pipeline_mode<synchronous>, transform_indices = @transform_5, window_bounds = array<i64: 5, 32, 16>}, {pipeline_mode = #tpu.pipeline_mode<synchronous>, transform_indices = @transform_6, window_bounds = array<i64: 32, 1>}, {pipeline_mode = #tpu.pipeline_mode<synchronous>, transform_indices = @transform_7, window_bounds = array<i64: 1, 32>}, {pipeline_mode = #tpu.pipeline_mode<synchronous>, transform_indices = @transform_8, window_bounds = array<i64: 1, 1>}, {transform_indices = @transform_9, window_bounds = array<i64: 1, 4, 8, 256>}, {transform_indices = @transform_10, window_bounds = array<i64: 1, 2, 16, 256>}, {transform_indices = @transform_11, window_bounds = array<i64: 1, 1, 32, 256>}, {transform_indices = @transform_12, window_bounds = array<i64: 1, 1, 1, 256>}]} {
    %c0 = arith.constant 0 : index
    %c0_0 = arith.constant 0 : index
    %c0_1 = arith.constant 0 : index
    %c0_2 = arith.constant 0 : index
    %c0_3 = arith.constant 0 : index
    %0 = vector.load %arg2[%c0, %c0_0, %c0_1, %c0_2, %c0_3] : memref<1x1x8x4x260xf32, #tpu.memory_space<vmem>>, vector<1x1x1x4x260xf32>
    %1 = vector.shape_cast %0 : vector<1x1x1x4x260xf32> to vector<4x260xf32>
    %c0_4 = arith.constant 0 : index
    %c0_5 = arith.constant 0 : index
    %c1 = arith.constant 1 : index
    %c0_6 = arith.constant 0 : index
    %c0_7 = arith.constant 0 : index
    %2 = vector.load %arg2[%c0_4, %c0_5, %c1, %c0_6, %c0_7] : memref<1x1x8x4x260xf32, #tpu.memory_space<vmem>>, vector<1x1x1x4x260xf32>
    %3 = vector.shape_cast %2 : vector<1x1x1x4x260xf32> to vector<4x260xf32>
    %c0_8 = arith.constant 0 : index
    %c0_9 = arith.constant 0 : index
    %c2 = arith.constant 2 : index
    %c0_10 = arith.constant 0 : index
    %c0_11 = arith.constant 0 : index
    %4 = vector.load %arg2[%c0_8, %c0_9, %c2, %c0_10, %c0_11] : memref<1x1x8x4x260xf32, #tpu.memory_space<vmem>>, vector<1x1x1x4x260xf32>
    %5 = vector.shape_cast %4 : vector<1x1x1x4x260xf32> to vector<4x260xf32>
    %c0_12 = arith.constant 0 : index
    %c0_13 = arith.constant 0 : index
    %c3 = arith.constant 3 : index
    %c0_14 = arith.constant 0 : index
    %c0_15 = arith.constant 0 : index
    %6 = vector.load %arg2[%c0_12, %c0_13, %c3, %c0_14, %c0_15] : memref<1x1x8x4x260xf32, #tpu.memory_space<vmem>>, vector<1x1x1x4x260xf32>
    %7 = vector.shape_cast %6 : vector<1x1x1x4x260xf32> to vector<4x260xf32>
    %c0_16 = arith.constant 0 : index
    %c0_17 = arith.constant 0 : index
    %c4 = arith.constant 4 : index
    %c0_18 = arith.constant 0 : index
    %c0_19 = arith.constant 0 : index
    %8 = vector.load %arg2[%c0_16, %c0_17, %c4, %c0_18, %c0_19] : memref<1x1x8x4x260xf32, #tpu.memory_space<vmem>>, vector<1x1x1x4x260xf32>
    %9 = vector.shape_cast %8 : vector<1x1x1x4x260xf32> to vector<4x260xf32>
    %c0_20 = arith.constant 0 : index
    %c0_21 = arith.constant 0 : index
    %c5 = arith.constant 5 : index
    %c0_22 = arith.constant 0 : index
    %c0_23 = arith.constant 0 : index
    %10 = vector.load %arg2[%c0_20, %c0_21, %c5, %c0_22, %c0_23] : memref<1x1x8x4x260xf32, #tpu.memory_space<vmem>>, vector<1x1x1x4x260xf32>
    %11 = vector.shape_cast %10 : vector<1x1x1x4x260xf32> to vector<4x260xf32>
    %c0_24 = arith.constant 0 : index
    %c0_25 = arith.constant 0 : index
    %c6 = arith.constant 6 : index
    %c0_26 = arith.constant 0 : index
    %c0_27 = arith.constant 0 : index
    %12 = vector.load %arg2[%c0_24, %c0_25, %c6, %c0_26, %c0_27] : memref<1x1x8x4x260xf32, #tpu.memory_space<vmem>>, vector<1x1x1x4x260xf32>
    %13 = vector.shape_cast %12 : vector<1x1x1x4x260xf32> to vector<4x260xf32>
    %c0_28 = arith.constant 0 : index
    %c0_29 = arith.constant 0 : index
    %c7 = arith.constant 7 : index
    %c0_30 = arith.constant 0 : index
    %c0_31 = arith.constant 0 : index
    %14 = vector.load %arg2[%c0_28, %c0_29, %c7, %c0_30, %c0_31] : memref<1x1x8x4x260xf32, #tpu.memory_space<vmem>>, vector<1x1x1x4x260xf32>
    %15 = vector.shape_cast %14 : vector<1x1x1x4x260xf32> to vector<4x260xf32>
    %cst = arith.constant 0.000000e+00 : f32
    %16 = vector.broadcast %cst : f32 to vector<8x259xf32>
    %c0_32 = arith.constant 0 : index
    %c0_33 = arith.constant 0 : index
    %c0_34 = arith.constant 0 : index
    %17 = vector.load %arg3[%c0_32, %c0_33, %c0_34] : memref<5x8x4xf32, #tpu.memory_space<vmem>>, vector<1x8x4xf32>
    %18 = vector.shape_cast %17 : vector<1x8x4xf32> to vector<8x4xf32>
    %19 = vector.extract_strided_slice %1 {offsets = [0, 0], sizes = [4, 259], strides = [1, 1]} : vector<4x260xf32> to vector<4x259xf32>
    %cst_35 = arith.constant dense<0.000000e+00> : vector<8x259xf32>
    %20 = tpu.matmul %18, %19, %cst_35 {dimension_numbers = #tpu.dot_dimension_numbers<[1], [0], [0], [1], [0, 0, 1, 1], [], []>} : vector<8x4xf32>, vector<4x259xf32>, vector<8x259xf32> -> vector<8x259xf32>
    %21 = arith.addf %16, %20 : vector<8x259xf32>
    %c1_36 = arith.constant 1 : index
    %c0_37 = arith.constant 0 : index
    %c0_38 = arith.constant 0 : index
    %22 = vector.load %arg3[%c1_36, %c0_37, %c0_38] : memref<5x8x4xf32, #tpu.memory_space<vmem>>, vector<1x8x4xf32>
    %23 = vector.shape_cast %22 : vector<1x8x4xf32> to vector<8x4xf32>
    %24 = vector.extract_strided_slice %3 {offsets = [0, 0], sizes = [4, 259], strides = [1, 1]} : vector<4x260xf32> to vector<4x259xf32>
    %cst_39 = arith.constant dense<0.000000e+00> : vector<8x259xf32>
    %25 = tpu.matmul %23, %24, %cst_39 {dimension_numbers = #tpu.dot_dimension_numbers<[1], [0], [0], [1], [0, 0, 1, 1], [], []>} : vector<8x4xf32>, vector<4x259xf32>, vector<8x259xf32> -> vector<8x259xf32>
    %26 = arith.addf %21, %25 : vector<8x259xf32>
    %c2_40 = arith.constant 2 : index
    %c0_41 = arith.constant 0 : index
    %c0_42 = arith.constant 0 : index
    %27 = vector.load %arg3[%c2_40, %c0_41, %c0_42] : memref<5x8x4xf32, #tpu.memory_space<vmem>>, vector<1x8x4xf32>
    %28 = vector.shape_cast %27 : vector<1x8x4xf32> to vector<8x4xf32>
    %29 = vector.extract_strided_slice %5 {offsets = [0, 0], sizes = [4, 259], strides = [1, 1]} : vector<4x260xf32> to vector<4x259xf32>
    %cst_43 = arith.constant dense<0.000000e+00> : vector<8x259xf32>
    %30 = tpu.matmul %28, %29, %cst_43 {dimension_numbers = #tpu.dot_dimension_numbers<[1], [0], [0], [1], [0, 0, 1, 1], [], []>} : vector<8x4xf32>, vector<4x259xf32>, vector<8x259xf32> -> vector<8x259xf32>
    %31 = arith.addf %26, %30 : vector<8x259xf32>
    %c3_44 = arith.constant 3 : index
    %c0_45 = arith.constant 0 : index
    %c0_46 = arith.constant 0 : index
    %32 = vector.load %arg3[%c3_44, %c0_45, %c0_46] : memref<5x8x4xf32, #tpu.memory_space<vmem>>, vector<1x8x4xf32>
    %33 = vector.shape_cast %32 : vector<1x8x4xf32> to vector<8x4xf32>
    %34 = vector.extract_strided_slice %7 {offsets = [0, 0], sizes = [4, 259], strides = [1, 1]} : vector<4x260xf32> to vector<4x259xf32>
    %cst_47 = arith.constant dense<0.000000e+00> : vector<8x259xf32>
    %35 = tpu.matmul %33, %34, %cst_47 {dimension_numbers = #tpu.dot_dimension_numbers<[1], [0], [0], [1], [0, 0, 1, 1], [], []>} : vector<8x4xf32>, vector<4x259xf32>, vector<8x259xf32> -> vector<8x259xf32>
    %36 = arith.addf %31, %35 : vector<8x259xf32>
    %c4_48 = arith.constant 4 : index
    %c0_49 = arith.constant 0 : index
    %c0_50 = arith.constant 0 : index
    %37 = vector.load %arg3[%c4_48, %c0_49, %c0_50] : memref<5x8x4xf32, #tpu.memory_space<vmem>>, vector<1x8x4xf32>
    %38 = vector.shape_cast %37 : vector<1x8x4xf32> to vector<8x4xf32>
    %39 = vector.extract_strided_slice %9 {offsets = [0, 0], sizes = [4, 259], strides = [1, 1]} : vector<4x260xf32> to vector<4x259xf32>
    %cst_51 = arith.constant dense<0.000000e+00> : vector<8x259xf32>
    %40 = tpu.matmul %38, %39, %cst_51 {dimension_numbers = #tpu.dot_dimension_numbers<[1], [0], [0], [1], [0, 0, 1, 1], [], []>} : vector<8x4xf32>, vector<4x259xf32>, vector<8x259xf32> -> vector<8x259xf32>
    %41 = arith.addf %36, %40 : vector<8x259xf32>
    %c0_52 = arith.constant 0 : index
    %c0_53 = arith.constant 0 : index
    %42 = vector.load %arg4[%c0_52, %c0_53] : memref<8x1xf32, #tpu.memory_space<vmem>>, vector<8x1xf32>
    %43 = vector.broadcast %42 : vector<8x1xf32> to vector<8x259xf32>
    %44 = arith.addf %41, %43 : vector<8x259xf32>
    %cst_54 = arith.constant 0.000000e+00 : f32
    %45 = vector.broadcast %cst_54 : f32 to vector<8x259xf32>
    %c0_55 = arith.constant 0 : index
    %c0_56 = arith.constant 0 : index
    %c0_57 = arith.constant 0 : index
    %46 = vector.load %arg3[%c0_55, %c0_56, %c0_57] : memref<5x8x4xf32, #tpu.memory_space<vmem>>, vector<1x8x4xf32>
    %47 = vector.shape_cast %46 : vector<1x8x4xf32> to vector<8x4xf32>
    %48 = vector.extract_strided_slice %5 {offsets = [0, 0], sizes = [4, 259], strides = [1, 1]} : vector<4x260xf32> to vector<4x259xf32>
    %cst_58 = arith.constant dense<0.000000e+00> : vector<8x259xf32>
    %49 = tpu.matmul %47, %48, %cst_58 {dimension_numbers = #tpu.dot_dimension_numbers<[1], [0], [0], [1], [0, 0, 1, 1], [], []>} : vector<8x4xf32>, vector<4x259xf32>, vector<8x259xf32> -> vector<8x259xf32>
    %50 = arith.addf %45, %49 : vector<8x259xf32>
    %c1_59 = arith.constant 1 : index
    %c0_60 = arith.constant 0 : index
    %c0_61 = arith.constant 0 : index
    %51 = vector.load %arg3[%c1_59, %c0_60, %c0_61] : memref<5x8x4xf32, #tpu.memory_space<vmem>>, vector<1x8x4xf32>
    %52 = vector.shape_cast %51 : vector<1x8x4xf32> to vector<8x4xf32>
    %53 = vector.extract_strided_slice %7 {offsets = [0, 0], sizes = [4, 259], strides = [1, 1]} : vector<4x260xf32> to vector<4x259xf32>
    %cst_62 = arith.constant dense<0.000000e+00> : vector<8x259xf32>
    %54 = tpu.matmul %52, %53, %cst_62 {dimension_numbers = #tpu.dot_dimension_numbers<[1], [0], [0], [1], [0, 0, 1, 1], [], []>} : vector<8x4xf32>, vector<4x259xf32>, vector<8x259xf32> -> vector<8x259xf32>
    %55 = arith.addf %50, %54 : vector<8x259xf32>
    %c2_63 = arith.constant 2 : index
    %c0_64 = arith.constant 0 : index
    %c0_65 = arith.constant 0 : index
    %56 = vector.load %arg3[%c2_63, %c0_64, %c0_65] : memref<5x8x4xf32, #tpu.memory_space<vmem>>, vector<1x8x4xf32>
    %57 = vector.shape_cast %56 : vector<1x8x4xf32> to vector<8x4xf32>
    %58 = vector.extract_strided_slice %9 {offsets = [0, 0], sizes = [4, 259], strides = [1, 1]} : vector<4x260xf32> to vector<4x259xf32>
    %cst_66 = arith.constant dense<0.000000e+00> : vector<8x259xf32>
    %59 = tpu.matmul %57, %58, %cst_66 {dimension_numbers = #tpu.dot_dimension_numbers<[1], [0], [0], [1], [0, 0, 1, 1], [], []>} : vector<8x4xf32>, vector<4x259xf32>, vector<8x259xf32> -> vector<8x259xf32>
    %60 = arith.addf %55, %59 : vector<8x259xf32>
    %c3_67 = arith.constant 3 : index
    %c0_68 = arith.constant 0 : index
    %c0_69 = arith.constant 0 : index
    %61 = vector.load %arg3[%c3_67, %c0_68, %c0_69] : memref<5x8x4xf32, #tpu.memory_space<vmem>>, vector<1x8x4xf32>
    %62 = vector.shape_cast %61 : vector<1x8x4xf32> to vector<8x4xf32>
    %63 = vector.extract_strided_slice %11 {offsets = [0, 0], sizes = [4, 259], strides = [1, 1]} : vector<4x260xf32> to vector<4x259xf32>
    %cst_70 = arith.constant dense<0.000000e+00> : vector<8x259xf32>
    %64 = tpu.matmul %62, %63, %cst_70 {dimension_numbers = #tpu.dot_dimension_numbers<[1], [0], [0], [1], [0, 0, 1, 1], [], []>} : vector<8x4xf32>, vector<4x259xf32>, vector<8x259xf32> -> vector<8x259xf32>
    %65 = arith.addf %60, %64 : vector<8x259xf32>
    %c4_71 = arith.constant 4 : index
    %c0_72 = arith.constant 0 : index
    %c0_73 = arith.constant 0 : index
    %66 = vector.load %arg3[%c4_71, %c0_72, %c0_73] : memref<5x8x4xf32, #tpu.memory_space<vmem>>, vector<1x8x4xf32>
    %67 = vector.shape_cast %66 : vector<1x8x4xf32> to vector<8x4xf32>
    %68 = vector.extract_strided_slice %13 {offsets = [0, 0], sizes = [4, 259], strides = [1, 1]} : vector<4x260xf32> to vector<4x259xf32>
    %cst_74 = arith.constant dense<0.000000e+00> : vector<8x259xf32>
    %69 = tpu.matmul %67, %68, %cst_74 {dimension_numbers = #tpu.dot_dimension_numbers<[1], [0], [0], [1], [0, 0, 1, 1], [], []>} : vector<8x4xf32>, vector<4x259xf32>, vector<8x259xf32> -> vector<8x259xf32>
    %70 = arith.addf %65, %69 : vector<8x259xf32>
    %c0_75 = arith.constant 0 : index
    %c0_76 = arith.constant 0 : index
    %71 = vector.load %arg4[%c0_75, %c0_76] : memref<8x1xf32, #tpu.memory_space<vmem>>, vector<8x1xf32>
    %72 = vector.broadcast %71 : vector<8x1xf32> to vector<8x259xf32>
    %73 = arith.addf %70, %72 : vector<8x259xf32>
    %cst_77 = arith.constant 0.000000e+00 : f32
    %74 = vector.broadcast %cst_77 : f32 to vector<8x259xf32>
    %c0_78 = arith.constant 0 : index
    %c0_79 = arith.constant 0 : index
    %c0_80 = arith.constant 0 : index
    %75 = vector.load %arg3[%c0_78, %c0_79, %c0_80] : memref<5x8x4xf32, #tpu.memory_space<vmem>>, vector<1x8x4xf32>
    %76 = vector.shape_cast %75 : vector<1x8x4xf32> to vector<8x4xf32>
    %77 = vector.extract_strided_slice %9 {offsets = [0, 0], sizes = [4, 259], strides = [1, 1]} : vector<4x260xf32> to vector<4x259xf32>
    %cst_81 = arith.constant dense<0.000000e+00> : vector<8x259xf32>
    %78 = tpu.matmul %76, %77, %cst_81 {dimension_numbers = #tpu.dot_dimension_numbers<[1], [0], [0], [1], [0, 0, 1, 1], [], []>} : vector<8x4xf32>, vector<4x259xf32>, vector<8x259xf32> -> vector<8x259xf32>
    %79 = arith.addf %74, %78 : vector<8x259xf32>
    %c1_82 = arith.constant 1 : index
    %c0_83 = arith.constant 0 : index
    %c0_84 = arith.constant 0 : index
    %80 = vector.load %arg3[%c1_82, %c0_83, %c0_84] : memref<5x8x4xf32, #tpu.memory_space<vmem>>, vector<1x8x4xf32>
    %81 = vector.shape_cast %80 : vector<1x8x4xf32> to vector<8x4xf32>
    %82 = vector.extract_strided_slice %11 {offsets = [0, 0], sizes = [4, 259], strides = [1, 1]} : vector<4x260xf32> to vector<4x259xf32>
    %cst_85 = arith.constant dense<0.000000e+00> : vector<8x259xf32>
    %83 = tpu.matmul %81, %82, %cst_85 {dimension_numbers = #tpu.dot_dimension_numbers<[1], [0], [0], [1], [0, 0, 1, 1], [], []>} : vector<8x4xf32>, vector<4x259xf32>, vector<8x259xf32> -> vector<8x259xf32>
    %84 = arith.addf %79, %83 : vector<8x259xf32>
    %c2_86 = arith.constant 2 : index
    %c0_87 = arith.constant 0 : index
    %c0_88 = arith.constant 0 : index
    %85 = vector.load %arg3[%c2_86, %c0_87, %c0_88] : memref<5x8x4xf32, #tpu.memory_space<vmem>>, vector<1x8x4xf32>
    %86 = vector.shape_cast %85 : vector<1x8x4xf32> to vector<8x4xf32>
    %87 = vector.extract_strided_slice %13 {offsets = [0, 0], sizes = [4, 259], strides = [1, 1]} : vector<4x260xf32> to vector<4x259xf32>
    %cst_89 = arith.constant dense<0.000000e+00> : vector<8x259xf32>
    %88 = tpu.matmul %86, %87, %cst_89 {dimension_numbers = #tpu.dot_dimension_numbers<[1], [0], [0], [1], [0, 0, 1, 1], [], []>} : vector<8x4xf32>, vector<4x259xf32>, vector<8x259xf32> -> vector<8x259xf32>
    %89 = arith.addf %84, %88 : vector<8x259xf32>
    %c3_90 = arith.constant 3 : index
    %c0_91 = arith.constant 0 : index
    %c0_92 = arith.constant 0 : index
    %90 = vector.load %arg3[%c3_90, %c0_91, %c0_92] : memref<5x8x4xf32, #tpu.memory_space<vmem>>, vector<1x8x4xf32>
    %91 = vector.shape_cast %90 : vector<1x8x4xf32> to vector<8x4xf32>
    %92 = vector.extract_strided_slice %15 {offsets = [0, 0], sizes = [4, 259], strides = [1, 1]} : vector<4x260xf32> to vector<4x259xf32>
    %cst_93 = arith.constant dense<0.000000e+00> : vector<8x259xf32>
    %93 = tpu.matmul %91, %92, %cst_93 {dimension_numbers = #tpu.dot_dimension_numbers<[1], [0], [0], [1], [0, 0, 1, 1], [], []>} : vector<8x4xf32>, vector<4x259xf32>, vector<8x259xf32> -> vector<8x259xf32>
    %94 = arith.addf %89, %93 : vector<8x259xf32>
    %c4_94 = arith.constant 4 : index
    %c0_95 = arith.constant 0 : index
    %c0_96 = arith.constant 0 : index
    %95 = vector.load %arg3[%c4_94, %c0_95, %c0_96] : memref<5x8x4xf32, #tpu.memory_space<vmem>>, vector<1x8x4xf32>
    %96 = vector.shape_cast %95 : vector<1x8x4xf32> to vector<8x4xf32>
    %97 = vector.extract_strided_slice %1 {offsets = [0, 1], sizes = [4, 259], strides = [1, 1]} : vector<4x260xf32> to vector<4x259xf32>
    %cst_97 = arith.constant dense<0.000000e+00> : vector<8x259xf32>
    %98 = tpu.matmul %96, %97, %cst_97 {dimension_numbers = #tpu.dot_dimension_numbers<[1], [0], [0], [1], [0, 0, 1, 1], [], []>} : vector<8x4xf32>, vector<4x259xf32>, vector<8x259xf32> -> vector<8x259xf32>
    %99 = arith.addf %94, %98 : vector<8x259xf32>
    %c0_98 = arith.constant 0 : index
    %c0_99 = arith.constant 0 : index
    %100 = vector.load %arg4[%c0_98, %c0_99] : memref<8x1xf32, #tpu.memory_space<vmem>>, vector<8x1xf32>
    %101 = vector.broadcast %100 : vector<8x1xf32> to vector<8x259xf32>
    %102 = arith.addf %99, %101 : vector<8x259xf32>
    %cst_100 = arith.constant 0.000000e+00 : f32
    %103 = vector.broadcast %cst_100 : f32 to vector<8x259xf32>
    %c0_101 = arith.constant 0 : index
    %c0_102 = arith.constant 0 : index
    %c0_103 = arith.constant 0 : index
    %104 = vector.load %arg3[%c0_101, %c0_102, %c0_103] : memref<5x8x4xf32, #tpu.memory_space<vmem>>, vector<1x8x4xf32>
    %105 = vector.shape_cast %104 : vector<1x8x4xf32> to vector<8x4xf32>
    %106 = vector.extract_strided_slice %13 {offsets = [0, 0], sizes = [4, 259], strides = [1, 1]} : vector<4x260xf32> to vector<4x259xf32>
    %cst_104 = arith.constant dense<0.000000e+00> : vector<8x259xf32>
    %107 = tpu.matmul %105, %106, %cst_104 {dimension_numbers = #tpu.dot_dimension_numbers<[1], [0], [0], [1], [0, 0, 1, 1], [], []>} : vector<8x4xf32>, vector<4x259xf32>, vector<8x259xf32> -> vector<8x259xf32>
    %108 = arith.addf %103, %107 : vector<8x259xf32>
    %c1_105 = arith.constant 1 : index
    %c0_106 = arith.constant 0 : index
    %c0_107 = arith.constant 0 : index
    %109 = vector.load %arg3[%c1_105, %c0_106, %c0_107] : memref<5x8x4xf32, #tpu.memory_space<vmem>>, vector<1x8x4xf32>
    %110 = vector.shape_cast %109 : vector<1x8x4xf32> to vector<8x4xf32>
    %111 = vector.extract_strided_slice %15 {offsets = [0, 0], sizes = [4, 259], strides = [1, 1]} : vector<4x260xf32> to vector<4x259xf32>
    %cst_108 = arith.constant dense<0.000000e+00> : vector<8x259xf32>
    %112 = tpu.matmul %110, %111, %cst_108 {dimension_numbers = #tpu.dot_dimension_numbers<[1], [0], [0], [1], [0, 0, 1, 1], [], []>} : vector<8x4xf32>, vector<4x259xf32>, vector<8x259xf32> -> vector<8x259xf32>
    %113 = arith.addf %108, %112 : vector<8x259xf32>
    %c2_109 = arith.constant 2 : index
    %c0_110 = arith.constant 0 : index
    %c0_111 = arith.constant 0 : index
    %114 = vector.load %arg3[%c2_109, %c0_110, %c0_111] : memref<5x8x4xf32, #tpu.memory_space<vmem>>, vector<1x8x4xf32>
    %115 = vector.shape_cast %114 : vector<1x8x4xf32> to vector<8x4xf32>
    %116 = vector.extract_strided_slice %1 {offsets = [0, 1], sizes = [4, 259], strides = [1, 1]} : vector<4x260xf32> to vector<4x259xf32>
    %cst_112 = arith.constant dense<0.000000e+00> : vector<8x259xf32>
    %117 = tpu.matmul %115, %116, %cst_112 {dimension_numbers = #tpu.dot_dimension_numbers<[1], [0], [0], [1], [0, 0, 1, 1], [], []>} : vector<8x4xf32>, vector<4x259xf32>, vector<8x259xf32> -> vector<8x259xf32>
    %118 = arith.addf %113, %117 : vector<8x259xf32>
    %c3_113 = arith.constant 3 : index
    %c0_114 = arith.constant 0 : index
    %c0_115 = arith.constant 0 : index
    %119 = vector.load %arg3[%c3_113, %c0_114, %c0_115] : memref<5x8x4xf32, #tpu.memory_space<vmem>>, vector<1x8x4xf32>
    %120 = vector.shape_cast %119 : vector<1x8x4xf32> to vector<8x4xf32>
    %121 = vector.extract_strided_slice %3 {offsets = [0, 1], sizes = [4, 259], strides = [1, 1]} : vector<4x260xf32> to vector<4x259xf32>
    %cst_116 = arith.constant dense<0.000000e+00> : vector<8x259xf32>
    %122 = tpu.matmul %120, %121, %cst_116 {dimension_numbers = #tpu.dot_dimension_numbers<[1], [0], [0], [1], [0, 0, 1, 1], [], []>} : vector<8x4xf32>, vector<4x259xf32>, vector<8x259xf32> -> vector<8x259xf32>
    %123 = arith.addf %118, %122 : vector<8x259xf32>
    %c4_117 = arith.constant 4 : index
    %c0_118 = arith.constant 0 : index
    %c0_119 = arith.constant 0 : index
    %124 = vector.load %arg3[%c4_117, %c0_118, %c0_119] : memref<5x8x4xf32, #tpu.memory_space<vmem>>, vector<1x8x4xf32>
    %125 = vector.shape_cast %124 : vector<1x8x4xf32> to vector<8x4xf32>
    %126 = vector.extract_strided_slice %5 {offsets = [0, 1], sizes = [4, 259], strides = [1, 1]} : vector<4x260xf32> to vector<4x259xf32>
    %cst_120 = arith.constant dense<0.000000e+00> : vector<8x259xf32>
    %127 = tpu.matmul %125, %126, %cst_120 {dimension_numbers = #tpu.dot_dimension_numbers<[1], [0], [0], [1], [0, 0, 1, 1], [], []>} : vector<8x4xf32>, vector<4x259xf32>, vector<8x259xf32> -> vector<8x259xf32>
    %128 = arith.addf %123, %127 : vector<8x259xf32>
    %c0_121 = arith.constant 0 : index
    %c0_122 = arith.constant 0 : index
    %129 = vector.load %arg4[%c0_121, %c0_122] : memref<8x1xf32, #tpu.memory_space<vmem>>, vector<8x1xf32>
    %130 = vector.broadcast %129 : vector<8x1xf32> to vector<8x259xf32>
    %131 = arith.addf %128, %130 : vector<8x259xf32>
    %132 = vector.extract_strided_slice %102 {offsets = [0, 1], sizes = [8, 256], strides = [1, 1]} : vector<8x259xf32> to vector<8x256xf32>
    %c0_123 = arith.constant 0 : index
    %c0_124 = arith.constant 0 : index
    %c0_125 = arith.constant 0 : index
    %c0_126 = arith.constant 0 : index
    %133 = vector.load %arg11[%c0_123, %c0_124, %c0_125, %c0_126] : memref<1x4x8x256xf32, #tpu.memory_space<vmem>>, vector<1x1x8x256xf32>
    %134 = vector.shape_cast %133 : vector<1x1x8x256xf32> to vector<8x256xf32>
    %135 = vector.shape_cast %132 : vector<8x256xf32> to vector<1x1x8x256xf32>
    tpu.vector_store %arg11[%c0_123, %c0_124, %c0_125, %c0_126], %135 {strides = array<i32>} : memref<1x4x8x256xf32, #tpu.memory_space<vmem>>, vector<1x1x8x256xf32>,
    %136 = vector.extract_strided_slice %131 {offsets = [0, 1], sizes = [8, 256], strides = [1, 1]} : vector<8x259xf32> to vector<8x256xf32>
    %c0_127 = arith.constant 0 : index
    %c1_128 = arith.constant 1 : index
    %c0_129 = arith.constant 0 : index
    %c0_130 = arith.constant 0 : index
    %137 = vector.load %arg11[%c0_127, %c1_128, %c0_129, %c0_130] : memref<1x4x8x256xf32, #tpu.memory_space<vmem>>, vector<1x1x8x256xf32>
    %138 = vector.shape_cast %137 : vector<1x1x8x256xf32> to vector<8x256xf32>
    %139 = vector.shape_cast %136 : vector<8x256xf32> to vector<1x1x8x256xf32>
    tpu.vector_store %arg11[%c0_127, %c1_128, %c0_129, %c0_130], %139 {strides = array<i32>} : memref<1x4x8x256xf32, #tpu.memory_space<vmem>>, vector<1x1x8x256xf32>,
    %140 = vector.extract_strided_slice %44 {offsets = [0, 2], sizes = [8, 256], strides = [1, 1]} : vector<8x259xf32> to vector<8x256xf32>
    %c0_131 = arith.constant 0 : index
    %c2_132 = arith.constant 2 : index
    %c0_133 = arith.constant 0 : index
    %c0_134 = arith.constant 0 : index
    %141 = vector.load %arg11[%c0_131, %c2_132, %c0_133, %c0_134] : memref<1x4x8x256xf32, #tpu.memory_space<vmem>>, vector<1x1x8x256xf32>
    %142 = vector.shape_cast %141 : vector<1x1x8x256xf32> to vector<8x256xf32>
    %143 = vector.shape_cast %140 : vector<8x256xf32> to vector<1x1x8x256xf32>
    tpu.vector_store %arg11[%c0_131, %c2_132, %c0_133, %c0_134], %143 {strides = array<i32>} : memref<1x4x8x256xf32, #tpu.memory_space<vmem>>, vector<1x1x8x256xf32>,
    %144 = vector.extract_strided_slice %73 {offsets = [0, 2], sizes = [8, 256], strides = [1, 1]} : vector<8x259xf32> to vector<8x256xf32>
    %c0_135 = arith.constant 0 : index
    %c3_136 = arith.constant 3 : index
    %c0_137 = arith.constant 0 : index
    %c0_138 = arith.constant 0 : index
    %145 = vector.load %arg11[%c0_135, %c3_136, %c0_137, %c0_138] : memref<1x4x8x256xf32, #tpu.memory_space<vmem>>, vector<1x1x8x256xf32>
    %146 = vector.shape_cast %145 : vector<1x1x8x256xf32> to vector<8x256xf32>
    %147 = vector.shape_cast %144 : vector<8x256xf32> to vector<1x1x8x256xf32>
    tpu.vector_store %arg11[%c0_135, %c3_136, %c0_137, %c0_138], %147 {strides = array<i32>} : memref<1x4x8x256xf32, #tpu.memory_space<vmem>>, vector<1x1x8x256xf32>,
    %148 = tpu.iota {dimensions = array<i32: 1>} : vector<1x259xi32>
    %c256_i32 = arith.constant 256 : i32
    %149 = arith.muli %c256_i32, %arg1 : i32
    %150 = vector.broadcast %149 : i32 to vector<1x259xi32>
    %151 = arith.addi %148, %150 : vector<1x259xi32>
    %c4_i32 = arith.constant 4 : i32
    %152 = vector.broadcast %c4_i32 : i32 to vector<1x259xi32>
    %153 = arith.muli %152, %151 : vector<1x259xi32>
    %c-6_i32 = arith.constant -6 : i32
    %154 = vector.broadcast %c-6_i32 : i32 to vector<1x259xi32>
    %155 = arith.addi %153, %154 : vector<1x259xi32>
    %c0_i32 = arith.constant 0 : i32
    %156 = vector.broadcast %c0_i32 : i32 to vector<1x259xi32>
    %157 = arith.cmpi sge, %155, %156 : vector<1x259xi32>
    %c1024_i32 = arith.constant 1024 : i32
    %158 = vector.broadcast %c1024_i32 : i32 to vector<1x259xi32>
    %159 = arith.cmpi slt, %155, %158 : vector<1x259xi32>
    %160 = arith.andi %157, %159 : vector<1x259xi1>
    %cst_139 = arith.constant 0.000000e+00 : f32
    %161 = vector.broadcast %cst_139 : f32 to vector<8x259xf32>
    %162 = arith.cmpf ogt, %44, %161 : vector<8x259xf32>
    %cst_140 = arith.constant 2.000000e-01 : f32
    %163 = vector.broadcast %cst_140 : f32 to vector<8x259xf32>
    %164 = arith.mulf %163, %44 : vector<8x259xf32>
    %165 = arith.select %162, %44, %164 : vector<8x259xi1>, vector<8x259xf32>
    %cst_141 = arith.constant 0.000000e+00 : f32
    %166 = vector.shape_cast %160 : vector<1x259xi1> to vector<1x259xi1>
    %167 = vector.broadcast %166 : vector<1x259xi1> to vector<8x259xi1>
    %168 = vector.broadcast %cst_141 : f32 to vector<8x259xf32>
    %169 = arith.select %167, %165, %168 : vector<8x259xi1>, vector<8x259xf32>
    %170 = tpu.iota {dimensions = array<i32: 1>} : vector<1x259xi32>
    %c256_i32_142 = arith.constant 256 : i32
    %171 = arith.muli %c256_i32_142, %arg1 : i32
    %172 = vector.broadcast %171 : i32 to vector<1x259xi32>
    %173 = arith.addi %170, %172 : vector<1x259xi32>
    %c4_i32_143 = arith.constant 4 : i32
    %174 = vector.broadcast %c4_i32_143 : i32 to vector<1x259xi32>
    %175 = arith.muli %174, %173 : vector<1x259xi32>
    %c-5_i32 = arith.constant -5 : i32
    %176 = vector.broadcast %c-5_i32 : i32 to vector<1x259xi32>
    %177 = arith.addi %175, %176 : vector<1x259xi32>
    %c0_i32_144 = arith.constant 0 : i32
    %178 = vector.broadcast %c0_i32_144 : i32 to vector<1x259xi32>
    %179 = arith.cmpi sge, %177, %178 : vector<1x259xi32>
    %c1024_i32_145 = arith.constant 1024 : i32
    %180 = vector.broadcast %c1024_i32_145 : i32 to vector<1x259xi32>
    %181 = arith.cmpi slt, %177, %180 : vector<1x259xi32>
    %182 = arith.andi %179, %181 : vector<1x259xi1>
    %cst_146 = arith.constant 0.000000e+00 : f32
    %183 = vector.broadcast %cst_146 : f32 to vector<8x259xf32>
    %184 = arith.cmpf ogt, %73, %183 : vector<8x259xf32>
    %cst_147 = arith.constant 2.000000e-01 : f32
    %185 = vector.broadcast %cst_147 : f32 to vector<8x259xf32>
    %186 = arith.mulf %185, %73 : vector<8x259xf32>
    %187 = arith.select %184, %73, %186 : vector<8x259xi1>, vector<8x259xf32>
    %cst_148 = arith.constant 0.000000e+00 : f32
    %188 = vector.shape_cast %182 : vector<1x259xi1> to vector<1x259xi1>
    %189 = vector.broadcast %188 : vector<1x259xi1> to vector<8x259xi1>
    %190 = vector.broadcast %cst_148 : f32 to vector<8x259xf32>
    %191 = arith.select %189, %187, %190 : vector<8x259xi1>, vector<8x259xf32>
    %192 = tpu.iota {dimensions = array<i32: 1>} : vector<1x259xi32>
    %c256_i32_149 = arith.constant 256 : i32
    %193 = arith.muli %c256_i32_149, %arg1 : i32
    %194 = vector.broadcast %193 : i32 to vector<1x259xi32>
    %195 = arith.addi %192, %194 : vector<1x259xi32>
    %c4_i32_150 = arith.constant 4 : i32
    %196 = vector.broadcast %c4_i32_150 : i32 to vector<1x259xi32>
    %197 = arith.muli %196, %195 : vector<1x259xi32>
    %c-4_i32 = arith.constant -4 : i32
    %198 = vector.broadcast %c-4_i32 : i32 to vector<1x259xi32>
    %199 = arith.addi %197, %198 : vector<1x259xi32>
    %c0_i32_151 = arith.constant 0 : i32
    %200 = vector.broadcast %c0_i32_151 : i32 to vector<1x259xi32>
    %201 = arith.cmpi sge, %199, %200 : vector<1x259xi32>
    %c1024_i32_152 = arith.constant 1024 : i32
    %202 = vector.broadcast %c1024_i32_152 : i32 to vector<1x259xi32>
    %203 = arith.cmpi slt, %199, %202 : vector<1x259xi32>
    %204 = arith.andi %201, %203 : vector<1x259xi1>
    %cst_153 = arith.constant 0.000000e+00 : f32
    %205 = vector.broadcast %cst_153 : f32 to vector<8x259xf32>
    %206 = arith.cmpf ogt, %102, %205 : vector<8x259xf32>
    %cst_154 = arith.constant 2.000000e-01 : f32
    %207 = vector.broadcast %cst_154 : f32 to vector<8x259xf32>
    %208 = arith.mulf %207, %102 : vector<8x259xf32>
    %209 = arith.select %206, %102, %208 : vector<8x259xi1>, vector<8x259xf32>
    %cst_155 = arith.constant 0.000000e+00 : f32
    %210 = vector.shape_cast %204 : vector<1x259xi1> to vector<1x259xi1>
    %211 = vector.broadcast %210 : vector<1x259xi1> to vector<8x259xi1>
    %212 = vector.broadcast %cst_155 : f32 to vector<8x259xf32>
    %213 = arith.select %211, %209, %212 : vector<8x259xi1>, vector<8x259xf32>
    %214 = tpu.iota {dimensions = array<i32: 1>} : vector<1x259xi32>
    %c256_i32_156 = arith.constant 256 : i32
    %215 = arith.muli %c256_i32_156, %arg1 : i32
    %216 = vector.broadcast %215 : i32 to vector<1x259xi32>
    %217 = arith.addi %214, %216 : vector<1x259xi32>
    %c4_i32_157 = arith.constant 4 : i32
    %218 = vector.broadcast %c4_i32_157 : i32 to vector<1x259xi32>
    %219 = arith.muli %218, %217 : vector<1x259xi32>
    %c-3_i32 = arith.constant -3 : i32
    %220 = vector.broadcast %c-3_i32 : i32 to vector<1x259xi32>
    %221 = arith.addi %219, %220 : vector<1x259xi32>
    %c0_i32_158 = arith.constant 0 : i32
    %222 = vector.broadcast %c0_i32_158 : i32 to vector<1x259xi32>
    %223 = arith.cmpi sge, %221, %222 : vector<1x259xi32>
    %c1024_i32_159 = arith.constant 1024 : i32
    %224 = vector.broadcast %c1024_i32_159 : i32 to vector<1x259xi32>
    %225 = arith.cmpi slt, %221, %224 : vector<1x259xi32>
    %226 = arith.andi %223, %225 : vector<1x259xi1>
    %cst_160 = arith.constant 0.000000e+00 : f32
    %227 = vector.broadcast %cst_160 : f32 to vector<8x259xf32>
    %228 = arith.cmpf ogt, %131, %227 : vector<8x259xf32>
    %cst_161 = arith.constant 2.000000e-01 : f32
    %229 = vector.broadcast %cst_161 : f32 to vector<8x259xf32>
    %230 = arith.mulf %229, %131 : vector<8x259xf32>
    %231 = arith.select %228, %131, %230 : vector<8x259xi1>, vector<8x259xf32>
    %cst_162 = arith.constant 0.000000e+00 : f32
    %232 = vector.shape_cast %226 : vector<1x259xi1> to vector<1x259xi1>
    %233 = vector.broadcast %232 : vector<1x259xi1> to vector<8x259xi1>
    %234 = vector.broadcast %cst_162 : f32 to vector<8x259xf32>
    %235 = arith.select %233, %231, %234 : vector<8x259xi1>, vector<8x259xf32>
    %cst_163 = arith.constant 0.000000e+00 : f32
    %236 = vector.broadcast %cst_163 : f32 to vector<16x258xf32>
    %c0_164 = arith.constant 0 : index
    %c0_165 = arith.constant 0 : index
    %c0_166 = arith.constant 0 : index
    %237 = vector.load %arg5[%c0_164, %c0_165, %c0_166] : memref<5x16x8xf32, #tpu.memory_space<vmem>>, vector<1x16x8xf32>
    %238 = vector.shape_cast %237 : vector<1x16x8xf32> to vector<16x8xf32>
    %239 = vector.extract_strided_slice %169 {offsets = [0, 0], sizes = [8, 258], strides = [1, 1]} : vector<8x259xf32> to vector<8x258xf32>
    %cst_167 = arith.constant dense<0.000000e+00> : vector<16x258xf32>
    %240 = tpu.matmul %238, %239, %cst_167 {dimension_numbers = #tpu.dot_dimension_numbers<[1], [0], [0], [1], [0, 0, 1, 1], [], []>} : vector<16x8xf32>, vector<8x258xf32>, vector<16x258xf32> -> vector<16x258xf32>
    %241 = arith.addf %236, %240 : vector<16x258xf32>
    %c1_168 = arith.constant 1 : index
    %c0_169 = arith.constant 0 : index
    %c0_170 = arith.constant 0 : index
    %242 = vector.load %arg5[%c1_168, %c0_169, %c0_170] : memref<5x16x8xf32, #tpu.memory_space<vmem>>, vector<1x16x8xf32>
    %243 = vector.shape_cast %242 : vector<1x16x8xf32> to vector<16x8xf32>
    %244 = vector.extract_strided_slice %191 {offsets = [0, 0], sizes = [8, 258], strides = [1, 1]} : vector<8x259xf32> to vector<8x258xf32>
    %cst_171 = arith.constant dense<0.000000e+00> : vector<16x258xf32>
    %245 = tpu.matmul %243, %244, %cst_171 {dimension_numbers = #tpu.dot_dimension_numbers<[1], [0], [0], [1], [0, 0, 1, 1], [], []>} : vector<16x8xf32>, vector<8x258xf32>, vector<16x258xf32> -> vector<16x258xf32>
    %246 = arith.addf %241, %245 : vector<16x258xf32>
    %c2_172 = arith.constant 2 : index
    %c0_173 = arith.constant 0 : index
    %c0_174 = arith.constant 0 : index
    %247 = vector.load %arg5[%c2_172, %c0_173, %c0_174] : memref<5x16x8xf32, #tpu.memory_space<vmem>>, vector<1x16x8xf32>
    %248 = vector.shape_cast %247 : vector<1x16x8xf32> to vector<16x8xf32>
    %249 = vector.extract_strided_slice %213 {offsets = [0, 0], sizes = [8, 258], strides = [1, 1]} : vector<8x259xf32> to vector<8x258xf32>
    %cst_175 = arith.constant dense<0.000000e+00> : vector<16x258xf32>
    %250 = tpu.matmul %248, %249, %cst_175 {dimension_numbers = #tpu.dot_dimension_numbers<[1], [0], [0], [1], [0, 0, 1, 1], [], []>} : vector<16x8xf32>, vector<8x258xf32>, vector<16x258xf32> -> vector<16x258xf32>
    %251 = arith.addf %246, %250 : vector<16x258xf32>
    %c3_176 = arith.constant 3 : index
    %c0_177 = arith.constant 0 : index
    %c0_178 = arith.constant 0 : index
    %252 = vector.load %arg5[%c3_176, %c0_177, %c0_178] : memref<5x16x8xf32, #tpu.memory_space<vmem>>, vector<1x16x8xf32>
    %253 = vector.shape_cast %252 : vector<1x16x8xf32> to vector<16x8xf32>
    %254 = vector.extract_strided_slice %235 {offsets = [0, 0], sizes = [8, 258], strides = [1, 1]} : vector<8x259xf32> to vector<8x258xf32>
    %cst_179 = arith.constant dense<0.000000e+00> : vector<16x258xf32>
    %255 = tpu.matmul %253, %254, %cst_179 {dimension_numbers = #tpu.dot_dimension_numbers<[1], [0], [0], [1], [0, 0, 1, 1], [], []>} : vector<16x8xf32>, vector<8x258xf32>, vector<16x258xf32> -> vector<16x258xf32>
    %256 = arith.addf %251, %255 : vector<16x258xf32>
    %c4_180 = arith.constant 4 : index
    %c0_181 = arith.constant 0 : index
    %c0_182 = arith.constant 0 : index
    %257 = vector.load %arg5[%c4_180, %c0_181, %c0_182] : memref<5x16x8xf32, #tpu.memory_space<vmem>>, vector<1x16x8xf32>
    %258 = vector.shape_cast %257 : vector<1x16x8xf32> to vector<16x8xf32>
    %259 = vector.extract_strided_slice %169 {offsets = [0, 1], sizes = [8, 258], strides = [1, 1]} : vector<8x259xf32> to vector<8x258xf32>
    %cst_183 = arith.constant dense<0.000000e+00> : vector<16x258xf32>
    %260 = tpu.matmul %258, %259, %cst_183 {dimension_numbers = #tpu.dot_dimension_numbers<[1], [0], [0], [1], [0, 0, 1, 1], [], []>} : vector<16x8xf32>, vector<8x258xf32>, vector<16x258xf32> -> vector<16x258xf32>
    %261 = arith.addf %256, %260 : vector<16x258xf32>
    %c0_184 = arith.constant 0 : index
    %c0_185 = arith.constant 0 : index
    %262 = vector.load %arg6[%c0_184, %c0_185] : memref<16x1xf32, #tpu.memory_space<vmem>>, vector<16x1xf32>
    %263 = vector.broadcast %262 : vector<16x1xf32> to vector<16x258xf32>
    %264 = arith.addf %261, %263 : vector<16x258xf32>
    %cst_186 = arith.constant 0.000000e+00 : f32
    %265 = vector.broadcast %cst_186 : f32 to vector<16x258xf32>
    %c0_187 = arith.constant 0 : index
    %c0_188 = arith.constant 0 : index
    %c0_189 = arith.constant 0 : index
    %266 = vector.load %arg5[%c0_187, %c0_188, %c0_189] : memref<5x16x8xf32, #tpu.memory_space<vmem>>, vector<1x16x8xf32>
    %267 = vector.shape_cast %266 : vector<1x16x8xf32> to vector<16x8xf32>
    %268 = vector.extract_strided_slice %213 {offsets = [0, 0], sizes = [8, 258], strides = [1, 1]} : vector<8x259xf32> to vector<8x258xf32>
    %cst_190 = arith.constant dense<0.000000e+00> : vector<16x258xf32>
    %269 = tpu.matmul %267, %268, %cst_190 {dimension_numbers = #tpu.dot_dimension_numbers<[1], [0], [0], [1], [0, 0, 1, 1], [], []>} : vector<16x8xf32>, vector<8x258xf32>, vector<16x258xf32> -> vector<16x258xf32>
    %270 = arith.addf %265, %269 : vector<16x258xf32>
    %c1_191 = arith.constant 1 : index
    %c0_192 = arith.constant 0 : index
    %c0_193 = arith.constant 0 : index
    %271 = vector.load %arg5[%c1_191, %c0_192, %c0_193] : memref<5x16x8xf32, #tpu.memory_space<vmem>>, vector<1x16x8xf32>
    %272 = vector.shape_cast %271 : vector<1x16x8xf32> to vector<16x8xf32>
    %273 = vector.extract_strided_slice %235 {offsets = [0, 0], sizes = [8, 258], strides = [1, 1]} : vector<8x259xf32> to vector<8x258xf32>
    %cst_194 = arith.constant dense<0.000000e+00> : vector<16x258xf32>
    %274 = tpu.matmul %272, %273, %cst_194 {dimension_numbers = #tpu.dot_dimension_numbers<[1], [0], [0], [1], [0, 0, 1, 1], [], []>} : vector<16x8xf32>, vector<8x258xf32>, vector<16x258xf32> -> vector<16x258xf32>
    %275 = arith.addf %270, %274 : vector<16x258xf32>
    %c2_195 = arith.constant 2 : index
    %c0_196 = arith.constant 0 : index
    %c0_197 = arith.constant 0 : index
    %276 = vector.load %arg5[%c2_195, %c0_196, %c0_197] : memref<5x16x8xf32, #tpu.memory_space<vmem>>, vector<1x16x8xf32>
    %277 = vector.shape_cast %276 : vector<1x16x8xf32> to vector<16x8xf32>
    %278 = vector.extract_strided_slice %169 {offsets = [0, 1], sizes = [8, 258], strides = [1, 1]} : vector<8x259xf32> to vector<8x258xf32>
    %cst_198 = arith.constant dense<0.000000e+00> : vector<16x258xf32>
    %279 = tpu.matmul %277, %278, %cst_198 {dimension_numbers = #tpu.dot_dimension_numbers<[1], [0], [0], [1], [0, 0, 1, 1], [], []>} : vector<16x8xf32>, vector<8x258xf32>, vector<16x258xf32> -> vector<16x258xf32>
    %280 = arith.addf %275, %279 : vector<16x258xf32>
    %c3_199 = arith.constant 3 : index
    %c0_200 = arith.constant 0 : index
    %c0_201 = arith.constant 0 : index
    %281 = vector.load %arg5[%c3_199, %c0_200, %c0_201] : memref<5x16x8xf32, #tpu.memory_space<vmem>>, vector<1x16x8xf32>
    %282 = vector.shape_cast %281 : vector<1x16x8xf32> to vector<16x8xf32>
    %283 = vector.extract_strided_slice %191 {offsets = [0, 1], sizes = [8, 258], strides = [1, 1]} : vector<8x259xf32> to vector<8x258xf32>
    %cst_202 = arith.constant dense<0.000000e+00> : vector<16x258xf32>
    %284 = tpu.matmul %282, %283, %cst_202 {dimension_numbers = #tpu.dot_dimension_numbers<[1], [0], [0], [1], [0, 0, 1, 1], [], []>} : vector<16x8xf32>, vector<8x258xf32>, vector<16x258xf32> -> vector<16x258xf32>
    %285 = arith.addf %280, %284 : vector<16x258xf32>
    %c4_203 = arith.constant 4 : index
    %c0_204 = arith.constant 0 : index
    %c0_205 = arith.constant 0 : index
    %286 = vector.load %arg5[%c4_203, %c0_204, %c0_205] : memref<5x16x8xf32, #tpu.memory_space<vmem>>, vector<1x16x8xf32>
    %287 = vector.shape_cast %286 : vector<1x16x8xf32> to vector<16x8xf32>
    %288 = vector.extract_strided_slice %213 {offsets = [0, 1], sizes = [8, 258], strides = [1, 1]} : vector<8x259xf32> to vector<8x258xf32>
    %cst_206 = arith.constant dense<0.000000e+00> : vector<16x258xf32>
    %289 = tpu.matmul %287, %288, %cst_206 {dimension_numbers = #tpu.dot_dimension_numbers<[1], [0], [0], [1], [0, 0, 1, 1], [], []>} : vector<16x8xf32>, vector<8x258xf32>, vector<16x258xf32> -> vector<16x258xf32>
    %290 = arith.addf %285, %289 : vector<16x258xf32>
    %c0_207 = arith.constant 0 : index
    %c0_208 = arith.constant 0 : index
    %291 = vector.load %arg6[%c0_207, %c0_208] : memref<16x1xf32, #tpu.memory_space<vmem>>, vector<16x1xf32>
    %292 = vector.broadcast %291 : vector<16x1xf32> to vector<16x258xf32>
    %293 = arith.addf %290, %292 : vector<16x258xf32>
    %294 = vector.extract_strided_slice %264 {offsets = [0, 1], sizes = [16, 256], strides = [1, 1]} : vector<16x258xf32> to vector<16x256xf32>
    %c0_209 = arith.constant 0 : index
    %c0_210 = arith.constant 0 : index
    %c0_211 = arith.constant 0 : index
    %c0_212 = arith.constant 0 : index
    %295 = vector.load %arg12[%c0_209, %c0_210, %c0_211, %c0_212] : memref<1x2x16x256xf32, #tpu.memory_space<vmem>>, vector<1x1x16x256xf32>
    %296 = vector.shape_cast %295 : vector<1x1x16x256xf32> to vector<16x256xf32>
    %297 = vector.shape_cast %294 : vector<16x256xf32> to vector<1x1x16x256xf32>
    tpu.vector_store %arg12[%c0_209, %c0_210, %c0_211, %c0_212], %297 {strides = array<i32>} : memref<1x2x16x256xf32, #tpu.memory_space<vmem>>, vector<1x1x16x256xf32>,
    %298 = vector.extract_strided_slice %293 {offsets = [0, 1], sizes = [16, 256], strides = [1, 1]} : vector<16x258xf32> to vector<16x256xf32>
    %c0_213 = arith.constant 0 : index
    %c1_214 = arith.constant 1 : index
    %c0_215 = arith.constant 0 : index
    %c0_216 = arith.constant 0 : index
    %299 = vector.load %arg12[%c0_213, %c1_214, %c0_215, %c0_216] : memref<1x2x16x256xf32, #tpu.memory_space<vmem>>, vector<1x1x16x256xf32>
    %300 = vector.shape_cast %299 : vector<1x1x16x256xf32> to vector<16x256xf32>
    %301 = vector.shape_cast %298 : vector<16x256xf32> to vector<1x1x16x256xf32>
    tpu.vector_store %arg12[%c0_213, %c1_214, %c0_215, %c0_216], %301 {strides = array<i32>} : memref<1x2x16x256xf32, #tpu.memory_space<vmem>>, vector<1x1x16x256xf32>,
    %302 = tpu.iota {dimensions = array<i32: 1>} : vector<1x258xi32>
    %c256_i32_217 = arith.constant 256 : i32
    %303 = arith.muli %c256_i32_217, %arg1 : i32
    %304 = vector.broadcast %303 : i32 to vector<1x258xi32>
    %305 = arith.addi %302, %304 : vector<1x258xi32>
    %c2_i32 = arith.constant 2 : i32
    %306 = vector.broadcast %c2_i32 : i32 to vector<1x258xi32>
    %307 = arith.muli %306, %305 : vector<1x258xi32>
    %c-2_i32 = arith.constant -2 : i32
    %308 = vector.broadcast %c-2_i32 : i32 to vector<1x258xi32>
    %309 = arith.addi %307, %308 : vector<1x258xi32>
    %c0_i32_218 = arith.constant 0 : i32
    %310 = vector.broadcast %c0_i32_218 : i32 to vector<1x258xi32>
    %311 = arith.cmpi sge, %309, %310 : vector<1x258xi32>
    %c512_i32 = arith.constant 512 : i32
    %312 = vector.broadcast %c512_i32 : i32 to vector<1x258xi32>
    %313 = arith.cmpi slt, %309, %312 : vector<1x258xi32>
    %314 = arith.andi %311, %313 : vector<1x258xi1>
    %cst_219 = arith.constant 0.000000e+00 : f32
    %315 = vector.broadcast %cst_219 : f32 to vector<16x258xf32>
    %316 = arith.cmpf ogt, %264, %315 : vector<16x258xf32>
    %cst_220 = arith.constant 2.000000e-01 : f32
    %317 = vector.broadcast %cst_220 : f32 to vector<16x258xf32>
    %318 = arith.mulf %317, %264 : vector<16x258xf32>
    %319 = arith.select %316, %264, %318 : vector<16x258xi1>, vector<16x258xf32>
    %cst_221 = arith.constant 0.000000e+00 : f32
    %320 = vector.shape_cast %314 : vector<1x258xi1> to vector<1x258xi1>
    %321 = vector.broadcast %320 : vector<1x258xi1> to vector<16x258xi1>
    %322 = vector.broadcast %cst_221 : f32 to vector<16x258xf32>
    %323 = arith.select %321, %319, %322 : vector<16x258xi1>, vector<16x258xf32>
    %324 = tpu.iota {dimensions = array<i32: 1>} : vector<1x258xi32>
    %c256_i32_222 = arith.constant 256 : i32
    %325 = arith.muli %c256_i32_222, %arg1 : i32
    %326 = vector.broadcast %325 : i32 to vector<1x258xi32>
    %327 = arith.addi %324, %326 : vector<1x258xi32>
    %c2_i32_223 = arith.constant 2 : i32
    %328 = vector.broadcast %c2_i32_223 : i32 to vector<1x258xi32>
    %329 = arith.muli %328, %327 : vector<1x258xi32>
    %c-1_i32 = arith.constant -1 : i32
    %330 = vector.broadcast %c-1_i32 : i32 to vector<1x258xi32>
    %331 = arith.addi %329, %330 : vector<1x258xi32>
    %c0_i32_224 = arith.constant 0 : i32
    %332 = vector.broadcast %c0_i32_224 : i32 to vector<1x258xi32>
    %333 = arith.cmpi sge, %331, %332 : vector<1x258xi32>
    %c512_i32_225 = arith.constant 512 : i32
    %334 = vector.broadcast %c512_i32_225 : i32 to vector<1x258xi32>
    %335 = arith.cmpi slt, %331, %334 : vector<1x258xi32>
    %336 = arith.andi %333, %335 : vector<1x258xi1>
    %cst_226 = arith.constant 0.000000e+00 : f32
    %337 = vector.broadcast %cst_226 : f32 to vector<16x258xf32>
    %338 = arith.cmpf ogt, %293, %337 : vector<16x258xf32>
    %cst_227 = arith.constant 2.000000e-01 : f32
    %339 = vector.broadcast %cst_227 : f32 to vector<16x258xf32>
    %340 = arith.mulf %339, %293 : vector<16x258xf32>
    %341 = arith.select %338, %293, %340 : vector<16x258xi1>, vector<16x258xf32>
    %cst_228 = arith.constant 0.000000e+00 : f32
    %342 = vector.shape_cast %336 : vector<1x258xi1> to vector<1x258xi1>
    %343 = vector.broadcast %342 : vector<1x258xi1> to vector<16x258xi1>
    %344 = vector.broadcast %cst_228 : f32 to vector<16x258xf32>
    %345 = arith.select %343, %341, %344 : vector<16x258xi1>, vector<16x258xf32>
    %cst_229 = arith.constant 0.000000e+00 : f32
    %346 = vector.broadcast %cst_229 : f32 to vector<32x256xf32>
    %c0_230 = arith.constant 0 : index
    %c0_231 = arith.constant 0 : index
    %c0_232 = arith.constant 0 : index
    %347 = vector.load %arg7[%c0_230, %c0_231, %c0_232] : memref<5x32x16xf32, #tpu.memory_space<vmem>>, vector<1x32x16xf32>
    %348 = vector.shape_cast %347 : vector<1x32x16xf32> to vector<32x16xf32>
    %349 = vector.extract_strided_slice %323 {offsets = [0, 0], sizes = [16, 256], strides = [1, 1]} : vector<16x258xf32> to vector<16x256xf32>
    %cst_233 = arith.constant dense<0.000000e+00> : vector<32x256xf32>
    %350 = tpu.matmul %348, %349, %cst_233 {dimension_numbers = #tpu.dot_dimension_numbers<[1], [0], [0], [1], [0, 0, 1, 1], [], []>} : vector<32x16xf32>, vector<16x256xf32>, vector<32x256xf32> -> vector<32x256xf32>
    %351 = arith.addf %346, %350 : vector<32x256xf32>
    %c1_234 = arith.constant 1 : index
    %c0_235 = arith.constant 0 : index
    %c0_236 = arith.constant 0 : index
    %352 = vector.load %arg7[%c1_234, %c0_235, %c0_236] : memref<5x32x16xf32, #tpu.memory_space<vmem>>, vector<1x32x16xf32>
    %353 = vector.shape_cast %352 : vector<1x32x16xf32> to vector<32x16xf32>
    %354 = vector.extract_strided_slice %345 {offsets = [0, 0], sizes = [16, 256], strides = [1, 1]} : vector<16x258xf32> to vector<16x256xf32>
    %cst_237 = arith.constant dense<0.000000e+00> : vector<32x256xf32>
    %355 = tpu.matmul %353, %354, %cst_237 {dimension_numbers = #tpu.dot_dimension_numbers<[1], [0], [0], [1], [0, 0, 1, 1], [], []>} : vector<32x16xf32>, vector<16x256xf32>, vector<32x256xf32> -> vector<32x256xf32>
    %356 = arith.addf %351, %355 : vector<32x256xf32>
    %c2_238 = arith.constant 2 : index
    %c0_239 = arith.constant 0 : index
    %c0_240 = arith.constant 0 : index
    %357 = vector.load %arg7[%c2_238, %c0_239, %c0_240] : memref<5x32x16xf32, #tpu.memory_space<vmem>>, vector<1x32x16xf32>
    %358 = vector.shape_cast %357 : vector<1x32x16xf32> to vector<32x16xf32>
    %359 = vector.extract_strided_slice %323 {offsets = [0, 1], sizes = [16, 256], strides = [1, 1]} : vector<16x258xf32> to vector<16x256xf32>
    %cst_241 = arith.constant dense<0.000000e+00> : vector<32x256xf32>
    %360 = tpu.matmul %358, %359, %cst_241 {dimension_numbers = #tpu.dot_dimension_numbers<[1], [0], [0], [1], [0, 0, 1, 1], [], []>} : vector<32x16xf32>, vector<16x256xf32>, vector<32x256xf32> -> vector<32x256xf32>
    %361 = arith.addf %356, %360 : vector<32x256xf32>
    %c3_242 = arith.constant 3 : index
    %c0_243 = arith.constant 0 : index
    %c0_244 = arith.constant 0 : index
    %362 = vector.load %arg7[%c3_242, %c0_243, %c0_244] : memref<5x32x16xf32, #tpu.memory_space<vmem>>, vector<1x32x16xf32>
    %363 = vector.shape_cast %362 : vector<1x32x16xf32> to vector<32x16xf32>
    %364 = vector.extract_strided_slice %345 {offsets = [0, 1], sizes = [16, 256], strides = [1, 1]} : vector<16x258xf32> to vector<16x256xf32>
    %cst_245 = arith.constant dense<0.000000e+00> : vector<32x256xf32>
    %365 = tpu.matmul %363, %364, %cst_245 {dimension_numbers = #tpu.dot_dimension_numbers<[1], [0], [0], [1], [0, 0, 1, 1], [], []>} : vector<32x16xf32>, vector<16x256xf32>, vector<32x256xf32> -> vector<32x256xf32>
    %366 = arith.addf %361, %365 : vector<32x256xf32>
    %c4_246 = arith.constant 4 : index
    %c0_247 = arith.constant 0 : index
    %c0_248 = arith.constant 0 : index
    %367 = vector.load %arg7[%c4_246, %c0_247, %c0_248] : memref<5x32x16xf32, #tpu.memory_space<vmem>>, vector<1x32x16xf32>
    %368 = vector.shape_cast %367 : vector<1x32x16xf32> to vector<32x16xf32>
    %369 = vector.extract_strided_slice %323 {offsets = [0, 2], sizes = [16, 256], strides = [1, 1]} : vector<16x258xf32> to vector<16x256xf32>
    %cst_249 = arith.constant dense<0.000000e+00> : vector<32x256xf32>
    %370 = tpu.matmul %368, %369, %cst_249 {dimension_numbers = #tpu.dot_dimension_numbers<[1], [0], [0], [1], [0, 0, 1, 1], [], []>} : vector<32x16xf32>, vector<16x256xf32>, vector<32x256xf32> -> vector<32x256xf32>
    %371 = arith.addf %366, %370 : vector<32x256xf32>
    %c0_250 = arith.constant 0 : index
    %c0_251 = arith.constant 0 : index
    %372 = vector.load %arg8[%c0_250, %c0_251] : memref<32x1xf32, #tpu.memory_space<vmem>>, vector<32x1xf32>
    %373 = vector.broadcast %372 : vector<32x1xf32> to vector<32x256xf32>
    %374 = arith.addf %371, %373 : vector<32x256xf32>
    %c0_252 = arith.constant 0 : index
    %c0_253 = arith.constant 0 : index
    %c0_254 = arith.constant 0 : index
    %c0_255 = arith.constant 0 : index
    %375 = vector.load %arg13[%c0_252, %c0_253, %c0_254, %c0_255] : memref<1x1x32x256xf32, #tpu.memory_space<vmem>>, vector<1x1x32x256xf32>
    %376 = vector.shape_cast %375 : vector<1x1x32x256xf32> to vector<32x256xf32>
    %377 = vector.shape_cast %374 : vector<32x256xf32> to vector<1x1x32x256xf32>
    tpu.vector_store %arg13[%c0_252, %c0_253, %c0_254, %c0_255], %377 {strides = array<i32>} : memref<1x1x32x256xf32, #tpu.memory_space<vmem>>, vector<1x1x32x256xf32>,
    %378 = tpu.iota {dimensions = array<i32: 1>} : vector<1x256xi32>
    %c256_i32_256 = arith.constant 256 : i32
    %379 = arith.muli %c256_i32_256, %arg1 : i32
    %380 = vector.broadcast %379 : i32 to vector<1x256xi32>
    %381 = arith.addi %378, %380 : vector<1x256xi32>
    %c1_i32 = arith.constant 1 : i32
    %382 = vector.broadcast %c1_i32 : i32 to vector<1x256xi32>
    %383 = arith.muli %382, %381 : vector<1x256xi32>
    %c0_i32_257 = arith.constant 0 : i32
    %384 = vector.broadcast %c0_i32_257 : i32 to vector<1x256xi32>
    %385 = arith.addi %383, %384 : vector<1x256xi32>
    %c0_i32_258 = arith.constant 0 : i32
    %386 = vector.broadcast %c0_i32_258 : i32 to vector<1x256xi32>
    %387 = arith.cmpi sge, %385, %386 : vector<1x256xi32>
    %c256_i32_259 = arith.constant 256 : i32
    %388 = vector.broadcast %c256_i32_259 : i32 to vector<1x256xi32>
    %389 = arith.cmpi slt, %385, %388 : vector<1x256xi32>
    %390 = arith.andi %387, %389 : vector<1x256xi1>
    %cst_260 = arith.constant 0.000000e+00 : f32
    %391 = vector.broadcast %cst_260 : f32 to vector<32x256xf32>
    %392 = arith.cmpf ogt, %374, %391 : vector<32x256xf32>
    %cst_261 = arith.constant 2.000000e-01 : f32
    %393 = vector.broadcast %cst_261 : f32 to vector<32x256xf32>
    %394 = arith.mulf %393, %374 : vector<32x256xf32>
    %395 = arith.select %392, %374, %394 : vector<32x256xi1>, vector<32x256xf32>
    %cst_262 = arith.constant 0.000000e+00 : f32
    %396 = vector.shape_cast %390 : vector<1x256xi1> to vector<1x256xi1>
    %397 = vector.broadcast %396 : vector<1x256xi1> to vector<32x256xi1>
    %398 = vector.broadcast %cst_262 : f32 to vector<32x256xf32>
    %399 = arith.select %397, %395, %398 : vector<32x256xi1>, vector<32x256xf32>
    %c0_263 = arith.constant 0 : index
    %c0_264 = arith.constant 0 : index
    %400 = vector.load %arg9[%c0_263, %c0_264] : memref<1x32xf32, #tpu.memory_space<vmem>>, vector<1x32xf32>
    %cst_265 = arith.constant dense<0.000000e+00> : vector<1x256xf32>
    %401 = tpu.matmul %400, %399, %cst_265 {dimension_numbers = #tpu.dot_dimension_numbers<[1], [0], [0], [1], [0, 0, 1, 1], [], []>} : vector<1x32xf32>, vector<32x256xf32>, vector<1x256xf32> -> vector<1x256xf32>
    %c0_266 = arith.constant 0 : index
    %c0_267 = arith.constant 0 : index
    %402 = vector.load %arg10[%c0_266, %c0_267] : memref<1x1xf32, #tpu.memory_space<vmem>>, vector<1x1xf32>
    %403 = vector.broadcast %402 : vector<1x1xf32> to vector<1x256xf32>
    %404 = arith.addf %401, %403 : vector<1x256xf32>
    %c0_268 = arith.constant 0 : index
    %c0_269 = arith.constant 0 : index
    %c0_270 = arith.constant 0 : index
    %c0_271 = arith.constant 0 : index
    %405 = vector.load %arg14[%c0_268, %c0_269, %c0_270, %c0_271] : memref<1x1x1x256xf32, #tpu.memory_space<vmem>>, vector<1x1x1x256xf32>
    %406 = vector.shape_cast %405 : vector<1x1x1x256xf32> to vector<1x256xf32>
    %407 = vector.shape_cast %404 : vector<1x256xf32> to vector<1x1x1x256xf32>
    tpu.vector_store %arg14[%c0_268, %c0_269, %c0_270, %c0_271], %407 {strides = array<i32>} : memref<1x1x1x256xf32, #tpu.memory_space<vmem>>, vector<1x1x1x256xf32>,
    return
  }
  func.func @transform_0(%arg0: i32, %arg1: i32) -> (i32, i32, i32, i32, i32) {
    %c0_i32 = arith.constant 0 : i32
    %c0_i32_0 = arith.constant 0 : i32
    %c0_i32_1 = arith.constant 0 : i32
    %c0_i32_2 = arith.constant 0 : i32
    return %arg0, %arg1, %c0_i32, %c0_i32_0, %c0_i32_1 : i32, i32, i32, i32, i32
  }
  func.func @transform_1(%arg0: i32, %arg1: i32) -> (i32, i32, i32) {
    %c0_i32 = arith.constant 0 : i32
    %c0_i32_0 = arith.constant 0 : i32
    %c0_i32_1 = arith.constant 0 : i32
    %c0_i32_2 = arith.constant 0 : i32
    return %c0_i32, %c0_i32_0, %c0_i32_1 : i32, i32, i32
  }
  func.func @transform_2(%arg0: i32, %arg1: i32) -> (i32, i32) {
    %c0_i32 = arith.constant 0 : i32
    %c0_i32_0 = arith.constant 0 : i32
    %c0_i32_1 = arith.constant 0 : i32
    return %c0_i32, %c0_i32_0 : i32, i32
  }
  func.func @transform_3(%arg0: i32, %arg1: i32) -> (i32, i32, i32) {
    %c0_i32 = arith.constant 0 : i32
    %c0_i32_0 = arith.constant 0 : i32
    %c0_i32_1 = arith.constant 0 : i32
    %c0_i32_2 = arith.constant 0 : i32
    return %c0_i32, %c0_i32_0, %c0_i32_1 : i32, i32, i32
  }
  func.func @transform_4(%arg0: i32, %arg1: i32) -> (i32, i32) {
    %c0_i32 = arith.constant 0 : i32
    %c0_i32_0 = arith.constant 0 : i32
    %c0_i32_1 = arith.constant 0 : i32
    return %c0_i32, %c0_i32_0 : i32, i32
  }
  func.func @transform_5(%arg0: i32, %arg1: i32) -> (i32, i32, i32) {
    %c0_i32 = arith.constant 0 : i32
    %c0_i32_0 = arith.constant 0 : i32
    %c0_i32_1 = arith.constant 0 : i32
    %c0_i32_2 = arith.constant 0 : i32
    return %c0_i32, %c0_i32_0, %c0_i32_1 : i32, i32, i32
  }
  func.func @transform_6(%arg0: i32, %arg1: i32) -> (i32, i32) {
    %c0_i32 = arith.constant 0 : i32
    %c0_i32_0 = arith.constant 0 : i32
    %c0_i32_1 = arith.constant 0 : i32
    return %c0_i32, %c0_i32_0 : i32, i32
  }
  func.func @transform_7(%arg0: i32, %arg1: i32) -> (i32, i32) {
    %c0_i32 = arith.constant 0 : i32
    %c0_i32_0 = arith.constant 0 : i32
    %c0_i32_1 = arith.constant 0 : i32
    return %c0_i32, %c0_i32_0 : i32, i32
  }
  func.func @transform_8(%arg0: i32, %arg1: i32) -> (i32, i32) {
    %c0_i32 = arith.constant 0 : i32
    %c0_i32_0 = arith.constant 0 : i32
    %c0_i32_1 = arith.constant 0 : i32
    return %c0_i32, %c0_i32_0 : i32, i32
  }
  func.func @transform_9(%arg0: i32, %arg1: i32) -> (i32, i32, i32, i32) {
    %c0_i32 = arith.constant 0 : i32
    %c0_i32_0 = arith.constant 0 : i32
    %c0_i32_1 = arith.constant 0 : i32
    return %arg0, %c0_i32, %c0_i32_0, %arg1 : i32, i32, i32, i32
  }
  func.func @transform_10(%arg0: i32, %arg1: i32) -> (i32, i32, i32, i32) {
    %c0_i32 = arith.constant 0 : i32
    %c0_i32_0 = arith.constant 0 : i32
    %c0_i32_1 = arith.constant 0 : i32
    return %arg0, %c0_i32, %c0_i32_0, %arg1 : i32, i32, i32, i32
  }
  func.func @transform_11(%arg0: i32, %arg1: i32) -> (i32, i32, i32, i32) {
    %c0_i32 = arith.constant 0 : i32
    %c0_i32_0 = arith.constant 0 : i32
    %c0_i32_1 = arith.constant 0 : i32
    return %arg0, %c0_i32, %c0_i32_0, %arg1 : i32, i32, i32, i32
  }
  func.func @transform_12(%arg0: i32, %arg1: i32) -> (i32, i32, i32, i32) {
    %c0_i32 = arith.constant 0 : i32
    %c0_i32_0 = arith.constant 0 : i32
    %c0_i32_1 = arith.constant 0 : i32
    return %arg0, %c0_i32, %c0_i32_0, %arg1 : i32, i32, i32, i32
  }
}

</mosaic_0001>

<bundles_post_ra>
// kernel: tpu_custom_call.1
= control target key start
LH: loop header
LB: loop body
LE: loop exit
PB: predicated region body
PF: predicated region fallthrough
CT: control target
= control target key end

     0   :  { %s8967_s0 = inlined_call_operand.vmem [shape: f32[2,1,8,4,260], index: 0, kind: input, shape index: {}]   ;;  %s8968_s1 = inlined_call_operand.vmem [shape: f32[5,8,4], index: 1, kind: input, shape index: {}]   ;;  %s8969_s2 = inlined_call_operand.vmem [shape: f32[8,1], index: 2, kind: input, shape index: {}]   ;;  %s8970_s3 = inlined_call_operand.vmem [shape: f32[5,16,8], index: 3, kind: input, shape index: {}]   ;;  %s8971_s4 = inlined_call_operand.vmem [shape: f32[16,1], index: 4, kind: input, shape index: {}]   ;;  %s8972_s5 = inlined_call_operand.vmem [shape: f32[5,32,16], index: 5, kind: input, shape index: {}]   ;;  %s8973_s6 = inlined_call_operand.vmem [shape: f32[32,1], index: 6, kind: input, shape index: {}]   ;;  %s8974_s7 = inlined_call_operand.vmem [shape: f32[1,32], index: 7, kind: input, shape index: {}]   ;;  %s8975_s8 = inlined_call_operand.<no memory space> [shape: f32[1,1], index: 8, kind: input, shape index: {}]   ;;  %s8976_s9 = inlined_call_operand.hbm [shape: f32[2,4,8,256], index: 9, kind: output, shape index: {0}]   ;;  %s8977_s10 = inlined_call_operand.hbm [shape: f32[2,2,16,256], index: 10, kind: output, shape index: {1}]   ;;  %s8978_s11 = inlined_call_operand.hbm [shape: f32[2,1,32,256], index: 11, kind: output, shape index: {2}]   ;;  %s8979_s12 = inlined_call_operand.hbm [shape: f32[2,1,1,256], index: 12, kind: output, shape index: {3}]  }
   0x1   :  { %8987 = sst [smem:[#allocation14_spill]] %s8967_s0  ;;  %v18_v0 = vstv %s8975_s8 }
   0x2   :  { %8988 = sst [smem:[#allocation15_spill]] %s8968_s1  ;;  %19 = vst [vmem:[#allocation2] sm:$0x1] %v18_v0 }
   0x3   :  { %8989 = sst [smem:[#allocation16_spill]] %s8969_s2 }
   0x4   :  { %8990 = sst [smem:[#allocation17_spill]] %s8970_s3 }
   0x5   :  { %8991 = sst [smem:[#allocation18_spill]] %s8971_s4 }
   0x6   :  { %8992 = sst [smem:[#allocation19_spill]] %s8972_s5 }
   0x7   :  { %8993 = sst [smem:[#allocation20_spill]] %s8973_s6 }
   0x8   :  { %8994 = sst [smem:[#allocation21_spill]] %s8974_s7 }
   0x9   :  { %8995 = sst [smem:[#allocation22_spill]] %s8977_s10 }
   0xa   :  { %20 = vsyncpa [#allocation4], 0 }
   0xb   :  { %22 = vsyncpa [#allocation4 + $0x1], 0 }
   0xc   :  { %23 = vsyncpa [#allocation6], 0 }
   0xd   :  { %25 = vsyncpa [#allocation6 + $0x1], 0 }
   0xe   :  { %26 = vsyncpa [#allocation9], 0 }
   0xf   :  { %28 = vsyncpa [#allocation9 + $0x1], 0  ;;  %s7630_s23 = smov 0   ;;  %s7632_s24 = smov 0  }
  0x10   :  { %s7634_s25 = smov 0   ;;  %s7636_s26 = smov 0  }
  0x11   :  { %s7638_s27 = smov 0   ;;  %s7640_s28 = smov 0  }
  0x12 LB: > { %s8981_s8 = sadd.s32 4294967295, %s7548_s28   ;;  %s8980_s29 = sadd.s32 4294967294, %s7548_s28   ;;  %s7548_s28 = sphi %s7640_s28, %s34_s28   ;;  %s7544_s27 = sphi %s7638_s27, %s9043_s27   ;;  %s7540_s26 = sphi %s7636_s26, %s9042_s26   ;;  %s7536_s25 = sphi %s7634_s25, %s9041_s25   ;;  %s7532_s24 = sphi %s7632_s24, %s9040_s24   ;;  %s7528_s23 = sphi %s7630_s23, %s9039_s23  }
  0x13   : > { %s46_s30 = sadd.s32 1, %s7544_s27  ;;  %s251_s13 = sadd.s32 1, %s7536_s25 }
  0x14   : > { %p48_p0 = scmp.ge.s32.totalorder %s46_s30, 2  ;;  %p261_p1 = scmp.ne.s32.totalorder %s7536_s25, %s7532_s24 }
  0x15   : > { %p262_p2 = scmp.eq.s32.totalorder %s8981_s8, 1  ;;  %p267_p3 = scmp.ne.s32.totalorder %s7532_s24, %s7528_s23 }
  0x16   : > { %s9045_s30 = smov (%p48_p0, %s46_s30), 0  ;;  %p268_p5 = scmp.eq.s32.totalorder %s8980_s29, 1 }
  0x17   : > { %8996 = sst [smem:[#allocation13_spill]] %s9045_s30  ;;  %p7672_p4 = por %p262_p2, %p261_p1 }
  0x18   : > { %s246_s15 = ssub.s32 %s7544_s27, %s9045_s30  ;;  %p6617_p6 = scmp.ge.s32.totalorder %s7548_s28, 1 }
  0x19   : > { %p249_p7 = scmp.eq.s32.totalorder %s246_s15, 0  ;;  %p7681_p8 = por %p268_p5, %p267_p3 }
  0x1a   : > { %p406_p9 = scmp.lt.s32.totalorder %s7548_s28, 3 }
  0x1b   : > { %s7687_s17 = scalar_select %p249_p7, %s7536_s25, %s251_s13  }
  0x1c   : > { %p407_p10 = pnand %p6617_p6, %p406_p9 }
  0x1d   : > { %p467_p11 = scmp.lt.s32.totalorder (!%p407_p10), %s7540_s26, 1  ;;  %v7550_v1 = vmov (!%p407_p10), 0.0   ;;  %vm7551_vm0 = vmmov (!%p407_p10), 0   ;;  %v7552_v2 = vmov (!%p407_p10), 0   ;;  %s8999_s0 = sld [smem:[#allocation14_spill]] (!%p407_p10)  ;;  %vm513_vm1 = vcmask (!%p407_p10), 1043456  }
  0x1e   : > { %410 = sbr.rel (%p407_p10) target bundleno = 1352 (0x548), region = 56  ;;  %584 = vmatprep.mubr.f32.mxu0 (!%p407_p10), %v7550_v1  ;;  %6950 = vmatprep.subr.mxu1 (!%p407_p10), %v7550_v1  ;;  %s8982_s13 = smov (!%p407_p10), 127   ;;  %vm509_vm2 = vcmask (!%p407_p10), 31744   ;;  %vm2617_vm3 = vcmask (!%p407_p10), 1039360   ;;  %vm3719_vm4 = vcmask (!%p407_p10), 64512   ;;  %v3582_v49 = vlaneseq (!%p407_p10) }
  0x1f   : > { %6952 = vmatprep.mubr.msk.f32.mxu1 (!%p407_p10), %vm7551_vm0, %v7550_v1  ;;  %7323 = vset.pattern.permute.xlu1 (!%p407_p10), %v7552_v2  ;;  %s9000_s1 = sld [smem:[#allocation15_spill]] (!%p407_p10)  ;;  %s9001_s2 = sld [smem:[#allocation16_spill]] (!%p407_p10) }
  0x20   : > { %7324 = vset.pattern.permute.xlu0 (!%p407_p10), %v7552_v2  ;;  %s9002_s3 = sld [smem:[#allocation17_spill]] (!%p407_p10)  ;;  %v8013_v52 = vand.u32 (!%p407_p10), 127, %v3582_v49  ;;  %s9015_s4 = sld [smem:[#allocation18_spill]] (!%p407_p10) }
  0x21   : > { %s9024_s5 = sld [smem:[#allocation19_spill]] (!%p407_p10)  ;;  %s8984_s20 = smov (!%p407_p10), 126  }
  0x22   : > { %v8016_v56 = vadd.s32 (!%p407_p10), 256, %v8013_v52  ;;  %s9029_s6 = sld [smem:[#allocation20_spill]] (!%p407_p10)  ;;  %s9030_s29 = smov (!%p407_p10), 127  }
  0x23   : > { %s9032_s7 = sld [smem:[#allocation21_spill]] (!%p407_p10)  ;;  %s9033_s15 = sadd.s32 (!%p407_p10), 4294967295, %s7548_s28  }
  0x24   : > { %v8019_v60 = vmul.u32 (!%p407_p10), 4, %v8016_v56  ;;  %s8801_s8 = sshll.u32 (!%p407_p10), %s7540_s26, 10  ;;  %s9034_s10 = sld [smem:[#allocation22_spill]] (!%p407_p10) }
  0x25   : > { %s468_s18 = scalar_select %p467_p11, %s7540_s26, 1  ;;  %v7707_v8 = vld [vmem:[%s9000_s1 + $0x8] sm:$0xff]  ;;  %v7733_v12 = vld [vmem:[%s9000_s1] sm:$0xff]  ;;  %v7752_v15 = vld [vmem:[%s9000_s1 + $0x10] sm:$0xff] }
  0x26   : > { %v7767_v18 = vld [vmem:[%s9000_s1 + $0x18] sm:$0xff]  ;;  %v7787_v21 = vld [vmem:[%s9000_s1 + $0x20] sm:$0xff]  ;;  %v7991_v44 = vld [vmem:[%s9002_s3 + $0x10] sm:$0xff]  ;;  %v3596_v0 = vadd.s32 4294967290, %v8019_v60  ;;  %s7555_s1 = smov [#allocation5]  }
  0x27   : > { %s7244_s19 = smul.u32 96, %s468_s18  ;;  %v1288_v23 = vld [vmem:[%s9001_s2] sm:$0xff]  ;;  %s7382_s2 = sshll.u32 %s7555_s1, 4  ;;  %s7383_s2 = int_to_ptr.vmem [resolvable:$false] %s7382_s2 }
  0x28   : > { %vm3599_vm5 = vcmp.ge.s32.totalorder %v3596_v0, 0  ;;  %vm3602_vm6 = vcmp.lt.s32.totalorder %v3596_v0, 1024  ;;  %v8111_v0 = vld [vmem:[%s9002_s3 + $0x20] sm:$0xff] }
  0x29   : > { %s7698_s22 = scalar_lea.vmem %s8999_s0, %s7244_s19  ;;  %vm8027_vm7 = vmand %vm3599_vm5, %vm3602_vm6  ;;  %s8798_s0 = sand.u32 1, %s9033_s15  }
  0x2a   : > { %v6623_v3 = vld [vmem:[%s7698_s22 + $0xc] sm:$0xff]  ;;  %v480_v4 = vld [vmem:[%s7698_s22] sm:$0xff]  ;;  %v6624_v7 = vld [vmem:[%s7698_s22 + $0x14] sm:$0xf]  ;;  %s8818_s15 = scalar_lea.hbm %s8976_s9, %s8801_s8 }
  0x2b   : > { %v508_v5 = vcombine.high %v6623_v3, %v6623_v3  ;;  %2611 = vrot.lane.b32.xlu1 %v480_v4, %s8982_s13  ;;  %v663_v6 = vcombine.high %v480_v4, %v480_v4  ;;  %6951 = vmatpush3.msk.msra.mxu1 %vm513_vm1, %v6624_v7  ;;  %v7711_v9 = vld [vmem:[%s7698_s22 + $0x18] sm:$0xff]  ;;  %v481_v10 = vld [vmem:[%s7698_s22 + $0x8] sm:$0xf]  ;;  %v6626_v13 = vld [vmem:[%s7698_s22 + $0x20] sm:$0xf] }
  0x2c   : > { %6953 = vmatmul.mubr.msk.f32.vlgmr.msra.gmra.mrb[0].mxu1 %vm509_vm2, %v7707_v8  ;;  %v7724_v11 = vcombine.high %v7711_v9, %v7711_v9  ;;  %6955 = vmatprep.subr.mxu1 %v7550_v1  ;;  %v6627_v14 = vld [vmem:[%s7698_s22 + $0x24] sm:$0xff]  ;;  %v6628_v16 = vld [vmem:[%s7698_s22 + $0x2c] sm:$0xf]  ;;  %v6630_v19 = vld [vmem:[%s7698_s22 + $0x38] sm:$0xf] }
  0x2d   : > { %6638 = vmatprep.subr.msk.mxu0 %vm513_vm1, %v508_v5  ;;  %2613 = vrot.lane.b32.xlu0 %v663_v6, %s8982_s13  ;;  %v976_v17 = vcombine.high %v6627_v14, %v6627_v14  ;;  %v7776_v20 = vld [vmem:[%s7698_s22 + $0x30] sm:$0xff]  ;;  %v6632_v24 = vld [vmem:[%s7698_s22 + $0x44] sm:$0xf]  ;;  %v6631_v26 = vld [vmem:[%s7698_s22 + $0x3c] sm:$0xff] }
  0x2e   : > { %6639 = vmatpush1.msk.msra.mxu0 %vm513_vm1, %v6623_v3  ;;  %6956 = vmatpush3.msk.msra.mxu1 %vm513_vm1, %v481_v10  ;;  %v7791_v22 = vcombine.high %v7776_v20, %v7776_v20  ;;  %v7840_v25 = vld [vmem:[%s7698_s22 + $0x50] sm:$0xf]  ;;  %v1725_v27 = vcombine.high %v6631_v26, %v6631_v26  ;;  %v6636_v28 = vld [vmem:[%s7698_s22 + $0x5c] sm:$0xf]  ;;  %v6633_v29 = vld [vmem:[%s7698_s22 + $0x48] sm:$0xff] }
  0x2f   : > { %6640 = vmatmul.mubr.msk.f32.vlgmr.msra.gmra.mrb[0].mxu0 %vm509_vm2, %v7707_v8  ;;  %6643 = vmatprep.subr.msk.mxu0 %vm513_vm1, %v663_v6  ;;  %v1878_v30 = vcombine.high %v6633_v29, %v6633_v29  ;;  %v6635_v31 = vld [vmem:[%s7698_s22 + $0x54] sm:$0xff]  ;;  %s8717_s22 = sand.u32 1, %s7532_s24  }
  0x30   : > { %6644 = vmatpush1.msk.msra.mxu0 %vm513_vm1, %v480_v4  ;;  %737 = vmatprep.mubr.f32.mxu0 %v7550_v1  ;;  %v2460_v32 = vcombine.high %v6635_v31, %v6635_v31  ;;  %s8723_s19 = sshll.u32 %s8717_s22, 6 }
  0x31   : > { %2615 = vrot.lane.b32.xlu0 %v481_v10, %s8982_s13  ;;  %6957 = vmatprep.mubr.msk.f32.mxu1 %vm7551_vm0, %v7550_v1  ;;  %v8034_v10 = vadd.s32 128, %v8013_v52 }
  0x32   : > { %6958 = vmatmul.mubr.msk.f32.vlgmr.msra.gmra.mrb[2].mxu1 %vm509_vm2, %v7733_v12  ;;  %6649 = vmatprep.subr.msk.mxu0 %vm513_vm1, %v7724_v11 }
  0x33   : > { %6960 = vmatprep.subr.mxu1 %v7550_v1  ;;  %6962 = vmatprep.mubr.msk.f32.mxu1 %vm7551_vm0, %v7550_v1 }
  0x34   : > { %6961 = vmatpush3.msk.msra.mxu1 %vm513_vm1, %v6626_v13  ;;  %3203 = vrot.lane.b32.xlu1 %v6624_v7, %s8982_s13 }
  0x35   : > { %6965 = vmatprep.subr.mxu1 %v7550_v1  ;;  %3361 = vrot.lane.b32.xlu0 %v6626_v13, %s8982_s13 }
  0x36   : > { %6963 = vmatmul.mubr.msk.f32.vlgmr.msra.gmra.mrb[4].mxu1 %vm509_vm2, %v7752_v15 }
  0x37   : > { %6645 = vmatmul.mubr.msk.f32.vlgmr.msra.gmra.mrb[0].mxu0 %vm509_vm2, %v7733_v12  ;;  %6966 = vmatpush3.msk.msra.mxu1 %vm513_vm1, %v6628_v16 }
  0x38   : > { %6650 = vmatpush1.msk.msra.mxu0 %vm513_vm1, %v7711_v9  ;;  %892 = vmatprep.mubr.f32.mxu0 %v7550_v1 }
  0x39   : > { %6967 = vmatprep.mubr.msk.f32.mxu1 %vm7551_vm0, %v7550_v1  ;;  %6655 = vmatprep.subr.msk.mxu0 %vm513_vm1, %v976_v17 }
  0x3a   : > { %6970 = vmatprep.subr.mxu1 %v7550_v1  ;;  %6968 = vmatmul.mubr.msk.f32.vlgmr.msra.gmra.mrb[6].mxu1 %vm509_vm2, %v7767_v18 }
  0x3b   : > { %3201 = vrot.lane.b32.xlu1 %v508_v5, %s8982_s13  ;;  %6971 = vmatpush3.msk.msra.mxu1 %vm513_vm1, %v6630_v19 }
  0x3c   : > { %6972 = vmatprep.mubr.msk.f32.mxu1 %vm7551_vm0, %v7550_v1  ;;  %3199 = vrot.lane.b32.xlu0 %v6623_v3, %s8982_s13 }
  0x3d   : > { %6975 = vmatprep.subr.mxu1 %v7550_v1 }
  0x3e   : > { %6973 = vmatmul.mubr.msk.f32.vlgmr.msra.gmra.mrb[8].mxu1 %vm509_vm2, %v7787_v21 }
  0x3f   : > { %6651 = vmatmul.mubr.msk.f32.vlgmr.msra.gmra.mrb[0].mxu0 %vm509_vm2, %v7752_v15  ;;  %3359 = vrot.lane.b32.xlu1 %v7724_v11, %s8982_s13 }
  0x40   : > { %6656 = vmatpush1.msk.msra.mxu0 %vm513_vm1, %v6627_v14  ;;  %1050 = vmatprep.mubr.f32.mxu0 %v7550_v1 }
  0x41   : > { %6661 = vmatprep.subr.msk.mxu0 %vm513_vm1, %v7791_v22  ;;  %6976 = vmatpush3.msk.msra.mxu1 %vm513_vm1, %v6628_v16  ;;  %v8044_v16 = vmul.u32 4, %v8034_v10 }
  0x42   : > { %6977 = vmatprep.mubr.msk.f32.mxu1 %vm7551_vm0, %v7550_v1  ;;  %3357 = vrot.lane.b32.xlu0 %v7711_v9, %s8982_s13 }
  0x43   : > { %6978 = vmatmul.mubr.msk.f32.vlgmr.msra.gmra.mrb[10].mxu1 %vm509_vm2, %v7707_v8  ;;  %6980 = vmatprep.subr.mxu1 %v7550_v1 }
  0x44   : > { %6982 = vmatprep.mubr.msk.f32.mxu1 %vm7551_vm0, %v7550_v1  ;;  %6981 = vmatpush3.msk.msra.mxu1 %vm513_vm1, %v6626_v13 }
  0x45   : > { %1291 = vperm.xlu1 %7323, %v1288_v23   ;;  %6985 = vmatprep.subr.mxu1 %v7550_v1 }
  0x47   : > { %6657 = vmatmul.mubr.msk.f32.vlgmr.msra.gmra.mrb[0].mxu0 %vm509_vm2, %v7767_v18  ;;  %6983 = vmatmul.mubr.msk.f32.vlgmr.msra.gmra.mrb[12].mxu1 %vm509_vm2, %v7733_v12 }
  0x48   : > { %6662 = vmatpush1.msk.msra.mxu0 %vm513_vm1, %v7776_v20  ;;  %1208 = vmatprep.mubr.f32.mxu0 %v7550_v1 }
  0x49   : > { %6666 = vmatprep.subr.msk.mxu0 %vm513_vm1, %v976_v17  ;;  %6986 = vmatpush3.msk.msra.mxu1 %vm513_vm1, %v6630_v19 }
  0x4a   : > { %6987 = vmatprep.mubr.msk.f32.mxu1 %vm7551_vm0, %v7550_v1  ;;  %6990 = vmatprep.subr.mxu1 %v7550_v1 }
  0x4b   : > { %6988 = vmatmul.mubr.msk.f32.vlgmr.msra.gmra.mrb[14].mxu1 %vm509_vm2, %v7752_v15 }
  0x4c   : > { %6991 = vmatpush3.msk.msra.mxu1 %vm513_vm1, %v6632_v24  ;;  %6992 = vmatprep.mubr.msk.f32.mxu1 %vm7551_vm0, %v7550_v1 }
  0x4d   : > { %6995 = vmatprep.subr.mxu1 %v7550_v1 }
  0x4f   : > { %6663 = vmatmul.mubr.msk.f32.vlgmr.msra.gmra.mrb[0].mxu0 %vm509_vm2, %v7787_v21  ;;  %6993 = vmatmul.mubr.msk.f32.vlgmr.msra.gmra.mrb[16].mxu1 %vm509_vm2, %v7767_v18 }
  0x50   : > { %6667 = vmatpush1.msk.msra.mxu0 %vm513_vm1, %v6627_v14  ;;  %1361 = vmatprep.mubr.f32.mxu0 %v7550_v1  ;;  %v8040_v14 = vmul.u32 4, %v8013_v52 }
  0x51   : > { %6671 = vmatprep.subr.msk.mxu0 %vm513_vm1, %v7724_v11  ;;  %6996 = vmatpush3.msk.msra.mxu1 %vm513_vm1, %v7840_v25 }
  0x52   : > { %6997 = vmatprep.mubr.msk.f32.mxu1 %vm7551_vm0, %v7550_v1  ;;  %7000 = vmatprep.subr.mxu1 %v7550_v1 }
  0x53   : > { %6668 = vmatmul.mubr.msk.f32.vlgmr.msra.gmra.mrb[2].mxu0 %vm509_vm2, %v7707_v8  ;;  %6998 = vmatmul.mubr.msk.f32.vlgmr.msra.gmra.mrb[18].mxu1 %vm509_vm2, %v7787_v21 }
  0x54   : > { %6672 = vmatpush1.msk.msra.mxu0 %vm513_vm1, %v7711_v9  ;;  %1502 = vmatprep.mubr.f32.mxu0 %v7550_v1 }
  0x55   : > { %6676 = vmatprep.subr.msk.mxu0 %vm513_vm1, %v7791_v22  ;;  %7001 = vmatpush3.msk.msra.mxu1 %vm513_vm1, %v6632_v24 }
  0x56   : > { %7002 = vmatprep.mubr.msk.f32.mxu1 %vm7551_vm0, %v7550_v1  ;;  %7005 = vmatprep.subr.mxu1 %v7550_v1 }
  0x57   : > { %7003 = vmatmul.mubr.msk.f32.vlgmr.msra.gmra.mrb[20].mxu1 %vm509_vm2, %v7707_v8 }
  0x58   : > { %7006 = vmatpush3.msk.msra.mxu1 %vm513_vm1, %v6630_v19  ;;  %7007 = vmatprep.mubr.msk.f32.mxu1 %vm7551_vm0, %v7550_v1  ;;  %v3594_v19 = vadd.s32 4294967290, %v8040_v14 }
  0x59   : > { %7010 = vmatprep.subr.mxu1 %v7550_v1 }
  0x5a   : > { %vm3597_vm9 = vcmp.ge.s32.totalorder %v3594_v19, 0  ;;  %vm3600_vm10 = vcmp.lt.s32.totalorder %v3594_v19, 1024 }
  0x5b   : > { %6673 = vmatmul.mubr.msk.f32.vlgmr.msra.gmra.mrb[2].mxu0 %vm509_vm2, %v7733_v12  ;;  %7008 = vmatmul.mubr.msk.f32.vlgmr.msra.gmra.mrb[22].mxu1 %vm509_vm2, %v7733_v12  ;;  %vm8055_vm13 = vmand %vm3597_vm9, %vm3600_vm10 }
  0x5c   : > { %6677 = vmatpush1.msk.msra.mxu0 %vm513_vm1, %v7776_v20  ;;  %1643 = vmatprep.mubr.f32.mxu0 %v7550_v1 }
  0x5d   : > { %6681 = vmatprep.subr.msk.mxu0 %vm513_vm1, %v1725_v27  ;;  %7011 = vmatpush3.msk.msra.mxu1 %vm513_vm1, %v7840_v25 }
  0x5e   : > { %7012 = vmatprep.mubr.msk.f32.mxu1 %vm7551_vm0, %v7550_v1  ;;  %7015 = vmatprep.subr.mxu1 %v7550_v1 }
  0x5f   : > { %7013 = vmatmul.mubr.msk.f32.vlgmr.msra.gmra.mrb[24].mxu1 %vm509_vm2, %v7752_v15 }
  0x60   : > { %7016 = vmatpush3.msk.msra.mxu1 %vm513_vm1, %v6636_v28  ;;  %7017 = vmatprep.mubr.msk.f32.mxu1 %vm7551_vm0, %v7550_v1 }
  0x61   : > { %7020 = vmatprep.subr.mxu1 %v7550_v1 }
  0x63   : > { %6678 = vmatmul.mubr.msk.f32.vlgmr.msra.gmra.mrb[2].mxu0 %vm509_vm2, %v7752_v15  ;;  %7018 = vmatmul.mubr.msk.f32.vlgmr.msra.gmra.mrb[26].mxu1 %vm509_vm2, %v7767_v18 }
  0x64   : > { %6682 = vmatpush1.msk.msra.mxu0 %vm513_vm1, %v6631_v26  ;;  %1796 = vmatprep.mubr.f32.mxu0 %v7550_v1 }
  0x65   : > { %6686 = vmatprep.subr.msk.mxu0 %vm513_vm1, %v1878_v30  ;;  %7022 = vmatprep.mubr.msk.f32.mxu1 %vm7551_vm0, %v7550_v1 }
  0x6b   : > { %6683 = vmatmul.mubr.msk.f32.vlgmr.msra.gmra.mrb[2].mxu0 %vm509_vm2, %v7767_v18 }
  0x6c   : > { %6687 = vmatpush1.msk.msra.mxu0 %vm513_vm1, %v6633_v29  ;;  %1949 = vmatprep.mubr.f32.mxu0 %v7550_v1 }
  0x6d   : > { %6691 = vmatprep.subr.msk.mxu0 %vm513_vm1, %v1725_v27 }
  0x73   : > { %6688 = vmatmul.mubr.msk.f32.vlgmr.msra.gmra.mrb[2].mxu0 %vm509_vm2, %v7787_v21 }
  0x74   : > { %6692 = vmatpush1.msk.msra.mxu0 %vm513_vm1, %v6631_v26  ;;  %2096 = vmatprep.mubr.f32.mxu0 %v7550_v1 }
  0x75   : > { %6696 = vmatprep.subr.msk.mxu0 %vm513_vm1, %v7791_v22 }
  0x77   : > { %6693 = vmatmul.mubr.msk.f32.vlgmr.msra.gmra.mrb[4].mxu0 %vm509_vm2, %v7707_v8 }
  0x78   : > { %6697 = vmatpush1.msk.msra.mxu0 %vm513_vm1, %v7776_v20  ;;  %2237 = vmatprep.mubr.f32.mxu0 %v7550_v1 }
  0x79   : > { %6701 = vmatprep.subr.msk.mxu0 %vm513_vm1, %v1878_v30 }
  0x7f   : > { %6698 = vmatmul.mubr.msk.f32.vlgmr.msra.gmra.mrb[4].mxu0 %vm509_vm2, %v7733_v12 }
  0x80   : > { %6702 = vmatpush1.msk.msra.mxu0 %vm513_vm1, %v6633_v29  ;;  %2378 = vmatprep.mubr.f32.mxu0 %v7550_v1 }
  0x81   : > { %6706 = vmatprep.subr.msk.mxu0 %vm513_vm1, %v2460_v32 }
  0x87   : > { %6703 = vmatmul.mubr.msk.f32.vlgmr.msra.gmra.mrb[4].mxu0 %vm509_vm2, %v7752_v15 }
  0x88   : > { %6707 = vmatpush1.msk.msra.mxu0 %vm513_vm1, %v6635_v31  ;;  %2531 = vmatprep.mubr.f32.mxu0 %v7550_v1 }
  0x8f   : > { %6708 = vmatmul.mubr.msk.f32.vlgmr.msra.gmra.mrb[4].mxu0 %vm509_vm2, %v7767_v18 }
  0x90   : > { %2690 = vmatprep.mubr.f32.mxu0 %v7550_v1 }
  0x9d   : > { %v2612_v34 = vpop.permute.xlu1 %2611 }
  0x9f   : > { %v2614_v33 = vpop.permute.xlu0 %2613 }
  0xa0   : > { %v2618_v37 = vsel %vm2617_vm3, %v2612_v34, %v2614_v33 }
  0xa3   : > { %v2616_v35 = vpop.permute.xlu0 %2615 }
  0xa4   : > { %7021 = vmatpush3.msk.msra.mxu1 %vm513_vm1, %v2616_v35  ;;  %v2619_v36 = vsel %vm2617_vm3, %v2614_v33, %v2616_v35 }
  0xa5   : > { %6711 = vmatprep.subr.msk.mxu0 %vm513_vm1, %v2619_v36  ;;  %7023 = vmatmul.mubr.msk.f32.vlgmr.msra.gmra.mrb[28].mxu1 %vm509_vm2, %v7787_v21 }
  0xa6   : > { %6712 = vmatpush1.msk.msra.mxu0 %vm513_vm1, %v2618_v37  ;;  %7025 = vmatprep.subr.mxu1 %v7550_v1  ;;  %v3204_v38 = vpop.permute.xlu1 %3203 }
  0xa7   : > { %6713 = vmatmul.mubr.msk.f32.vlgmr.msra.gmra.mrb[4].mxu0 %vm509_vm2, %v7787_v21  ;;  %6716 = vmatprep.subr.msk.mxu0 %vm513_vm1, %v2460_v32  ;;  %v3362_v40 = vpop.permute.xlu0 %3361 }
  0xa8   : > { %7026 = vmatpush3.msk.msra.mxu1 %vm513_vm1, %v6636_v28  ;;  %7027 = vmatprep.mubr.msk.f32.mxu1 %vm7551_vm0, %v7550_v1 }
  0xa9   : > { %6717 = vmatpush1.msk.msra.mxu0 %vm513_vm1, %v6635_v31  ;;  %7028 = vmatmul.mubr.msk.f32.vlgmr.msra.gmra.mrb[30].mxu1 %vm509_vm2, %v7707_v8  ;;  %v3626_v31 = vadd.s32 4294967291, %v8019_v60 }
  0xaa   : > { %2837 = vmatprep.mubr.f32.mxu0 %v7550_v1  ;;  %6721 = vmatprep.subr.msk.mxu0 %vm513_vm1, %v1878_v30 }
  0xab   : > { %7030 = vmatprep.subr.mxu1 %v7550_v1  ;;  %6718 = vmatmul.mubr.msk.f32.vlgmr.msra.gmra.mrb[6].mxu0 %vm509_vm2, %v7707_v8 }
  0xac   : > { %6722 = vmatpush1.msk.msra.mxu0 %vm513_vm1, %v6633_v29  ;;  %7031 = vmatpush3.msk.msra.mxu1 %vm513_vm1, %v7840_v25 }
  0xad   : > { %7032 = vmatprep.mubr.msk.f32.mxu1 %vm7551_vm0, %v7550_v1  ;;  %6726 = vmatprep.subr.msk.mxu0 %vm513_vm1, %v2619_v36  ;;  %v3202_v39 = vpop.permute.xlu1 %3201 }
  0xae   : > { %7035 = vmatprep.subr.mxu1 %v7550_v1  ;;  %7033 = vmatmul.mubr.msk.f32.vlgmr.msra.gmra.mrb[32].mxu1 %vm509_vm2, %v7733_v12  ;;  %v3206_v41 = vsel %vm2617_vm3, %v3202_v39, %v3204_v38  ;;  %v3200_v42 = vpop.permute.xlu0 %3199 }
  0xaf   : > { %7036 = vmatpush3.msk.msra.mxu1 %vm513_vm1, %v2616_v35  ;;  %7037 = vmatprep.mubr.msk.f32.mxu1 %vm7551_vm0, %v7550_v1  ;;  %v3205_v45 = vsel %vm2617_vm3, %v3200_v42, %v3202_v39 }
  0xb0   : > { %2978 = vmatprep.mubr.f32.mxu0 %v7550_v1  ;;  %7040 = vmatprep.subr.mxu1 %v7550_v1 }
  0xb1   : > { %v3360_v43 = vpop.permute.xlu1 %3359 }
  0xb2   : > { %7038 = vmatmul.mubr.msk.f32.vlgmr.msra.gmra.mrb[34].mxu1 %vm509_vm2, %v7752_v15  ;;  %v3364_v46 = vsel %vm2617_vm3, %v3360_v43, %v3362_v40 }
  0xb3   : > { %6723 = vmatmul.mubr.msk.f32.vlgmr.msra.gmra.mrb[6].mxu0 %vm509_vm2, %v7733_v12  ;;  %7041 = vmatpush3.msk.msra.mxu1 %vm513_vm1, %v3204_v38 }
  0xb4   : > { %6727 = vmatpush1.msk.msra.mxu0 %vm513_vm1, %v2618_v37  ;;  %7042 = vmatprep.mubr.msk.f32.mxu1 %vm7551_vm0, %v7550_v1  ;;  %v3358_v47 = vpop.permute.xlu0 %3357 }
  0xb5   : > { %7045 = vmatprep.subr.mxu1 %v7550_v1  ;;  %3119 = vmatprep.mubr.f32.mxu0 %v7550_v1  ;;  %v3363_v48 = vsel %vm2617_vm3, %v3358_v47, %v3360_v43 }
  0xb6   : > { %7043 = vmatmul.mubr.msk.f32.vlgmr.msra.gmra.mrb[36].mxu1 %vm509_vm2, %v7767_v18  ;;  %6731 = vmatprep.subr.msk.mxu0 %vm513_vm1, %v3206_v41 }
  0xb7   : > { %7046 = vmatpush3.msk.msra.mxu1 %vm513_vm1, %v3362_v40  ;;  %7047 = vmatprep.mubr.msk.f32.mxu1 %vm7551_vm0, %v7550_v1 }
  0xba   : > { %7048 = vmatmul.mubr.msk.f32.vlgmr.msra.gmra.mrb[38].mxu1 %vm509_vm2, %v7787_v21 }
  0xbb   : > { %6728 = vmatmul.mubr.msk.f32.vlgmr.msra.gmra.mrb[6].mxu0 %vm509_vm2, %v7752_v15  ;;  %7052 = vmatprep.mubr.msk.f32.mxu1 %vm3719_vm4, %v7991_v44 }
  0xbc   : > { %6732 = vmatpush1.msk.msra.mxu0 %vm513_vm1, %v3205_v45  ;;  %3277 = vmatprep.mubr.f32.mxu0 %v7550_v1 }
  0xbd   : > { %6736 = vmatprep.subr.msk.mxu0 %vm513_vm1, %v3364_v46 }
  0xc3   : > { %6733 = vmatmul.mubr.msk.f32.vlgmr.msra.gmra.mrb[6].mxu0 %vm509_vm2, %v7767_v18 }
  0xc4   : > { %6737 = vmatpush1.msk.msra.mxu0 %vm513_vm1, %v3363_v48  ;;  %3435 = vmatprep.mubr.f32.mxu0 %v7550_v1  ;;  %v8022_v3 = vpop.permute.xlu1 %1291  ;;  %vm3629_vm1 = vcmp.ge.s32.totalorder %v3626_v31, 0 }
  0xcb   : > { %6738 = vmatmul.mubr.msk.f32.vlgmr.msra.gmra.mrb[6].mxu0 %vm509_vm2, %v7787_v21  ;;  %v3595_v21 = vadd.s32 4294967290, %v8044_v16  ;;  %vm3632_vm2 = vcmp.lt.s32.totalorder %v3626_v31, 1024 }
  0xcc   : > { %3790 = vmatprep.mubr.f32.mxu0 %v7550_v1  ;;  %vm3635_vm5 = vmand %vm3629_vm1, %vm3632_vm2 }
  0xcd   : > { %vm3598_vm11 = vcmp.ge.s32.totalorder %v3595_v21, 0  ;;  %vm3601_vm12 = vcmp.lt.s32.totalorder %v3595_v21, 1024  ;;  %v3656_v21 = vadd.s32 4294967292, %v8019_v60 }
  0xce   : > { %vm8061_vm15 = vmand %vm3598_vm11, %vm3601_vm12 }
  0xff   : > { %v657_v50 = vpop.f32.mrb[0].mxu1 }
 0x100   : > { %v6954_v51 = vpop.f32.mrb[1].mxu1 }
 0x105   : > { %v810_v53 = vpop.f32.mrb[2].mxu1 }
 0x106   : > { %v811_v54 = vadd.f32 %v810_v53, %v657_v50  ;;  %v6959_v55 = vpop.f32.mrb[3].mxu1  ;;  %v8087_v50 = vld [vmem:[%s9002_s3 + $0x18] sm:$0xff] }
 0x109   : > { %v965_v57 = vpop.f32.mrb[4].mxu1 }
 0x10a   : > { %v971_v58 = vadd.f32 %v965_v57, %v811_v54  ;;  %v6964_v59 = vpop.f32.mrb[5].mxu1  ;;  %v8092_v54 = vld [vmem:[%s9002_s3] sm:$0xff] }
 0x10d   : > { %v1123_v61 = vpop.f32.mrb[6].mxu1 }
 0x10e   : > { %v1129_v62 = vadd.f32 %v1123_v61, %v971_v58  ;;  %v6969_v63 = vpop.f32.mrb[7].mxu1 }
 0x111   : > { %v1281_v2 = vpop.f32.mrb[8].mxu1 }
 0x112   : > { %v1287_v4 = vadd.f32 %v1281_v2, %v1129_v62  ;;  %v6974_v5 = vpop.f32.mrb[9].mxu1  ;;  %v8106_v62 = vld [vmem:[%s9002_s3 + $0x8] sm:$0xff] }
 0x113   : > { %v3625_v5 = vadd.s32 4294967291, %v8044_v16 }
 0x114   : > { %v8025_v6 = vadd.f32 %v8022_v3, %v1287_v4 }
 0x116   : > { %v1434_v7 = vpop.f32.mrb[10].mxu1  ;;  %vm3608_vm8 = vcmp.gt.f32.partialorder %v8025_v6, 0.0  ;;  %v3611_v9 = vmul.f32 0.2, %v8025_v6 }
 0x117   : > { %v6979_v11 = vpop.f32.mrb[11].mxu1 }
 0x118   : > { %v3614_v12 = vsel %vm3608_vm8, %v8025_v6, %v3611_v9  ;;  %vm3631_vm8 = vcmp.lt.s32.totalorder %v3625_v5, 1024 }
 0x119   : > { %v3623_v13 = vsel %vm8027_vm7, %v3614_v12, 0.0 }
 0x11a   : > { %v1575_v15 = vpop.f32.mrb[12].mxu1  ;;  %4380 = vrot.lane.b32.xlu0 %v3623_v13, %s8982_s13 }
 0x11b   : > { %v1576_v17 = vadd.f32 %v1575_v15, %v1434_v7  ;;  %v6984_v18 = vpop.f32.mrb[13].mxu1  ;;  %v3624_v7 = vadd.s32 4294967291, %v8040_v14 }
 0x11d   : > { %vm3627_vm9 = vcmp.ge.s32.totalorder %v3624_v7, 0  ;;  %vm3630_vm12 = vcmp.lt.s32.totalorder %v3624_v7, 1024 }
 0x11e   : > { %v1716_v20 = vpop.f32.mrb[14].mxu1 }
 0x11f   : > { %v1722_v22 = vadd.f32 %v1716_v20, %v1576_v17  ;;  %v6989_v23 = vpop.f32.mrb[15].mxu1 }
 0x122   : > { %v1210_v24 = vpop.f32.mrb[0].mxu0  ;;  %v1869_v25 = vpop.f32.mrb[16].mxu1 }
 0x123   : > { %v8049_v26 = vadd.f32 %v8022_v3, %v1210_v24  ;;  %v1212_v27 = vpop.f32.mrb[1].mxu0  ;;  %v1875_v28 = vadd.f32 %v1869_v25, %v1722_v22  ;;  %v6994_v29 = vpop.f32.mrb[17].mxu1  ;;  %v3655_v22 = vadd.s32 4294967292, %v8044_v16 }
 0x124   : > { %v8052_v30 = vadd.f32 %v8022_v3, %v1212_v27 }
 0x125   : > { %vm3606_vm14 = vcmp.gt.f32.partialorder %v8049_v26, 0.0  ;;  %v3609_v33 = vmul.f32 0.2, %v8049_v26  ;;  %vm3658_vm1 = vcmp.ge.s32.totalorder %v3655_v22, 0  ;;  %vm3661_vm2 = vcmp.lt.s32.totalorder %v3655_v22, 1024 }
 0x126   : > { %vm3607_vm0 = vcmp.gt.f32.partialorder %v8052_v30, 0.0  ;;  %v3610_v35 = vmul.f32 0.2, %v8052_v30  ;;  %v2022_v36 = vpop.f32.mrb[18].mxu1 }
 0x127   : > { %v8068_v37 = vsel %vm3606_vm14, %v8049_v26, %v3609_v33  ;;  %v2028_v38 = vadd.f32 %v2022_v36, %v1875_v28  ;;  %v6999_v39 = vpop.f32.mrb[19].mxu1  ;;  %v3654_v28 = vadd.s32 4294967292, %v8040_v14 }
 0x128   : > { %v3621_v40 = vsel %vm8055_vm13, %v8068_v37, 0.0  ;;  %v3613_v41 = vsel %vm3607_vm0, %v8052_v30, %v3610_v35  ;;  %vm3633_vm0 = vmand %vm3627_vm9, %vm3630_vm12 }
 0x129   : > { %4376 = vrot.lane.b32.xlu0 %v3621_v40, %s8982_s13  ;;  %v3622_v42 = vsel %vm8061_vm15, %v3613_v41, 0.0  ;;  %v8078_v43 = vadd.f32 %v2028_v38, %v8022_v3  ;;  %vm3657_vm9 = vcmp.ge.s32.totalorder %v3654_v28, 0 }
 0x12a   : > { %4378 = vrot.lane.b32.xlu1 %v3622_v42, %s8982_s13  ;;  %v2169_v45 = vpop.f32.mrb[20].mxu1 }
 0x12b   : > { %vm3638_vm6 = vcmp.gt.f32.partialorder %v8078_v43, 0.0  ;;  %v3641_v46 = vmul.f32 0.2, %v8078_v43  ;;  %v7004_v47 = vpop.f32.mrb[21].mxu1 }
 0x12d   : > { %v3644_v48 = vsel %vm3638_vm6, %v8078_v43, %v3641_v46  ;;  %v8191_v46 = vld [vmem:[%s9002_s3 + $0x28] sm:$0xff] }
 0x12e   : > { %7050 = vmatprep.subr.msk.mxu1 %vm3635_vm5, %v3644_v48  ;;  %v3653_v51 = vsel %vm3635_vm5, %v3644_v48, 0.0  ;;  %v2310_v53 = vpop.f32.mrb[22].mxu1 }
 0x12f   : > { %7051 = vmatpush3.msk.msra.mxu1 %vm3635_vm5, %v3644_v48  ;;  %5038 = vrot.lane.b32.xlu0 %v3653_v51, %s8982_s13  ;;  %v2311_v55 = vadd.f32 %v2310_v53, %v2169_v45  ;;  %v7009_v57 = vpop.f32.mrb[23].mxu1  ;;  %v8205_v51 = vld [vmem:[%s9002_s3 + $0x30] sm:$0xff] }
 0x130   : > { %7055 = vmatprep.subr.msk.mxu1 %vm8027_vm7, %v3614_v12  ;;  %7053 = vmatmul.mubr.msk.f32.vlgmr.msra.gmra.mrb[40].mxu1 %vm3719_vm4, %v8087_v50 }
 0x131   : > { %7056 = vmatpush3.msk.msra.mxu1 %vm8027_vm7, %v3614_v12  ;;  %7057 = vmatprep.mubr.msk.f32.mxu1 %vm3719_vm4, %v8092_v54  ;;  %vm3628_vm7 = vcmp.ge.s32.totalorder %v3625_v5, 0  ;;  %v4552_v5 = vld [vmem:[%s9015_s4 + $0x8] sm:$0xff] }
 0x132   : > { %v2451_v58 = vpop.f32.mrb[24].mxu1  ;;  %vm3634_vm10 = vmand %vm3628_vm7, %vm3631_vm8 }
 0x133   : > { %v2457_v59 = vadd.f32 %v2451_v58, %v2311_v55  ;;  %v7014_v61 = vpop.f32.mrb[25].mxu1  ;;  %vm8169_vm7 = vmand %vm3658_vm1, %vm3661_vm2 }
 0x136   : > { %v2604_v63 = vpop.f32.mrb[26].mxu1 }
 0x137   : > { %v2610_v2 = vadd.f32 %v2604_v63, %v2457_v59  ;;  %v7019_v4 = vpop.f32.mrb[27].mxu1  ;;  %v4551_v59 = vld [vmem:[%s9015_s4] sm:$0xff] }
 0x138   : > { %7058 = vmatmul.mubr.msk.f32.vlgmr.msra.gmra.mrb[40].mxu1 %vm3719_vm4, %v8106_v62 }
 0x139   : > { %7062 = vmatprep.mubr.msk.f32.mxu1 %vm3719_vm4, %v8111_v0 }
 0x146   : > { %v1951_v8 = vpop.f32.mrb[2].mxu0 }
 0x147   : > { %v8120_v9 = vadd.f32 %v1951_v8, %v8022_v3  ;;  %v1953_v11 = vpop.f32.mrb[3].mxu0 }
 0x148   : > { %v8123_v12 = vadd.f32 %v1953_v11, %v8022_v3 }
 0x149   : > { %v3639_v13 = vmul.f32 0.2, %v8120_v9  ;;  %vm3636_vm14 = vcmp.gt.f32.partialorder %v8120_v9, 0.0 }
 0x14a   : > { %vm3637_vm11 = vcmp.gt.f32.partialorder %v8123_v12, 0.0  ;;  %v3640_v15 = vmul.f32 0.2, %v8123_v12 }
 0x14b   : > { %v3642_v18 = vsel %vm3636_vm14, %v8120_v9, %v3639_v13  ;;  %v3686_v13 = vadd.s32 4294967293, %v8019_v60  ;;  %v8253_v60 = vld [vmem:[%s9002_s3 + $0x38] sm:$0xff] }
 0x14c   : > { %v3643_v17 = vsel %vm3637_vm11, %v8123_v12, %v3640_v15  ;;  %v3651_v20 = vsel %vm3633_vm0, %v3642_v18, 0.0 }
 0x14d   : > { %6749 = vmatprep.subr.msk.mxu0 %vm3634_vm10, %v3643_v17  ;;  %v3652_v19 = vsel %vm3634_vm10, %v3643_v17, 0.0  ;;  %vm3660_vm10 = vcmp.lt.s32.totalorder %v3654_v28, 1024  ;;  %vm3689_vm14 = vcmp.ge.s32.totalorder %v3686_v13, 0  ;;  %v3684_v28 = vadd.s32 4294967293, %v8040_v14 }
 0x14e   : > { %6750 = vmatpush1.msk.msra.mxu0 %vm3633_vm0, %v3642_v18  ;;  %5036 = vrot.lane.b32.xlu1 %v3652_v19, %s8982_s13  ;;  %vm8209_vm12 = vmand %vm3657_vm9, %vm3660_vm10  ;;  %vm3692_vm0 = vcmp.lt.s32.totalorder %v3686_v13, 1024 }
 0x14f   : > { %6756 = vmatprep.subr.msk.mxu0 %vm8061_vm15, %v3613_v41  ;;  %6751 = vmatmul.mubr.msk.f32.vlgmr.msra.gmra.mrb[8].mxu0 %vm3719_vm4, %v7991_v44  ;;  %vm3662_vm15 = vcmp.lt.s32.totalorder %v3656_v21, 1024 }
 0x150   : > { %6757 = vmatpush1.msk.msra.mxu0 %vm8055_vm13, %v8068_v37  ;;  %3796 = vmatprep.mubr.f32.mxu0 %v7550_v1  ;;  %vm3659_vm13 = vcmp.ge.s32.totalorder %v3656_v21, 0 }
 0x151   : > { %vm8162_vm5 = vmand %vm3659_vm13, %vm3662_vm15 }
 0x152   : > { %5034 = vrot.lane.b32.xlu1 %v3651_v20, %s8982_s13  ;;  %vm8243_vm13 = vmand %vm3689_vm14, %vm3692_vm0 }
 0x153   : > { %6752 = vmatmul.mubr.msk.f32.gmra.mrb[10].mxu0 %vm3719_vm4, %v8087_v50 }
 0x154   : > { %3948 = vmatprep.mubr.f32.mxu0 %v7550_v1 }
 0x157   : > { %6758 = vmatmul.mubr.msk.f32.vlgmr.msra.gmra.mrb[8].mxu0 %vm3719_vm4, %v8092_v54 }
 0x158   : > { %3954 = vmatprep.mubr.f32.mxu0 %v7550_v1 }
 0x15b   : > { %6759 = vmatmul.mubr.msk.f32.gmra.mrb[10].mxu0 %vm3719_vm4, %v8106_v62 }
 0x15c   : > { %4109 = vmatprep.mubr.f32.mxu0 %v7550_v1 }
 0x178   : > { %v2763_v23 = vpop.f32.mrb[28].mxu1 }
 0x179   : > { %v2769_v24 = vadd.f32 %v2763_v23, %v2610_v2  ;;  %v7024_v25 = vpop.f32.mrb[29].mxu1  ;;  %v8260_v23 = vld [vmem:[%s9002_s3 + $0x40] sm:$0xff] }
 0x17a   : > { %v2692_v27 = vpop.f32.mrb[4].mxu0  ;;  %v3685_v25 = vadd.s32 4294967293, %v8044_v16 }
 0x17b   : > { %v8154_v29 = vadd.f32 %v2769_v24, %v8022_v3  ;;  %v8157_v31 = vadd.f32 %v2692_v27, %v8022_v3  ;;  %v2694_v32 = vpop.f32.mrb[5].mxu0  ;;  %v8276_v27 = vld [vmem:[%s9002_s3 + $0x48] sm:$0xff]  ;;  %s8807_s3 = scalar_lea.hbm %s9034_s10, %s8801_s8 }
 0x17c   : > { %v8160_v33 = vadd.f32 %v2694_v32, %v8022_v3  ;;  %v2910_v34 = vpop.f32.mrb[30].mxu1  ;;  %vm3688_vm1 = vcmp.ge.s32.totalorder %v3685_v25, 0  ;;  %vm3691_vm2 = vcmp.lt.s32.totalorder %v3685_v25, 1024 }
 0x17d   : > { %vm3668_vm6 = vcmp.gt.f32.partialorder %v8154_v29, 0.0  ;;  %v3671_v36 = vmul.f32 0.2, %v8154_v29  ;;  %v3669_v37 = vmul.f32 0.2, %v8157_v31  ;;  %v7029_v40 = vpop.f32.mrb[31].mxu1  ;;  %vm3694_vm9 = vmand %vm3688_vm1, %vm3691_vm2 }
 0x17e   : > { %vm3667_vm8 = vcmp.gt.f32.partialorder %v8160_v33, 0.0  ;;  %v3670_v39 = vmul.f32 0.2, %v8160_v33  ;;  %vm3666_vm11 = vcmp.gt.f32.partialorder %v8157_v31, 0.0 }
 0x17f   : > { %v8176_v41 = vsel %vm3668_vm6, %v8154_v29, %v3671_v36  ;;  %v8214_v55 = vsel %vm3666_vm11, %v8157_v31, %v3669_v37  ;;  %vm3687_vm6 = vcmp.ge.s32.totalorder %v3684_v28, 0 }
 0x180   : > { %7060 = vmatprep.subr.msk.mxu1 %vm8162_vm5, %v8176_v41  ;;  %v8183_v42 = vsel %vm3667_vm8, %v8160_v33, %v3670_v39  ;;  %v3683_v45 = vsel %vm8162_vm5, %v8176_v41, 0.0  ;;  %v3681_v61 = vsel %vm8209_vm12, %v8214_v55, 0.0  ;;  %vm3690_vm8 = vcmp.lt.s32.totalorder %v3684_v28, 1024 }
 0x181   : > { %6765 = vmatprep.subr.msk.mxu0 %vm8169_vm7, %v8183_v42  ;;  %7061 = vmatpush3.msk.msra.mxu1 %vm8162_vm5, %v8176_v41  ;;  %v3682_v47 = vsel %vm8169_vm7, %v8183_v42, 0.0  ;;  %v3051_v48 = vpop.f32.mrb[32].mxu1  ;;  %vm3693_vm14 = vmand %vm3687_vm6, %vm3690_vm8 }
 0x182   : > { %5210 = vrot.lane.b32.xlu1 %v3683_v45, %s8982_s13  ;;  %5208 = vrot.lane.b32.xlu0 %v3682_v47, %s8982_s13  ;;  %v3052_v57 = vadd.f32 %v3051_v48, %v2910_v34  ;;  %v7034_v58 = vpop.f32.mrb[33].mxu1 }
 0x183   : > { %6766 = vmatpush1.msk.msra.mxu0 %vm8209_vm12, %v8214_v55  ;;  %7063 = vmatmul.mubr.msk.f32.vlgmr.msra.gmra.mrb[40].mxu1 %vm3719_vm4, %v8191_v46 }
 0x184   : > { %7067 = vmatprep.mubr.msk.f32.mxu1 %vm3719_vm4, %v8205_v51  ;;  %6767 = vmatmul.mubr.msk.f32.vlgmr.msra.gmra.mrb[8].mxu0 %vm3719_vm4, %v8111_v0 }
 0x185   : > { %v3192_v63 = vpop.f32.mrb[34].mxu1  ;;  %4115 = vmatprep.mubr.f32.mxu0 %v7550_v1 }
 0x186   : > { %4555 = vperm.xlu1 %7323, %v4551_v59   ;;  %5206 = vrot.lane.b32.xlu0 %v3681_v61, %s8982_s13  ;;  %v3198_v2 = vadd.f32 %v3192_v63, %v3052_v57  ;;  %v7039_v4 = vpop.f32.mrb[35].mxu1  ;;  %v5443_v57 = vmul.u32 2, %v8034_v10  ;;  %v5442_v63 = vmul.u32 2, %v8013_v52 }
 0x188   : > { %6768 = vmatmul.mubr.msk.f32.gmra.mrb[10].mxu0 %vm3719_vm4, %v8191_v46  ;;  %v5446_v4 = vadd.s32 4294967294, %v5443_v57 }
 0x189   : > { %v3350_v7 = vpop.f32.mrb[36].mxu1  ;;  %4276 = vmatprep.mubr.f32.mxu0 %v7550_v1 }
 0x18a   : > { %v3356_v8 = vadd.f32 %v3350_v7, %v3198_v2  ;;  %v7044_v11 = vpop.f32.mrb[37].mxu1  ;;  %4560 = vperm.xlu0 %7324, %v4552_v5   ;;  %vm5452_vm0 = vcmp.lt.s32.totalorder %v5446_v4, 512 }
 0x18c   : > { %v8264_v24 = vpop.permute.xlu0 %4380 }
 0x18d   : > { %v3508_v15 = vpop.f32.mrb[38].mxu1 }
 0x18e   : > { %v3514_v17 = vadd.f32 %v3508_v15, %v3356_v8  ;;  %v7049_v18 = vpop.f32.mrb[39].mxu1  ;;  %v5445_v8 = vadd.s32 4294967294, %v5442_v63 }
 0x190   : > { %v8241_v19 = vadd.f32 %v3514_v17, %v8022_v3  ;;  %vm5451_vm8 = vcmp.lt.s32.totalorder %v5445_v8, 512 }
 0x192   : > { %vm3698_vm15 = vcmp.gt.f32.partialorder %v8241_v19, 0.0  ;;  %v3701_v21 = vmul.f32 0.2, %v8241_v19 }
 0x194   : > { %v3704_v22 = vsel %vm3698_vm15, %v8241_v19, %v3701_v21  ;;  %vm5448_vm15 = vcmp.ge.s32.totalorder %v5445_v8, 0  ;;  %v5487_v8 = vadd.s32 4294967295, %v5442_v63 }
 0x195   : > { %7065 = vmatprep.subr.msk.mxu1 %vm8243_vm13, %v3704_v22 }
 0x196   : > { %7066 = vmatpush3.msk.msra.mxu1 %vm8243_vm13, %v3704_v22 }
 0x197   : > { %7068 = vmatmul.mubr.msk.f32.vlgmr.msra.gmra.mrb[40].mxu1 %vm3719_vm4, %v8253_v60  ;;  %7070 = vmatprep.subr.mxu1 %v8264_v24 }
 0x198   : > { %7071 = vmatpush3.msra.mxu1 %v8264_v24  ;;  %7072 = vmatprep.mubr.msk.f32.mxu1 %vm3719_vm4, %v8260_v23 }
 0x19b   : > { %v4377_v45 = vpop.permute.xlu0 %4376 }
 0x19c   : > { %v4379_v39 = vpop.permute.xlu1 %4378 }
 0x19d   : > { %v4383_v47 = vsel %vm2617_vm3, %v4379_v39, %v8264_v24  ;;  %v4382_v48 = vsel %vm2617_vm3, %v4377_v45, %v4379_v39 }
 0x19e   : > { %v3437_v32 = vpop.f32.mrb[6].mxu0 }
 0x19f   : > { %v8280_v34 = vadd.f32 %v3437_v32, %v8022_v3  ;;  %7073 = vmatmul.mubr.msk.f32.vlgmr.msra.gmra.mrb[40].mxu1 %vm3719_vm4, %v8276_v27  ;;  %v3439_v36 = vpop.f32.mrb[7].mxu0 }
 0x1a0   : > { %v8285_v37 = vadd.f32 %v3439_v36, %v8022_v3  ;;  %4633 = vmatprep.mubr.f32.mxu1 %v7550_v1 }
 0x1a1   : > { %v3699_v16 = vmul.f32 0.2, %v8280_v34  ;;  %vm3696_vm11 = vcmp.gt.f32.partialorder %v8280_v34, 0.0 }
 0x1a2   : > { %vm3697_vm10 = vcmp.gt.f32.partialorder %v8285_v37, 0.0  ;;  %v3700_v14 = vmul.f32 0.2, %v8285_v37 }
 0x1a3   : > { %v3702_v3 = vsel %vm3696_vm11, %v8280_v34, %v3699_v16 }
 0x1a4   : > { %v3703_v40 = vsel %vm3697_vm10, %v8285_v37, %v3700_v14  ;;  %vm8437_vm10 = vmand %vm5448_vm15, %vm5451_vm8 }
 0x1a5   : > { %6774 = vmatprep.subr.msk.mxu0 %vm3694_vm9, %v3703_v40  ;;  %6787 = vmatprep.subr.msk.mxu1 %vm3694_vm9, %v3703_v40 }
 0x1a6   : > { %6775 = vmatpush1.msk.msra.mxu0 %vm3693_vm14, %v3702_v3  ;;  %6788 = vmatpush1.msk.msra.mxu1 %vm3693_vm14, %v3702_v3 }
 0x1a7   : > { %6776 = vmatmul.mubr.msk.f32.vlgmr.msra.gmra.mrb[8].mxu0 %vm3719_vm4, %v8205_v51  ;;  %4393 = vmatprep.subr.mxu0 %v4383_v47 }
 0x1a8   : > { %6789 = vmatmul.mubr.msk.f32.vlgmr.msra.gmra.mrb[42].mxu1 %vm3719_vm4, %v7991_v44  ;;  %7075 = vmatprep.subr.msk.mxu1 %vm8243_vm13, %v3704_v22 }
 0x1a9   : > { %4394 = vmatpush1.msra.mxu0 %v4382_v48  ;;  %7076 = vmatpush3.msk.msra.mxu1 %vm8243_vm13, %v3704_v22 }
 0x1aa   : > { %6794 = vmatprep.subr.msk.mxu1 %vm8169_vm7, %v8183_v42  ;;  %4282 = vmatprep.mubr.f32.mxu0 %v7550_v1 }
 0x1ab   : > { %4639 = vmatprep.mubr.f32.mxu1 %v7550_v1  ;;  %6777 = vmatmul.mubr.msk.f32.gmra.mrb[10].mxu0 %vm3719_vm4, %v8253_v60 }
 0x1ac   : > { %6790 = vmatmul.mubr.msk.f32.gmra.mrb[44].mxu1 %vm3719_vm4, %v8087_v50  ;;  %4457 = vmatprep.mubr.f32.mxu0 %v7550_v1 }
 0x1ad   : > { %7077 = vmatprep.mubr.msk.f32.mxu1 %vm3719_vm4, %v7991_v44  ;;  %v5039_v44 = vpop.permute.xlu0 %5038 }
 0x1af   : > { %6783 = vmatmul.mubr.msk.f32.vlgmr.msra.gmra.mrb[8].mxu0 %vm3719_vm4, %v8260_v23 }
 0x1b0   : > { %7078 = vmatmul.mubr.msk.f32.vlgmr.msra.gmra.mrb[46].mxu1 %vm3719_vm4, %v8087_v50  ;;  %4463 = vmatprep.mubr.f32.mxu0 %v7550_v1 }
 0x1b1   : > { %6795 = vmatpush1.msk.msra.mxu1 %vm8209_vm12, %v8214_v55  ;;  %4785 = vmatprep.mubr.f32.mxu1 %v7550_v1  ;;  %v5444_v55 = vmul.u32 2, %v8016_v56  ;;  %vm5449_vm12 = vcmp.ge.s32.totalorder %v5446_v4, 0 }
 0x1b2   : > { %7080 = vmatprep.subr.msk.mxu1 %vm8162_vm5, %v8176_v41  ;;  %vm8417_vm2 = vmand %vm5449_vm12, %vm5452_vm0  ;;  %vm5490_vm0 = vcmp.ge.s32.totalorder %v5487_v8, 0 }
 0x1b3   : > { %6784 = vmatmul.mubr.msk.f32.gmra.mrb[10].mxu0 %vm3719_vm4, %v8276_v27  ;;  %v5447_v2 = vadd.s32 4294967294, %v5444_v55 }
 0x1b4   : > { %6796 = vmatmul.mubr.msk.f32.vlgmr.msra.gmra.mrb[42].mxu1 %vm3719_vm4, %v8092_v54  ;;  %5716 = vmatprep.mubr.f32.mxu0 %v7550_v1 }
 0x1b5   : > { %7081 = vmatpush3.msk.msra.mxu1 %vm8162_vm5, %v8176_v41  ;;  %4791 = vmatprep.mubr.f32.mxu1 %v7550_v1  ;;  %vm5453_vm5 = vcmp.lt.s32.totalorder %v5447_v2, 512 }
 0x1b6   : > { %4873 = vmatprep.subr.mxu1 %v4383_v47 }
 0x1b8   : > { %6797 = vmatmul.mubr.msk.f32.gmra.mrb[44].mxu1 %vm3719_vm4, %v8106_v62 }
 0x1b9   : > { %7082 = vmatprep.mubr.msk.f32.mxu1 %vm3719_vm4, %v8092_v54 }
 0x1bc   : > { %7083 = vmatmul.mubr.msk.f32.vlgmr.msra.gmra.mrb[46].mxu1 %vm3719_vm4, %v8106_v62 }
 0x1bd   : > { %4874 = vmatpush1.msra.mxu1 %v4382_v48  ;;  %4937 = vmatprep.mubr.f32.mxu1 %v7550_v1 }
 0x1be   : > { %7085 = vmatprep.subr.mxu1 %v8264_v24 }
 0x1c0   : > { %6801 = vmatmul.mubr.msk.f32.vlgmr.msra.gmra.mrb[42].mxu1 %vm3719_vm4, %v8111_v0  ;;  %v5037_v50 = vpop.permute.xlu1 %5036 }
 0x1c1   : > { %7086 = vmatpush3.msra.mxu1 %v8264_v24  ;;  %4943 = vmatprep.mubr.f32.mxu1 %v7550_v1  ;;  %v5041_v35 = vsel %vm2617_vm3, %v5037_v50, %v5039_v44 }
 0x1c2   : > { %5045 = vmatprep.subr.mxu1 %v5041_v35 }
 0x1c4   : > { %6802 = vmatmul.mubr.msk.f32.gmra.mrb[44].mxu1 %vm3719_vm4, %v8191_v46  ;;  %v5035_v54 = vpop.permute.xlu1 %5034 }
 0x1c5   : > { %7087 = vmatprep.mubr.msk.f32.mxu1 %vm3719_vm4, %v8111_v0  ;;  %v5040_v62 = vsel %vm2617_vm3, %v5035_v54, %v5037_v50 }
 0x1c8   : > { %7088 = vmatmul.mubr.msk.f32.vlgmr.msra.gmra.mrb[46].mxu1 %vm3719_vm4, %v8191_v46 }
 0x1c9   : > { %5046 = vmatpush1.msra.mxu1 %v5040_v62  ;;  %5109 = vmatprep.mubr.f32.mxu1 %v7550_v1 }
 0x1ca   : > { %7090 = vmatprep.subr.mxu1 %v5039_v44 }
 0x1cc   : > { %6805 = vmatmul.mubr.msk.f32.vlgmr.msra.gmra.mrb[42].mxu1 %vm3719_vm4, %v8205_v51 }
 0x1cd   : > { %7091 = vmatpush3.msra.mxu1 %v5039_v44  ;;  %5115 = vmatprep.mubr.f32.mxu1 %v7550_v1 }
 0x1d0   : > { %6806 = vmatmul.mubr.msk.f32.gmra.mrb[44].mxu1 %vm3719_vm4, %v8253_v60 }
 0x1d1   : > { %7092 = vmatprep.mubr.msk.f32.mxu1 %vm3719_vm4, %v8205_v51 }
 0x1d4   : > { %7093 = vmatmul.mubr.msk.f32.vlgmr.msra.gmra.mrb[46].mxu1 %vm3719_vm4, %v8253_v60 }
 0x1d5   : > { %5281 = vmatprep.mubr.f32.mxu1 %v7550_v1 }
 0x1f4   : > { %v5211_v0 = vpop.permute.xlu1 %5210  ;;  %v5209_v38 = vpop.permute.xlu0 %5208 }
 0x1f5   : > { %v5213_v41 = vsel %vm2617_vm3, %v5209_v38, %v5211_v0 }
 0x1f6   : > { %5217 = vmatprep.subr.mxu1 %v5213_v41 }
 0x1f8   : > { %v5207_v42 = vpop.permute.xlu0 %5206 }
 0x1f9   : > { %v5212_v46 = vsel %vm2617_vm3, %v5207_v42, %v5209_v38 }
 0x1fa   : > { %5218 = vmatpush1.msra.mxu1 %v5212_v46  ;;  %v5529_v46 = vld [vmem:[%s9024_s5] sm:$0xff] }
 0x1fb   : > { %6809 = vmatmul.mubr.msk.f32.vlgmr.msra.gmra.mrb[42].mxu1 %vm3719_vm4, %v8260_v23  ;;  %7095 = vmatprep.subr.mxu1 %v5211_v0 }
 0x1fc   : > { %7096 = vmatpush3.msra.mxu1 %v5211_v0  ;;  %5287 = vmatprep.mubr.f32.mxu1 %v7550_v1 }
 0x1ff   : > { %6810 = vmatmul.mubr.msk.f32.gmra.mrb[44].mxu1 %vm3719_vm4, %v8276_v27 }
 0x200   : > { %7097 = vmatprep.mubr.msk.f32.mxu1 %vm3719_vm4, %v8260_v23 }
 0x203   : > { %7098 = vmatmul.mubr.msk.f32.vlgmr.msra.gmra.mrb[46].mxu1 %vm3719_vm4, %v8276_v27  ;;  %vm5450_vm4 = vcmp.ge.s32.totalorder %v5447_v2, 0  ;;  %v5532_v2 = vld [vmem:[%s9024_s5 + $0x18] sm:$0xff] }
 0x204   : > { %5615 = vmatprep.mubr.f32.mxu1 %v7550_v1  ;;  %vm8410_vm13 = vmand %vm5450_vm4, %vm5453_vm5 }
 0x205   : > { %v8383_v58 = vpop.permute.xlu1 %4555  ;;  %vm7107_vm4 = vmpackc.low %vm8417_vm2, %vm8417_vm2 }
 0x206   : > { %vm7110_vm5 = vmpackc.low %vm8437_vm10, %vm8437_vm10 }
 0x209   : > { %v8388_v61 = vpop.permute.xlu0 %4560 }
 0x272   : > { %v7074_v51 = vpop.f32.mrb[40].mxu1 }
 0x273   : > { %v4536_v53 = vpop.f32.mrb[41].mxu1  ;;  %v8396_v5 = vadd.f32 %v7074_v51, %v8388_v61  ;;  %v5530_v51 = vld [vmem:[%s9024_s5 + $0x8] sm:$0xff] }
 0x274   : > { %v8386_v59 = vadd.f32 %v8383_v58, %v4536_v53  ;;  %v5531_v53 = vld [vmem:[%s9024_s5 + $0x10] sm:$0xff] }
 0x275   : > { %v5468_v18 = vmul.f32 0.2, %v8396_v5  ;;  %vm5462_vm1 = vcmp.gt.f32.partialorder %v8396_v5, 0.0 }
 0x276   : > { %v5465_v7 = vmul.f32 0.2, %v8386_v59  ;;  %vm5459_vm7 = vcmp.gt.f32.partialorder %v8386_v59, 0.0 }
 0x277   : > { %v5474_v16 = vsel %vm5462_vm1, %v8396_v5, %v5468_v18 }
 0x278   : > { %v5471_v22 = vsel %vm5459_vm7, %v8386_v59, %v5465_v7  ;;  %v5486_v54 = vsel %vm8410_vm13, %v5474_v16, 0.0  ;;  %vm5538_vm7 = vcmask 130048   ;;  %v5488_v7 = vadd.s32 4294967295, %v5443_v57 }
 0x279   : > { %v5483_v36 = vsel %vm8410_vm13, %v5471_v22, 0.0  ;;  %vm5493_vm13 = vcmp.lt.s32.totalorder %v5487_v8, 512  ;;  %v6818_v8 = vld [vmem:[%s9024_s5 + $0x28] sm:$0xff] }
 0x27a   : > { %vm5491_vm12 = vcmp.ge.s32.totalorder %v5488_v7, 0  ;;  %vm5494_vm1 = vcmp.lt.s32.totalorder %v5488_v7, 512  ;;  %vm8517_vm8 = vmand %vm5490_vm0, %vm5493_vm13  ;;  %v6238_v7 = vld [vmem:[#allocation2] sm:$0x1] }
 0x282   : > { %v4459_v11 = vpop.f32.mrb[8].mxu0 }
 0x283   : > { %v8403_v13 = vadd.f32 %v8383_v58, %v4459_v11  ;;  %v4461_v15 = vpop.f32.mrb[9].mxu0 }
 0x284   : > { %v8406_v17 = vadd.f32 %v8383_v58, %v4461_v15 }
 0x285   : > { %v5463_v20 = vmul.f32 0.2, %v8403_v13  ;;  %vm5457_vm9 = vcmp.gt.f32.partialorder %v8403_v13, 0.0 }
 0x286   : > { %v5464_v60 = vmul.f32 0.2, %v8406_v17  ;;  %v4465_v23 = vpop.f32.mrb[10].mxu0  ;;  %vm5458_vm6 = vcmp.gt.f32.partialorder %v8406_v17, 0.0 }
 0x287   : > { %v8424_v25 = vadd.f32 %v8388_v61, %v4465_v23  ;;  %v4467_v27 = vpop.f32.mrb[11].mxu0  ;;  %v5469_v45 = vsel %vm5457_vm9, %v8403_v13, %v5463_v20  ;;  %v5489_v20 = vadd.s32 4294967295, %v5444_v55 }
 0x288   : > { %v8427_v28 = vadd.f32 %v8388_v61, %v4467_v27  ;;  %v5470_v32 = vsel %vm5458_vm6, %v8406_v17, %v5464_v60  ;;  %v5481_v50 = vsel %vm8437_vm10, %v5469_v45, 0.0 }
 0x289   : > { %v5466_v14 = vmul.f32 0.2, %v8424_v25  ;;  %v5482_v39 = vsel %vm8417_vm2, %v5470_v32, 0.0  ;;  %vm5460_vm11 = vcmp.gt.f32.partialorder %v8424_v25, 0.0  ;;  %vm5492_vm9 = vcmp.ge.s32.totalorder %v5489_v20, 0 }
 0x28a   : > { %vm5461_vm14 = vcmp.gt.f32.partialorder %v8427_v28, 0.0  ;;  %v5467_v3 = vmul.f32 0.2, %v8427_v28  ;;  %v8445_v47 = vpack.i.bf16 %v5483_v36, %v5482_v39 }
 0x28b   : > { %v5472_v48 = vsel %vm5460_vm11, %v8424_v25, %v5466_v14  ;;  %vm8525_vm11 = vmand %vm5491_vm12, %vm5494_vm1 }
 0x28c   : > { %v5473_v44 = vsel %vm5461_vm14, %v8427_v28, %v5467_v3  ;;  %7326 = vrot.lane.b32.xlu1 %v8445_v47, %s8982_s13  ;;  %v5484_v35 = vsel %vm8437_vm10, %v5472_v48, 0.0  ;;  %v7109_v41 = vpack.c.bf16 %v5472_v48, %v5469_v45  ;;  %vm5495_vm14 = vcmp.lt.s32.totalorder %v5489_v20, 512 }
 0x28d   : > { %v7106_v62 = vpack.c.bf16 %v5473_v44, %v5470_v32  ;;  %v8460_v0 = vpack.i.bf16 %v5484_v35, %v5481_v50  ;;  %v5485_v38 = vsel %vm8417_vm2, %v5473_v44, 0.0  ;;  %vm5498_vm12 = vmand %vm5492_vm9, %vm5495_vm14 }
 0x28e   : > { %v8467_v42 = vpack.i.bf16 %v5486_v54, %v5485_v38 }
 0x28f   : > { %7108 = vmatprep.subr.msk.bf16.mxu0 %vm7107_vm4, %v7106_v62  ;;  %7336 = vrot.lane.b32.xlu0 %v8460_v0, %s8982_s13  ;;  %vm7101_vm4 = vmpackc.low %vm8525_vm11, %vm8525_vm11 }
 0x290   : > { %7331 = vrot.lane.b32.xlu1 %v8467_v42, %s8982_s13  ;;  %7111 = vmatpush1.bf16.msk.msra.mxu0 %vm7110_vm5, %v7109_v41  ;;  %vm7104_vm5 = vmpackc.low %vm8517_vm8, %vm8517_vm8 }
 0x293   : > { %6833 = vmatmul.mubr.msk.f32.vlgmr.msra.gmra.mrb[12].mxu0 %vm5538_vm7, %v5529_v46 }
 0x294   : > { %5722 = vmatprep.mubr.f32.mxu0 %v7550_v1 }
 0x297   : > { %6834 = vmatmul.mubr.msk.f32.gmra.mrb[14].mxu0 %vm5538_vm7, %v5530_v51 }
 0x298   : > { %5728 = vmatprep.mubr.f32.mxu0 %v7550_v1 }
 0x29b   : > { %6835 = vmatmul.mubr.msk.f32.gmra.mrb[16].mxu0 %vm5538_vm7, %v5531_v53 }
 0x29c   : > { %5734 = vmatprep.mubr.f32.mxu0 %v7550_v1 }
 0x29f   : > { %6836 = vmatmul.mubr.msk.f32.gmra.mrb[18].mxu0 %vm5538_vm7, %v5532_v2  ;;  %v6156_v2 = vld [vmem:[%s9029_s6 + $0x8] sm:$0xff] }
 0x2a0   : > { %5848 = vmatprep.mubr.f32.mxu0 %v7550_v1 }
 0x2ce   : > { %v5283_v4 = vpop.f32.mrb[42].mxu1 }
 0x2cf   : > { %v8498_v11 = vadd.f32 %v5283_v4, %v8383_v58  ;;  %v5285_v15 = vpop.f32.mrb[43].mxu1  ;;  %v6155_v4 = vld [vmem:[%s9029_s6] sm:$0xff] }
 0x2d0   : > { %v8501_v18 = vadd.f32 %v5285_v15, %v8383_v58  ;;  %v6819_v15 = vld [vmem:[%s9024_s5 + $0x30] sm:$0xff] }
 0x2d1   : > { %v5505_v21 = vmul.f32 0.2, %v8498_v11  ;;  %vm5499_vm15 = vcmp.gt.f32.partialorder %v8498_v11, 0.0 }
 0x2d2   : > { %v5289_v22 = vpop.f32.mrb[44].mxu1  ;;  %v5506_v52 = vmul.f32 0.2, %v8501_v18  ;;  %vm5500_vm2 = vcmp.gt.f32.partialorder %v8501_v18, 0.0 }
 0x2d3   : > { %v8509_v10 = vadd.f32 %v5289_v22, %v8388_v61  ;;  %v5291_v57 = vpop.f32.mrb[45].mxu1  ;;  %v5511_v60 = vsel %vm5499_vm15, %v8498_v11, %v5505_v21  ;;  %vm3558_vm15 = vcmask 1031168  }
 0x2d4   : > { %v8513_v56 = vadd.f32 %v5291_v57, %v8388_v61  ;;  %v5512_v14 = vsel %vm5500_vm2, %v8501_v18, %v5506_v52 }
 0x2d5   : > { %vm5502_vm6 = vcmp.gt.f32.partialorder %v8509_v10, 0.0  ;;  %v5508_v55 = vmul.f32 0.2, %v8509_v10  ;;  %v5524_v46 = vsel %vm8525_vm11, %v5512_v14, 0.0 }
 0x2d6   : > { %vm5503_vm10 = vcmp.gt.f32.partialorder %v8513_v56, 0.0  ;;  %v5509_v23 = vmul.f32 0.2, %v8513_v56  ;;  %v7099_v24 = vpop.f32.mrb[46].mxu1 }
 0x2d7   : > { %v5514_v32 = vsel %vm5502_vm6, %v8509_v10, %v5508_v55  ;;  %v8531_v36 = vadd.f32 %v7099_v24, %v8388_v61  ;;  %v5360_v16 = vpop.f32.mrb[47].mxu1 }
 0x2d8   : > { %v7103_v39 = vpack.c.bf16 %v5514_v32, %v5511_v60  ;;  %v8538_v40 = vadd.f32 %v5360_v16, %v8383_v58  ;;  %v5515_v45 = vsel %vm5503_vm10, %v8513_v56, %v5509_v23  ;;  %v5526_v61 = vsel %vm8517_vm8, %v5514_v32, 0.0 }
 0x2d9   : > { %v5510_v3 = vmul.f32 0.2, %v8531_v36  ;;  %v7100_v48 = vpack.c.bf16 %v5515_v45, %v5512_v14  ;;  %vm5504_vm0 = vcmp.gt.f32.partialorder %v8531_v36, 0.0  ;;  %v5523_v58 = vsel %vm8517_vm8, %v5511_v60, 0.0 }
 0x2da   : > { %v5507_v44 = vmul.f32 0.2, %v8538_v40  ;;  %vm5501_vm13 = vcmp.gt.f32.partialorder %v8538_v40, 0.0  ;;  %v7350_v50 = vpack.i.bf16 %v5526_v61, %v5523_v58  ;;  %v5527_v54 = vsel %vm8525_vm11, %v5515_v45, 0.0 }
 0x2db   : > { %7102 = vmatprep.subr.msk.bf16.mxu1 %vm7101_vm4, %v7100_v48  ;;  %v5516_v35 = vsel %vm5504_vm0, %v8531_v36, %v5510_v3  ;;  %vm6248_vm11 = vcmask 261120  }
 0x2dc   : > { %7105 = vmatpush1.bf16.msk.msra.mxu1 %vm7104_vm5, %v7103_v39  ;;  %v5528_v62 = vsel %vm5498_vm12, %v5516_v35, 0.0  ;;  %v5513_v38 = vsel %vm5501_vm13, %v8538_v40, %v5507_v44 }
 0x2dd   : > { %v7340_v41 = vpack.i.bf16 %v5528_v62, %v5527_v54  ;;  %v5525_v51 = vsel %vm5498_vm12, %v5513_v38, 0.0 }
 0x2de   : > { %v7345_v53 = vpack.i.bf16 %v5525_v51, %v5524_v46  ;;  %v6846_v46 = vld [vmem:[%s9024_s5 + $0x68] sm:$0xff]  ;;  %v6847_v51 = vld [vmem:[%s9024_s5 + $0x70] sm:$0xff] }
 0x2df   : > { %7341 = vrot.lane.b32.xlu0 %v7340_v41, %s8982_s13 }
 0x2e0   : > { %7346 = vrot.lane.b32.xlu1 %v7345_v53, %s8982_s13  ;;  %v6848_v53 = vld [vmem:[%s9024_s5 + $0x78] sm:$0xff] }
 0x2e3   : > { %7356 = vrot.lane.b32.xlu0 %v8445_v47, %s8984_s20  ;;  %v6158_v47 = vld [vmem:[%s9029_s6 + $0x18] sm:$0xff] }
 0x2e4   : > { %7351 = vrot.lane.b32.xlu1 %v7350_v50, %s8982_s13  ;;  %v6845_v50 = vld [vmem:[%s9024_s5 + $0x60] sm:$0xff]  ;;  %s8737_s13 = scalar_lea.vmem [#allocation5], %s8723_s19 }
 0x2e5   : > { %s6395_s18 = sshll.u32 %s8737_s13, 4  ;;  %s8812_s18 = int_to_ptr.vmem [resolvable:$true] %s6395_s18 }
 0x2e6   : > { %p7385_p1 = scmp.lt.s32.totalorder %s8812_s18, %s7383_s2 }
 0x2e7   : > { %7366 = vrot.lane.b32.xlu0 %v8460_v0, %s8984_s20  ;;  %v6157_v0 = vld [vmem:[%s9029_s6 + $0x10] sm:$0xff] }
 0x2e8   : > { %7361 = vrot.lane.b32.xlu1 %v8467_v42, %s8984_s20  ;;  %v6817_v42 = vld [vmem:[%s9024_s5 + $0x20] sm:$0xff]  ;;  %s9031_s20 = smov 126  }
 0x2e9   : > { %6825 = vmatmul.mubr.msk.f32.vlgmr.msra.gmra.mrb[48].mxu1 %vm5538_vm7, %v6817_v42 }
 0x2ea   : > { %5621 = vmatprep.mubr.f32.mxu1 %v7550_v1 }
 0x2eb   : > { %6166 = vperm.xlu0 %7324, %v6156_v2  }
 0x2ec   : > { %6161 = vperm.xlu1 %7323, %v6155_v4  }
 0x2ed   : > { %6826 = vmatmul.mubr.msk.f32.gmra.mrb[50].mxu1 %vm5538_vm7, %v6818_v8 }
 0x2ee   : > { %5627 = vmatprep.mubr.f32.mxu1 %v7550_v1 }
 0x2ef   : > { %6176 = vperm.xlu0 %7324, %v6158_v47   ;;  %v6853_v47 = vld [vmem:[%s9024_s5 + $0x80] sm:$0xff] }
 0x2f0   : > { %6171 = vperm.xlu1 %7323, %v6157_v0  }
 0x2f1   : > { %6827 = vmatmul.mubr.msk.f32.gmra.mrb[52].mxu1 %vm5538_vm7, %v6819_v15 }
 0x2f2   : > { %5633 = vmatprep.mubr.f32.mxu1 %v7550_v1 }
 0x2f3   : > { %5387 = vrot.lane.b32.xlu0 %v8403_v13, %s9030_s29  ;;  %v6820_v13 = vld [vmem:[%s9024_s5 + $0x38] sm:$0xff] }
 0x2f4   : > { %6241 = vperm.xlu1 %7323, %v6238_v7   ;;  %v6854_v7 = vld [vmem:[%s9024_s5 + $0x88] sm:$0xff] }
 0x2f5   : > { %6828 = vmatmul.mubr.msk.f32.gmra.mrb[54].mxu1 %vm5538_vm7, %v6820_v13  ;;  %v6855_v13 = vld [vmem:[%s9024_s5 + $0x90] sm:$0xff] }
 0x2f6   : > { %6316 = vmatprep.mubr.f32.mxu1 %v7550_v1 }
 0x2f7   : > { %5391 = vrot.lane.b32.xlu0 %v8386_v59, %s9030_s29 }
 0x2f8   : > { %5389 = vrot.lane.b32.xlu1 %v8406_v17, %s9030_s29 }
 0x2fb   : > { %5395 = vrot.lane.b32.xlu0 %v8427_v28, %s9030_s29 }
 0x2fc   : > { %5393 = vrot.lane.b32.xlu1 %v8424_v25, %s9030_s29 }
 0x2fe   : > { %v7327_v59 = vpop.permute.xlu1 %7326 }
 0x2ff   : > { %5417 = vrot.lane.b32.xlu0 %v8498_v11, %s9030_s29  ;;  %v7329_v17 = vunpack.i.h.bf16 %v7327_v59  ;;  %v7328_v20 = vunpack.i.l.bf16 %v7327_v59 }
 0x300   : > { %5397 = vrot.lane.b32.xlu1 %v8396_v5, %s9030_s29 }
 0x301   : > { %v7337_v21 = vpop.permute.xlu0 %7336  ;;  %v5765_v5 = vsel %vm2617_vm3, %v7328_v20, %v7329_v17 }
 0x302   : > { %v7339_v22 = vunpack.i.h.bf16 %v7337_v21  ;;  %v7338_v52 = vunpack.i.l.bf16 %v7337_v21  ;;  %v7332_v28 = vpop.permute.xlu1 %7331 }
 0x303   : > { %v7334_v57 = vunpack.i.h.bf16 %v7332_v28  ;;  %v7333_v55 = vunpack.i.l.bf16 %v7332_v28  ;;  %5421 = vrot.lane.b32.xlu0 %v8538_v40, %s9030_s29 }
 0x304   : > { %v5764_v25 = vsel %vm2617_vm3, %v7338_v52, %v7328_v20  ;;  %5419 = vrot.lane.b32.xlu1 %v8501_v18, %s9030_s29  ;;  %v6837_v18 = vld [vmem:[%s9024_s5 + $0x40] sm:$0xff] }
 0x305   : > { %v5766_v11 = vsel %vm2617_vm3, %v7339_v22, %v7333_v55  ;;  %v5767_v63 = vsel %vm2617_vm3, %v7333_v55, %v7334_v57  ;;  %v6856_v22 = vld [vmem:[%s9024_s5 + $0x98] sm:$0xff] }
 0x306   : > { %v7114_v60 = vpack.c.bf16 %v5766_v11, %v5764_v25  ;;  %v7112_v23 = vpack.c.bf16 %v5767_v63, %v5765_v5 }
 0x307   : > { %5425 = vrot.lane.b32.xlu0 %v8513_v56, %s9030_s29  ;;  %v6838_v56 = vld [vmem:[%s9024_s5 + $0x48] sm:$0xff] }
 0x308   : > { %7113 = vmatprep.subr.bf16.mxu0 %v7112_v23  ;;  %5423 = vrot.lane.b32.xlu1 %v8509_v10, %s9030_s29 }
 0x309   : > { %7115 = vmatpush1.bf16.msra.mxu0 %v7114_v60 }
 0x30b   : > { %3521 = vrot.lane.b32.xlu0 %v8157_v31, %s9030_s29  ;;  %v6839_v31 = vld [vmem:[%s9024_s5 + $0x50] sm:$0xff] }
 0x30c   : > { %5427 = vrot.lane.b32.xlu1 %v8531_v36, %s9030_s29  ;;  %6841 = vmatmul.mubr.msk.f32.vlgmr.msra.gmra.mrb[12].mxu0 %vm5538_vm7, %v6837_v18 }
 0x30d   : > { %5854 = vmatprep.mubr.f32.mxu0 %v7550_v1 }
 0x30f   : > { %3525 = vrot.lane.b32.xlu0 %v8154_v29, %s9030_s29  ;;  %v6840_v29 = vld [vmem:[%s9024_s5 + $0x58] sm:$0xff]  ;;  %s7378_s5 = scalar_lea.vmem %s8812_s18, 1024 }
 0x310   : > { %3523 = vrot.lane.b32.xlu1 %v8160_v33, %s9030_s29  ;;  %6842 = vmatmul.mubr.msk.f32.gmra.mrb[14].mxu0 %vm5538_vm7, %v6838_v56  ;;  %p7379_p12 = scmp.ne.s32.totalorder %s8812_s18, %s7378_s5 }
 0x311   : > { %5860 = vmatprep.mubr.f32.mxu0 %v7550_v1 }
 0x312   : > { %p7380_p13 = pnand %p7379_p12, %p7672_p4 }
 0x313   : > { %3538 = vrot.lane.b32.xlu0 %v8285_v37, %s9030_s29 }
 0x314   : > { %3536 = vrot.lane.b32.xlu1 %v8280_v34, %s9030_s29  ;;  %6843 = vmatmul.mubr.msk.f32.gmra.mrb[16].mxu0 %vm5538_vm7, %v6839_v31  ;;  %p7381_p0 = pneg %p7380_p13 }
 0x315   : > { %5866 = vmatprep.mubr.f32.mxu0 %v7550_v1 }
 0x317   : > { %3552 = vrot.lane.b32.xlu0 %v8049_v26, %s9031_s20 }
 0x318   : > { %3540 = vrot.lane.b32.xlu1 %v8241_v19, %s9030_s29  ;;  %6844 = vmatmul.mubr.msk.f32.gmra.mrb[18].mxu0 %vm5538_vm7, %v6840_v29  ;;  %s8776_s29 = scalar_lea.vmem [#allocation7], %s8723_s19 }
 0x319   : > { %5988 = vmatprep.mubr.f32.mxu0 %v7550_v1  ;;  %s6413_s21 = sshll.u32 %s8776_s29, 4  ;;  %s8809_s21 = int_to_ptr.vmem [resolvable:$true] %s6413_s21 }
 0x31b   : > { %3556 = vrot.lane.b32.xlu0 %v8025_v6, %s9031_s20 }
 0x31c   : > { %3554 = vrot.lane.b32.xlu1 %v8052_v30, %s9031_s20 }
 0x31f   : > { %3571 = vrot.lane.b32.xlu0 %v8123_v12, %s9031_s20 }
 0x320   : > { %3569 = vrot.lane.b32.xlu1 %v8120_v9, %s9031_s20 }
 0x324   : > { %3573 = vrot.lane.b32.xlu1 %v8078_v43, %s9031_s20  ;;  %s8757_s20 = scalar_lea.vmem [#allocation3], %s8723_s19 }
 0x351   : > { %v7342_v26 = vpop.permute.xlu0 %7341 }
 0x352   : > { %v7344_v33 = vunpack.i.h.bf16 %v7342_v26  ;;  %v7343_v19 = vunpack.i.l.bf16 %v7342_v26  ;;  %v7347_v34 = vpop.permute.xlu1 %7346 }
 0x353   : > { %v7349_v37 = vunpack.i.h.bf16 %v7347_v34  ;;  %v7348_v10 = vunpack.i.l.bf16 %v7347_v34 }
 0x354   : > { %v5907_v6 = vsel %vm2617_vm3, %v7343_v19, %v7344_v33 }
 0x355   : > { %v7357_v24 = vpop.permute.xlu0 %7356  ;;  %v5905_v30 = vsel %vm2617_vm3, %v7348_v10, %v7349_v37 }
 0x356   : > { %v7352_v27 = vpop.permute.xlu1 %7351  ;;  %v7116_v32 = vpack.c.bf16 %v5907_v6, %v5905_v30  ;;  %v7359_v9 = vunpack.i.h.bf16 %v7357_v24  ;;  %v7358_v16 = vunpack.i.l.bf16 %v7357_v24 }
 0x357   : > { %v7354_v12 = vunpack.i.h.bf16 %v7352_v27  ;;  %v7353_v36 = vunpack.i.l.bf16 %v7352_v27 }
 0x358   : > { %7117 = vmatprep.subr.bf16.mxu0 %v7116_v32  ;;  %v6039_v54 = vsel %vm3558_vm15, %v7358_v16, %v7359_v9 }
 0x359   : > { %v5906_v43 = vsel %vm2617_vm3, %v7354_v12, %v7343_v19  ;;  %v5904_v14 = vsel %vm2617_vm3, %v7353_v36, %v7348_v10  ;;  %v7367_v39 = vpop.permute.xlu0 %7366 }
 0x35a   : > { %v7118_v40 = vpack.c.bf16 %v5906_v43, %v5904_v14  ;;  %v7369_v45 = vunpack.i.h.bf16 %v7367_v39  ;;  %v7368_v61 = vunpack.i.l.bf16 %v7367_v39  ;;  %v7362_v3 = vpop.permute.xlu1 %7361 }
 0x35b   : > { %v7364_v48 = vunpack.i.h.bf16 %v7362_v3  ;;  %v7363_v58 = vunpack.i.l.bf16 %v7362_v3 }
 0x35c   : > { %v6038_v44 = vsel %vm3558_vm15, %v7368_v61, %v7358_v16  ;;  %7119 = vmatpush1.bf16.msra.mxu0 %v7118_v40 }
 0x35d   : > { %v6040_v35 = vsel %vm3558_vm15, %v7369_v45, %v7363_v58  ;;  %v6041_v62 = vsel %vm3558_vm15, %v7363_v58, %v7364_v48 }
 0x35e   : > { %v7122_v38 = vpack.c.bf16 %v6040_v35, %v6038_v44  ;;  %v7120_v41 = vpack.c.bf16 %v6041_v62, %v6039_v54 }
 0x35f   : > { %6849 = vmatmul.mubr.msk.f32.vlgmr.msra.gmra.mrb[12].mxu0 %vm5538_vm7, %v6845_v50 }
 0x360   : > { %7121 = vmatprep.subr.bf16.mxu0 %v7120_v41  ;;  %5994 = vmatprep.mubr.f32.mxu0 %v7550_v1 }
 0x361   : > { %7123 = vmatpush1.bf16.msra.mxu0 %v7122_v38 }
 0x363   : > { %6850 = vmatmul.mubr.msk.f32.gmra.mrb[14].mxu0 %vm5538_vm7, %v6846_v46 }
 0x364   : > { %6000 = vmatprep.mubr.f32.mxu0 %v7550_v1 }
 0x367   : > { %6851 = vmatmul.mubr.msk.f32.gmra.mrb[16].mxu0 %vm5538_vm7, %v6847_v51 }
 0x368   : > { %6006 = vmatprep.mubr.f32.mxu0 %v7550_v1 }
 0x36a   : > { %v8698_v2 = vpop.permute.xlu0 %6166 }
 0x36b   : > { %v8700_v4 = vpop.permute.xlu1 %6161  ;;  %6852 = vmatmul.mubr.msk.f32.gmra.mrb[18].mxu0 %vm5538_vm7, %v6848_v53 }
 0x36c   : > { %6122 = vmatprep.mubr.f32.mxu0 %v7550_v1 }
 0x36e   : > { %v8707_v0 = vpop.permute.xlu0 %6176 }
 0x36f   : > { %v8709_v42 = vpop.permute.xlu1 %6171  ;;  %6857 = vmatmul.mubr.msk.f32.vlgmr.msra.gmra.mrb[12].mxu0 %vm5538_vm7, %v6853_v47 }
 0x370   : > { %6128 = vmatprep.mubr.f32.mxu0 %v7550_v1 }
 0x372   : > { %v5388_v8 = vpop.permute.xlu0 %5387 }
 0x373   : > { %v8719_v15 = vpop.permute.xlu1 %6241  ;;  %6858 = vmatmul.mubr.msk.f32.gmra.mrb[14].mxu0 %vm5538_vm7, %v6854_v7 }
 0x374   : > { %6134 = vmatprep.mubr.f32.mxu0 %v7550_v1 }
 0x376   : > { %v5392_v59 = vpop.permute.xlu0 %5391 }
 0x377   : > { %v5390_v17 = vpop.permute.xlu1 %5389  ;;  %6859 = vmatmul.mubr.msk.f32.gmra.mrb[16].mxu0 %vm5538_vm7, %v6855_v13 }
 0x378   : > { %v5399_v20 = vsel %vm2617_vm3, %v5388_v8, %v5390_v17  ;;  %v5400_v21 = vsel %vm2617_vm3, %v5390_v17, %v5392_v59  ;;  %6140 = vmatprep.mubr.f32.mxu0 %v7550_v1 }
 0x379   : > { %5407 = vst [vmem:[%s8737_s13] sm:$0xff] %v5399_v20  ;;  %5408 = vst [vmem:[%s8737_s13 + $0x8] sm:$0xff] %v5400_v21 }
 0x37a   : > { %v5396_v52 = vpop.permute.xlu0 %5395 }
 0x37b   : > { %v5394_v28 = vpop.permute.xlu1 %5393  ;;  %6860 = vmatmul.mubr.msk.f32.gmra.mrb[18].mxu0 %vm5538_vm7, %v6856_v22 }
 0x37c   : > { %v5401_v1 = vsel %vm2617_vm3, %v5394_v28, %v5396_v52 }
 0x37d   : > { %5409 = vst [vmem:[%s8737_s13 + $0x10] sm:$0xff] %v5401_v1 }
 0x37e   : > { %v5418_v57 = vpop.permute.xlu0 %5417 }
 0x37f   : > { %v5398_v55 = vpop.permute.xlu1 %5397 }
 0x380   : > { %v5402_v25 = vsel %vm2617_vm3, %v5396_v52, %v5398_v55 }
 0x381   : > { %5410 = vst [vmem:[%s8737_s13 + $0x18] sm:$0xff] %v5402_v25 }
 0x382   : > { %v5422_v11 = vpop.permute.xlu0 %5421 }
 0x383   : > { %v5420_v5 = vpop.permute.xlu1 %5419 }
 0x384   : > { %v5429_v63 = vsel %vm2617_vm3, %v5418_v57, %v5420_v5  ;;  %v5430_v60 = vsel %vm2617_vm3, %v5420_v5, %v5422_v11 }
 0x385   : > { %6813 = vst [vmem:[%s8737_s13 + $0x20] sm:$0xff] %v5429_v63  ;;  %6814 = vst [vmem:[%s8737_s13 + $0x28] sm:$0xff] %v5430_v60 }
 0x386   : > { %v5426_v23 = vpop.permute.xlu0 %5425 }
 0x387   : > { %v5424_v18 = vpop.permute.xlu1 %5423 }
 0x388   : > { %v5431_v56 = vsel %vm2617_vm3, %v5424_v18, %v5426_v23 }
 0x389   : > { %6815 = vst [vmem:[%s8737_s13 + $0x30] sm:$0xff] %v5431_v56 }
 0x38a   : > { %v3522_v31 = vpop.permute.xlu0 %3521 }
 0x38b   : > { %v5428_v29 = vpop.permute.xlu1 %5427 }
 0x38c   : > { %v5432_v26 = vsel %vm2617_vm3, %v5426_v23, %v5428_v29 }
 0x38d   : > { %6816 = vst [vmem:[%s8737_s13 + $0x38] sm:$0xff] %v5432_v26  ;;  %s7384_s13 = scalar_lea.vmem %s7383_s2, 2048 }
 0x38e   : > { %v3526_v33 = vpop.permute.xlu0 %3525  ;;  %p7386_p2 = scmp.lt.s32.totalorder %s7384_s13, %s7378_s5 }
 0x38f   : > { %v3524_v19 = vpop.permute.xlu1 %3523 }
 0x390   : > { %v3527_v34 = vsel %vm2617_vm3, %v3522_v31, %v3524_v19  ;;  %v3528_v37 = vsel %vm2617_vm3, %v3524_v19, %v3526_v33  ;;  %p7387_p3 = por %p7386_p2, %p7385_p1 }
 0x391   : > { %3531 = vst [vmem:[%s8757_s20] sm:$0xff] %v3527_v34  ;;  %3532 = vst [vmem:[%s8757_s20 + $0x8] sm:$0xff] %v3528_v37 }
 0x392   : > { %v3539_v10 = vpop.permute.xlu0 %3538  ;;  %p7388_p5 = pnand %p7387_p3, %p7381_p0 }
 0x393   : > { %v3537_v6 = vpop.permute.xlu1 %3536 }
 0x394   : > { %v3542_v24 = vsel %vm2617_vm3, %v3537_v6, %v3539_v10 }
 0x395   : > { %6741 = vst [vmem:[%s8757_s20 + $0x10] sm:$0xff] %v3542_v24 }
 0x396   : > { %v3553_v30 = vpop.permute.xlu0 %3552 }
 0x397   : > { %v3541_v27 = vpop.permute.xlu1 %3540 }
 0x398   : > { %v3543_v32 = vsel %vm2617_vm3, %v3539_v10, %v3541_v27 }
 0x399   : > { %6742 = vst [vmem:[%s8757_s20 + $0x18] sm:$0xff] %v3543_v32 }
 0x39a   : > { %v3557_v12 = vpop.permute.xlu0 %3556 }
 0x39b   : > { %v3555_v36 = vpop.permute.xlu1 %3554 }
 0x39c   : > { %v3559_v9 = vsel %vm3558_vm15, %v3553_v30, %v3555_v36  ;;  %v3560_v16 = vsel %vm3558_vm15, %v3555_v36, %v3557_v12 }
 0x39d   : > { %6743 = vst [vmem:[%s8757_s20 + $0x20] sm:$0xff] %v3559_v9  ;;  %6744 = vst [vmem:[%s8757_s20 + $0x28] sm:$0xff] %v3560_v16 }
 0x39e   : > { %v3572_v43 = vpop.permute.xlu0 %3571 }
 0x39f   : > { %v3570_v14 = vpop.permute.xlu1 %3569 }
 0x3a0   : > { %v3575_v39 = vsel %vm3558_vm15, %v3570_v14, %v3572_v43 }
 0x3a1   : > { %6745 = vst [vmem:[%s8757_s20 + $0x30] sm:$0xff] %v3575_v39 }
 0x3a3   : > { %v3574_v40 = vpop.permute.xlu1 %3573 }
 0x3a4   : > { %v3576_v45 = vsel %vm3558_vm15, %v3572_v43, %v3574_v40 }
 0x3a5   : > { %6746 = vst [vmem:[%s8757_s20 + $0x38] sm:$0xff] %v3576_v45 }
 0x3bc   : > { %v5617_v61 = vpop.f32.mrb[48].mxu1 }
 0x3bd   : > { %v5619_v3 = vpop.f32.mrb[49].mxu1 }
 0x3c0   : > { %v5623_v48 = vpop.f32.mrb[50].mxu1 }
 0x3c1   : > { %v5625_v58 = vpop.f32.mrb[51].mxu1 }
 0x3c4   : > { %v5629_v44 = vpop.f32.mrb[52].mxu1 }
 0x3c5   : > { %v5631_v50 = vpop.f32.mrb[53].mxu1 }
 0x3c8   : > { %v5635_v35 = vpop.f32.mrb[54].mxu1 }
 0x3c9   : > { %v5637_v54 = vpop.f32.mrb[55].mxu1 }
 0x442   : > { %v6124_v62 = vpop.f32.mrb[12].mxu0 }
 0x443   : > { %v7132_v38 = vadd.f32 %v6124_v62, %v5617_v61  ;;  %v6126_v41 = vpop.f32.mrb[13].mxu0 }
 0x444   : > { %v7133_v46 = vadd.f32 %v6126_v41, %v5619_v3 }
 0x445   : > { %v6179_v51 = vadd.f32 %v7132_v38, %v8700_v4 }
 0x446   : > { %v6180_v53 = vadd.f32 %v7133_v46, %v8700_v4  ;;  %v6130_v47 = vpop.f32.mrb[14].mxu0 }
 0x447   : > { %6187 = vst [vmem:[%s8776_s29] sm:$0xff] %v6179_v51  ;;  %v7134_v7 = vadd.f32 %v6130_v47, %v5623_v48  ;;  %v6132_v8 = vpop.f32.mrb[15].mxu0  ;;  %v6209_v59 = vmul.f32 0.2, %v6179_v51  ;;  %vm6201_vm3 = vcmp.gt.f32.partialorder %v6179_v51, 0.0 }
 0x448   : > { %6188 = vst [vmem:[%s8776_s29 + $0x8] sm:$0xff] %v6180_v53  ;;  %v7135_v13 = vadd.f32 %v6132_v8, %v5625_v58  ;;  %v6210_v4 = vmul.f32 0.2, %v6180_v53  ;;  %vm6202_vm1 = vcmp.gt.f32.partialorder %v6180_v53, 0.0 }
 0x449   : > { %v6181_v17 = vadd.f32 %v7134_v7, %v8698_v2  ;;  %v6217_v25 = vsel %vm6201_vm3, %v6179_v51, %v6209_v59 }
 0x44a   : > { %v6182_v20 = vadd.f32 %v7135_v13, %v8698_v2  ;;  %v6136_v21 = vpop.f32.mrb[16].mxu0  ;;  %v6218_v63 = vsel %vm6202_vm1, %v6180_v53, %v6210_v4 }
 0x44b   : > { %6189 = vst [vmem:[%s8776_s29 + $0x10] sm:$0xff] %v6181_v17  ;;  %vm6203_vm7 = vcmp.gt.f32.partialorder %v6181_v17, 0.0  ;;  %v6211_v22 = vmul.f32 0.2, %v6181_v17  ;;  %v7136_v52 = vadd.f32 %v6136_v21, %v5629_v44  ;;  %v6138_v28 = vpop.f32.mrb[17].mxu0 }
 0x44c   : > { %6190 = vst [vmem:[%s8776_s29 + $0x18] sm:$0xff] %v6182_v20  ;;  %v7137_v1 = vadd.f32 %v6138_v28, %v5631_v50  ;;  %vm6204_vm2 = vcmp.gt.f32.partialorder %v6182_v20, 0.0  ;;  %v6212_v57 = vmul.f32 0.2, %v6182_v20 }
 0x44d   : > { %v6183_v55 = vadd.f32 %v7136_v52, %v8709_v42  ;;  %v6219_v11 = vsel %vm6203_vm7, %v6181_v17, %v6211_v22 }
 0x44e   : > { %v6184_v2 = vadd.f32 %v7137_v1, %v8709_v42  ;;  %v6142_v5 = vpop.f32.mrb[18].mxu0  ;;  %v6220_v60 = vsel %vm6204_vm2, %v6182_v20, %v6212_v57  ;;  %v7126_v23 = vpack.c.bf16 %v6219_v11, %v6217_v25 }
 0x44f   : > { %6191 = vst [vmem:[%s8776_s29 + $0x20] sm:$0xff] %v6183_v55  ;;  %v7138_v18 = vadd.f32 %v6142_v5, %v5635_v35  ;;  %v6144_v56 = vpop.f32.mrb[19].mxu0  ;;  %v7124_v31 = vpack.c.bf16 %v6220_v60, %v6218_v63  ;;  %v6213_v26 = vmul.f32 0.2, %v6183_v55  ;;  %vm6205_vm6 = vcmp.gt.f32.partialorder %v6183_v55, 0.0 }
 0x450   : > { %6192 = vst [vmem:[%s8776_s29 + $0x28] sm:$0xff] %v6184_v2  ;;  %v7139_v29 = vadd.f32 %v6144_v56, %v5637_v54  ;;  %v6214_v42 = vmul.f32 0.2, %v6184_v2  ;;  %vm6206_vm9 = vcmp.gt.f32.partialorder %v6184_v2, 0.0 }
 0x451   : > { %v6185_v33 = vadd.f32 %v7138_v18, %v8707_v0  ;;  %7125 = vmatprep.subr.bf16.mxu1 %v7124_v31  ;;  %v6221_v10 = vsel %vm6205_vm6, %v6183_v55, %v6213_v26 }
 0x452   : > { %v6186_v19 = vadd.f32 %v7139_v29, %v8707_v0  ;;  %7127 = vmatpush1.bf16.msra.mxu1 %v7126_v23  ;;  %v6222_v24 = vsel %vm6206_vm9, %v6184_v2, %v6214_v42  ;;  %v6237_v0 = vld [vmem:[%s9032_s7] sm:$0x1] }
 0x453   : > { %6193 = vst [vmem:[%s8776_s29 + $0x30] sm:$0xff] %v6185_v33  ;;  %vm6207_vm8 = vcmp.gt.f32.partialorder %v6185_v33, 0.0  ;;  %v6215_v34 = vmul.f32 0.2, %v6185_v33 }
 0x454   : > { %6194 = vst [vmem:[%s8776_s29 + $0x38] sm:$0xff] %v6186_v19  ;;  %vm6208_vm10 = vcmp.gt.f32.partialorder %v6186_v19, 0.0  ;;  %v6216_v37 = vmul.f32 0.2, %v6186_v19 }
 0x455   : > { %v6223_v6 = vsel %vm6207_vm8, %v6185_v33, %v6215_v34 }
 0x456   : > { %v6224_v30 = vsel %vm6208_vm10, %v6186_v19, %v6216_v37  ;;  %v7130_v27 = vpack.c.bf16 %v6223_v6, %v6221_v10 }
 0x457   : > { %v7128_v32 = vpack.c.bf16 %v6224_v30, %v6222_v24 }
 0x459   : > { %7129 = vmatprep.subr.bf16.mxu1 %v7128_v32 }
 0x45a   : > { %7131 = vmatpush1.bf16.msra.mxu1 %v7130_v27 }
 0x45d   : > { %6861 = vmatmul.mubr.msk.f32.vlgmr.msra.gmra.mrb[56].mxu1 %vm6248_vm11, %v6237_v0 }
 0x45e   : > { %7391 = shalt.err (!%p7388_p5)
}
 0x45f   : > { %s7392_s19 = scalar_lea.hbm %s8807_s3, 1024  ;;  %s7396_s1 = scalar_lea.hbm %s9034_s10, 2048 }
 0x460   : > { %p7393_p6 = scmp.ne.s32.totalorder %s8807_s3, %s7392_s19  ;;  %p7397_p10 = scmp.lt.u32.totalorder %s8807_s3, %s9034_s10 }
 0x461   : > { %p7398_p11 = scmp.lt.u32.totalorder %s7396_s1, %s7392_s19  ;;  %p7400_p13 = scmp.lt.u32.totalorder %s7392_s19, %s8807_s3 }
 0x462   : > { %p7394_p7 = pnand %p7393_p6, %p7672_p4 }
 0x463   : > { %p7399_p12 = por %p7398_p11, %p7397_p10 }
 0x464   : > { %p7395_p9 = pneg %p7394_p7 }
 0x465   : > { %p7401_p0 = por %p7400_p13, %p7399_p12 }
 0x467   : > { %p7402_p1 = pnand %p7401_p0, %p7395_p9 }
 0x469   : > { %7405 = shalt.err (!%p7402_p1)
}
 0x46a   : > { %s7556_s5 = smov 256   ;;  %s7557_s4 = smov 16  }
 0x46b   : > { %s9035_s6 = scalar_lea.sflag [#allocation6], %s8798_s0  ;;  %s8851_s29 = scalar_lea.hbm %s8978_s11, %s8801_s8 }
 0x46c   : > { %7246 = dma.vmem_to_hbm [thread:$0]  (%p7672_p4), %s8812_s18, 1024, %s8807_s3, %s9035_s6, %s7556_s5, %s7556_s5, %s7557_s4  }
 0x46d   : > { %s6377_s1 = sshll.u32 %s8757_s20, 4  ;;  %s6347_s2 = scalar_lea.sflag [#allocation4], %s8717_s22  ;;  %s8854_s1 = int_to_ptr.vmem [resolvable:$true] %s6377_s1 }
 0x46e   : > { %s7406_s7 = scalar_lea.vmem %s8854_s1, 1024  ;;  %s7558_s10 = smov [#allocation3]  }
 0x46f   : > { %p7407_p2 = scmp.ne.s32.totalorder %s8854_s1, %s7406_s7  ;;  %s7410_s30 = sshll.u32 %s7558_s10, 4  ;;  %s7411_s30 = int_to_ptr.vmem [resolvable:$false] %s7410_s30 }
 0x470   : > { %s7412_s3 = scalar_lea.vmem %s7411_s30, 2048  ;;  %p7413_p6 = scmp.lt.s32.totalorder %s8854_s1, %s7411_s30 }
 0x471   : > { %p7408_p3 = pnand %p7407_p2, %p7672_p4  ;;  %p7414_p7 = scmp.lt.s32.totalorder %s7412_s3, %s7406_s7 }
 0x473   : > { %p7409_p5 = pneg %p7408_p3  ;;  %p7415_p9 = por %p7414_p7, %p7413_p6 }
 0x475   : > { %p7416_p10 = pnand %p7415_p9, %p7409_p5 }
 0x477   : > { %7419 = shalt.err (!%p7416_p10)
}
 0x478   : > { %s7420_s20 = scalar_lea.hbm %s8818_s15, 1024  ;;  %s7424_s10 = scalar_lea.hbm %s8976_s9, 2048 }
 0x479   : > { %p7421_p11 = scmp.ne.s32.totalorder %s8818_s15, %s7420_s20  ;;  %p7425_p0 = scmp.lt.u32.totalorder %s8818_s15, %s8976_s9 }
 0x47a   : > { %p7426_p1 = scmp.lt.u32.totalorder %s7424_s10, %s7420_s20  ;;  %p7428_p3 = scmp.lt.u32.totalorder %s7420_s20, %s8818_s15 }
 0x47b   : > { %p7422_p12 = pnand %p7421_p11, %p7672_p4 }
 0x47c   : > { %p7427_p2 = por %p7426_p1, %p7425_p0 }
 0x47d   : > { %p7423_p13 = pneg %p7422_p12 }
 0x47e   : > { %p7429_p5 = por %p7428_p3, %p7427_p2 }
 0x480   : > { %p7430_p6 = pnand %p7429_p5, %p7423_p13 }
 0x482   : > { %7433 = shalt.err (!%p7430_p6)
}
 0x483   : > { %7245 = dma.vmem_to_hbm [thread:$0]  (%p7672_p4), %s8854_s1, 1024, %s8818_s15, %s6347_s2, %s7556_s5, %s7556_s5, %s7557_s4  }
 0x484   : > { %s7434_s7 = scalar_lea.vmem %s8809_s21, 1024  ;;  %s7559_s13 = smov [#allocation7]  }
 0x485   : > { %p7435_p7 = scmp.ne.s32.totalorder %s8809_s21, %s7434_s7  ;;  %s7438_s19 = sshll.u32 %s7559_s13, 4  ;;  %s7439_s19 = int_to_ptr.vmem [resolvable:$false] %s7438_s19 }
 0x486   : > { %s7440_s3 = scalar_lea.vmem %s7439_s19, 2048  ;;  %p7441_p11 = scmp.lt.s32.totalorder %s8809_s21, %s7439_s19 }
 0x487   : > { %p7436_p9 = pnand %p7435_p7, %p7672_p4  ;;  %p7442_p12 = scmp.lt.s32.totalorder %s7440_s3, %s7434_s7 }
 0x489   : > { %p7437_p10 = pneg %p7436_p9  ;;  %p7443_p13 = por %p7442_p12, %p7441_p11 }
 0x48b   : > { %p7444_p0 = pnand %p7443_p13, %p7437_p10 }
 0x48d   : > { %7447 = shalt.err (!%p7444_p0)
}
 0x48e   : > { %s7448_s15 = scalar_lea.hbm %s8851_s29, 1024  ;;  %s7452_s20 = scalar_lea.hbm %s8978_s11, 2048 }
 0x48f   : > { %p7449_p1 = scmp.ne.s32.totalorder %s8851_s29, %s7448_s15  ;;  %p7453_p5 = scmp.lt.u32.totalorder %s8851_s29, %s8978_s11 }
 0x490   : > { %p7454_p6 = scmp.lt.u32.totalorder %s7452_s20, %s7448_s15  ;;  %p7456_p9 = scmp.lt.u32.totalorder %s7448_s15, %s8851_s29 }
 0x491   : > { %p7450_p2 = pnand %p7449_p1, %p7672_p4 }
 0x492   : > { %p7455_p7 = por %p7454_p6, %p7453_p5 }
 0x493   : > { %p7451_p3 = pneg %p7450_p2 }
 0x494   : > { %p7457_p10 = por %p7456_p9, %p7455_p7 }
 0x496   : > { %p7458_p11 = pnand %p7457_p10, %p7451_p3 }
 0x498   : > { %7461 = shalt.err (!%p7458_p11)
}
 0x499   : > { %s9036_s10 = scalar_lea.sflag [#allocation6], %s8798_s0  ;;  %v6245_v12 = vshrl.u32 %v3582_v49, 7  ;;  %v7560_v36 = vmov 1966171168   ;;  %s6621_s6 = sshll.u32 %s8717_s22, 1  ;;  %vm6343_vm14 = vcmp.lt.s32.totalorder %v3582_v49, 256 }
 0x49a   : > { %7247 = dma.vmem_to_hbm [thread:$0]  (%p7672_p4), %s8809_s21, 1024, %s8851_s29, %s9036_s10, %s7556_s5, %s7556_s5, %s7557_s4   ;;  %v6327_v9 = vunpack.c.l.s4 %v7560_v36 }
 0x49b   : > { %v6246_v16 = vsub.s32 0, %v6245_v12  ;;  %s6879_s0 = sshll.u32 %s7540_s26, 5  ;;  %s466_s30 = scalar_lea.vmem [#allocation8], %s6621_s6 }
 0x49c   : > { %v6328_v43 = vunpack.c.0.s8 %v6327_v9  ;;  %s6432_s21 = sshll.u32 %s466_s30, 4  ;;  %s8917_s29 = scalar_lea.hbm %s8979_s12, %s6879_s0  ;;  %s8919_s21 = int_to_ptr.vmem [resolvable:$true] %s6432_s21 }
 0x49d   : > { %v6247_v14 = vrot.slane %v8719_v15, %v6246_v16  ;;  %s6362_s7 = scalar_lea.sflag [#allocation9], %s8717_s22  ;;  %s7462_s13 = scalar_lea.vmem %s8919_s21, 32 }
 0x49e   : > { %v6331_v3 = vsub.s32 %v6328_v43, %v6245_v12  ;;  %p7463_p12 = scmp.ne.s32.totalorder %s8919_s21, %s7462_s13  ;;  %s7561_s26 = smov [#allocation8]  }
 0x49f   : > { %s7466_s19 = sshll.u32 %s7561_s26, 4  ;;  %s7467_s19 = int_to_ptr.vmem [resolvable:$false] %s7466_s19 }
 0x4a0   : > { %p7464_p13 = pnand %p7463_p12, %p7672_p4  ;;  %s7468_s3 = scalar_lea.vmem %s7467_s19, 64 }
 0x4a1   : > { %p7469_p1 = scmp.lt.s32.totalorder %s8919_s21, %s7467_s19  ;;  %p7470_p2 = scmp.lt.s32.totalorder %s7468_s3, %s7462_s13 }
 0x4a2   : > { %p7465_p0 = pneg %p7464_p13 }
 0x4a3   : > { %p7471_p3 = por %p7470_p2, %p7469_p1 }
 0x4a5   : > { %p7472_p5 = pnand %p7471_p3, %p7465_p0 }
 0x530   : > { %v6318_v39 = vpop.f32.mrb[56].mxu1 }
 0x531   : > { %v6319_v40 = vadd.f32 %v6318_v39, %v6247_v14  ;;  %v6320_v45 = vpop.f32.mrb[57].mxu1 }
 0x532   : > { %v6321_v61 = vadd.f32 %v6320_v45, %v6247_v14 }
 0x534   : > { %v6325_v48 = vcombine.low %v6319_v40, %v6321_v61 }
 0x536   : > { %v6332_v58 = vrot.slane %v6325_v48, %v6331_v3 }
 0x538   : > { %v6339_v44 = vrot.slane %v6332_v58, %v6331_v3 }
 0x53a   : > { %6345 = vst.msk [vmem:[%s466_s30] sm:$0x3] %vm6343_vm14, %v6339_v44 }
 0x53b   : > { %7475 = shalt.err (!%p7472_p5)
}
 0x53c   : > { %s7476_s22 = scalar_lea.hbm %s8917_s29, 32  ;;  %s7480_s2 = scalar_lea.hbm %s8979_s12, 64 }
 0x53d   : > { %p7477_p6 = scmp.ne.s32.totalorder %s8917_s29, %s7476_s22  ;;  %p7481_p10 = scmp.lt.u32.totalorder %s8917_s29, %s8979_s12 }
 0x53e   : > { %p7482_p11 = scmp.lt.u32.totalorder %s7480_s2, %s7476_s22  ;;  %p7484_p13 = scmp.lt.u32.totalorder %s7476_s22, %s8917_s29 }
 0x53f   : > { %p7478_p7 = pnand %p7477_p6, %p7672_p4 }
 0x540   : > { %p7483_p12 = por %p7482_p11, %p7481_p10 }
 0x541   : > { %p7479_p9 = pneg %p7478_p7 }
 0x542   : > { %p7485_p0 = por %p7484_p13, %p7483_p12 }
 0x544   : > { %p7486_p1 = pnand %p7485_p0, %p7479_p9 }
 0x546   : > { %7489 = shalt.err (!%p7486_p1)
}
 0x547   : > { %7248 = dma.vmem_to_hbm [thread:$0]  (%p7672_p4), %s8919_s21, 32, %s8917_s29, %s6362_s7  }
 0x548 PF: > { %p7266_p2 = scmp.ge.s32.totalorder %s7548_s28, 2  ;;  %s6444_s18 = sand.u32 1, %s7528_s23  }
 0x549   : > { %s6445_s10 = scalar_lea.sflag [#allocation4], %s6444_s18 }
 0x54a   : > { %p7254_p3 = pnand %p7266_p2, %p7681_p8 }
 0x54c   : > { %7515 = dma.done.wait (!%p7254_p3), %s6445_s10, 1024  }
 0x54d   : > { %7517 = vsyncadd (!%p7254_p3), %s6445_s10, 4294966272  ;;  %s9037_s6 = sadd.s32 4294967294, %s7548_s28  }
 0x54e   : > { %s6453_s0 = sand.u32 1, %s9037_s6  }
 0x54f   : > { %s6454_s30 = scalar_lea.sflag [#allocation6], %s6453_s0 }
 0x550   : > { %7519 = dma.done.wait (!%p7254_p3), %s6454_s30, 2048  }
 0x551   : > { %7521 = vsyncadd (!%p7254_p3), %s6454_s30, 4294965248  ;;  %s6472_s14 = scalar_lea.sflag [#allocation9], %s6444_s18 }
 0x552   : > { %7523 = dma.done.wait (!%p7254_p3), %s6472_s14, 32  }
 0x553   : > { %7525 = vsyncadd (!%p7254_p3), %s6472_s14, 4294967264  ;;  %s34_s28 = sadd.s32 1, %s7548_s28   ;;  %s9038_s16 = sld [smem:[#allocation13_spill]] }
 0x554   : > { %p31_p4 = scmp.ge.s32.totalorder %s34_s28, 4   ;;  %s9039_s23 = smov %s7532_s24 }
 0x555   : > { %s9040_s24 = smov %s7536_s25  ;;  %s9041_s25 = smov %s7687_s17 }
 0x556   : > { %s9042_s26 = smov %s7544_s27  ;;  %33 = sbr.rel (!%p31_p4) target bundleno = 18 (0x12), region = 163 }
 0x559   : > { %s9043_s27 = smov %s9038_s16 }
 0x55d   :  { %6477 = vsyncpa [#allocation4], 1 }
 0x55e   :  { %6479 = vsyncpa [#allocation4 + $0x1], 1 }
 0x55f   :  { %6480 = vsyncpa [#allocation6], 1 }
 0x560   :  { %6482 = vsyncpa [#allocation6 + $0x1], 1 }
 0x561   :  { %6483 = vsyncpa [#allocation9], 1 }
 0x562   :  { %6485 = vsyncpa [#allocation9 + $0x1], 1 }

</bundles_post_ra>
